<compile_context>
chip_gen: v6e
topology: v6e:2x2x1
jax: 0.10.0
libtpu: 0.0.40
codegen_flags: <defaults>
</compile_context>

<pallas_src>
import jax
import jax.numpy as jnp
import numpy as np
from jax import lax
from jax.experimental import pallas as pl
from jax.experimental.pallas import tpu as pltpu


def _make_loop_kernel(h, w, c):
    h2, w2 = h // 2, w // 2

    def kernel(xp_ref, wf_ref, bf_ref, o_ref, col_ref, pool_ref):
        # --- im2col: 9 shifted (H, W, C) views of the padded image, packed as
        #     bf16 into the (H*W, 9*C) VMEM scratch (K laid out tap-major). ---
        for dy in range(3):
            for dx in range(3):
                t = dy * 3 + dx
                patch = xp_ref[0, dy:dy + h, dx:dx + w, :]          # (H, W, C) f32
                col_ref[:, t * c:(t + 1) * c] = (
                    patch.reshape(h * w, c).astype(jnp.bfloat16))

        # --- one MXU push: (H*W, 9C) @ (9C, 2C), f32 accumulate. ------------
        #     lanes [0,C)  = conv3x3, lanes [C,2C) = conv1x1 (centre tap only).
        z = jnp.dot(col_ref[...], wf_ref[...],
                    preferred_element_type=jnp.float32)             # (H*W, 2C)
        r = jnp.maximum(z + bf_ref[...], 0.0)                       # bias + relu
        y = r[:, :c] + r[:, c:]                                     # x1 + x2

        # --- fused 2x2 max-pool ---------------------------------------------
        # rows of y are ordered m = h*W + w, so H-pairs split off as a major
        # dim via a layout-safe (leading-dim) reshape; W-pairs are adjacent
        # sublanes, reduced with two stride-2 reads of the VMEM scratch.
        y4 = y.reshape(h2, 2, w, c)
        pool_ref[...] = jnp.maximum(y4[:, 0], y4[:, 1])             # pool along H
        o_ref[0] = jnp.maximum(
            pool_ref[:, pl.ds(0, w2, stride=2), :],                 # even W cols
            pool_ref[:, pl.ds(1, w2, stride=2), :],                 # odd  W cols
        ).astype(o_ref.dtype)

    return kernel


def loop_forward_pallas(x_nchw, params):
    n, c, h, w = x_nchw.shape
    h2, w2 = h // 2, w // 2

    # NCHW -> NHWC (C=64 on the lane dim) + padding=1 halo. The transpose and
    # pad fuse into one tiny XLA data-movement op at this size.
    x_nhwc = jnp.transpose(x_nchw, (0, 2, 3, 1))
    xp = jnp.pad(x_nhwc, ((0, 0), (1, 1), (1, 1), (0, 0)))

    # Fused weight: [ conv3x3 (im2col tap-major) | conv1x1 embedded at tap 4 ].
    w1r = jnp.transpose(params["w1"], (2, 3, 1, 0)).reshape(9 * c, c)   # (9C, C)
    w2m = jnp.transpose(params["w2"][:, :, 0, 0], (1, 0))               # (Cin, Cout)
    w2e = jnp.zeros((9 * c, c), jnp.float32).at[4 * c:5 * c].set(w2m)
    wf = jnp.concatenate([w1r, w2e], axis=1).astype(jnp.bfloat16)       # (9C, 2C)
    bf = jnp.concatenate([params["b1"], params["b2"]]).reshape(1, 2 * c)  # f32

    flops = 2 * (h * w) * (9 * c) * (2 * c) * n
    bytes_accessed = (n * (h + 2) * (w + 2) * c * 4          # padded activations
                      + 9 * c * 2 * c * 2 + 2 * c * 4        # fused weight + bias
                      + n * h2 * w2 * c * 4)                 # pooled output

    out_nhwc = pl.pallas_call(
        _make_loop_kernel(h, w, c),
        out_shape=jax.ShapeDtypeStruct((n, h2, w2, c), jnp.float32),
        grid=(n,),
        in_specs=[pl.BlockSpec((1, h + 2, w + 2, c), lambda i: (i, 0, 0, 0)),
                  pl.BlockSpec((9 * c, 2 * c), lambda i: (0, 0)),
                  pl.BlockSpec((1, 2 * c), lambda i: (0, 0))],
        out_specs=pl.BlockSpec((1, h2, w2, c), lambda i: (i, 0, 0, 0)),
        scratch_shapes=[pltpu.VMEM((h * w, 9 * c), jnp.bfloat16),   # im2col
                        pltpu.VMEM((h2, w, c), jnp.float32)],       # H-pooled rows
        compiler_params=pltpu.CompilerParams(
            dimension_semantics=("parallel",)),
        cost_estimate=pl.CostEstimate(flops=flops, transcendentals=0,
                                      bytes_accessed=bytes_accessed),
    )(xp, wf, bf)

    return jnp.transpose(out_nhwc, (0, 3, 1, 2))                    # back to NCHW


# ---------------------------------------------------------------------------
# Pure-JAX f32 reference (mirrors the PyTorch module) for validation.
# ---------------------------------------------------------------------------
def loop_forward_ref(x_nchw, p):
    dn = ("NCHW", "OIHW", "NCHW")
    hp = lax.Precision.HIGHEST
    c1 = lax.conv_general_dilated(x_nchw, p["w1"], (1, 1), ((1, 1), (1, 1)),
                                  dimension_numbers=dn, precision=hp)
    c2 = lax.conv_general_dilated(x_nchw, p["w2"], (1, 1), "VALID",
                                  dimension_numbers=dn, precision=hp)
    x1 = jax.nn.relu(c1 + p["b1"][None, :, None, None])
    x2 = jax.nn.relu(c2 + p["b2"][None, :, None, None])
    s = x1 + x2
    return lax.reduce_window(s, -jnp.inf, lax.max,
                             (1, 1, 2, 2), (1, 1, 2, 2), "VALID")


if __name__ == "__main__":
    key = jax.random.PRNGKey(0)
    keys = jax.random.split(key, 5)
    c = 64  # Loop() is Conv2d(64, 64, ...) so the channel count is fixed at 64.
    params = {
        "w1": jax.random.normal(keys[0], (c, c, 3, 3), jnp.float32) * 0.05,
        "b1": jax.random.normal(keys[1], (c,), jnp.float32) * 0.05,
        "w2": jax.random.normal(keys[2], (c, c, 1, 1), jnp.float32) * 0.05,
        "b2": jax.random.normal(keys[3], (c,), jnp.float32) * 0.05,
    }
    x = jax.random.normal(keys[4], (2, c, 16, 16), jnp.float32)

    fwd = jax.jit(loop_forward_pallas)
    out = jax.block_until_ready(fwd(x, params))
    assert out.shape == (2, c, 8, 8)

    ref = loop_forward_ref(x, params)
    # bf16 matmul inputs with f32 accumulation -> loose-ish tolerance.
    np.testing.assert_allclose(np.asarray(out), np.asarray(ref),
                               rtol=5e-2, atol=5e-2)
    print("KERNEL_OK")
</pallas_src>

<mosaic_0001>
module attributes {stable_mosaic.version = 11 : i64} {
  func.func @kernel(%arg0: i32, %arg1: memref<1x18x18x64xf32, #tpu.memory_space<vmem>>, %arg2: memref<576x128xbf16, #tpu.memory_space<vmem>>, %arg3: memref<1x128xf32, #tpu.memory_space<vmem>>, %arg4: memref<1x8x8x64xf32, #tpu.memory_space<vmem>>, %arg5: memref<256x576xbf16, #tpu.memory_space<vmem>>, %arg6: memref<8x16x64xf32, #tpu.memory_space<vmem>>) attributes {dimension_semantics = [#tpu.dimension_semantics<parallel>], iteration_bounds = array<i64: 2>, scalar_prefetch = 0 : i64, scratch_operands = 2 : i64, tpu.core_type = #tpu.core_type<tc>, window_params = [{transform_indices = @transform_0, window_bounds = array<i64: 1, 18, 18, 64>}, {pipeline_mode = #tpu.pipeline_mode<synchronous>, transform_indices = @transform_1, window_bounds = array<i64: 576, 128>}, {pipeline_mode = #tpu.pipeline_mode<synchronous>, transform_indices = @transform_2, window_bounds = array<i64: 1, 128>}, {transform_indices = @transform_3, window_bounds = array<i64: 1, 8, 8, 64>}]} {
    %c0 = arith.constant 0 : index
    %c0_0 = arith.constant 0 : index
    %c0_1 = arith.constant 0 : index
    %c0_2 = arith.constant 0 : index
    %0 = vector.load %arg1[%c0, %c0_0, %c0_1, %c0_2] : memref<1x18x18x64xf32, #tpu.memory_space<vmem>>, vector<1x16x16x64xf32>
    %1 = vector.shape_cast %0 : vector<1x16x16x64xf32> to vector<16x16x64xf32>
    %2 = vector.shape_cast %1 : vector<16x16x64xf32> to vector<256x64xf32>
    %3 = arith.truncf %2 : vector<256x64xf32> to vector<256x64xbf16>
    %c0_3 = arith.constant 0 : index
    %c0_4 = arith.constant 0 : index
    %4 = vector.load %arg5[%c0_3, %c0_4] : memref<256x576xbf16, #tpu.memory_space<vmem>>, vector<256x64xbf16>
    tpu.vector_store %arg5[%c0_3, %c0_4], %3 {strides = array<i32>} : memref<256x576xbf16, #tpu.memory_space<vmem>>, vector<256x64xbf16>,
    %c0_5 = arith.constant 0 : index
    %c0_6 = arith.constant 0 : index
    %c1 = arith.constant 1 : index
    %c0_7 = arith.constant 0 : index
    %5 = vector.load %arg1[%c0_5, %c0_6, %c1, %c0_7] : memref<1x18x18x64xf32, #tpu.memory_space<vmem>>, vector<1x16x16x64xf32>
    %6 = vector.shape_cast %5 : vector<1x16x16x64xf32> to vector<16x16x64xf32>
    %7 = vector.shape_cast %6 : vector<16x16x64xf32> to vector<256x64xf32>
    %8 = arith.truncf %7 : vector<256x64xf32> to vector<256x64xbf16>
    %c0_8 = arith.constant 0 : index
    %c64 = arith.constant 64 : index
    %9 = vector.load %arg5[%c0_8, %c64] : memref<256x576xbf16, #tpu.memory_space<vmem>>, vector<256x64xbf16>
    tpu.vector_store %arg5[%c0_8, %c64], %8 {strides = array<i32>} : memref<256x576xbf16, #tpu.memory_space<vmem>>, vector<256x64xbf16>,
    %c0_9 = arith.constant 0 : index
    %c0_10 = arith.constant 0 : index
    %c2 = arith.constant 2 : index
    %c0_11 = arith.constant 0 : index
    %10 = vector.load %arg1[%c0_9, %c0_10, %c2, %c0_11] : memref<1x18x18x64xf32, #tpu.memory_space<vmem>>, vector<1x16x16x64xf32>
    %11 = vector.shape_cast %10 : vector<1x16x16x64xf32> to vector<16x16x64xf32>
    %12 = vector.shape_cast %11 : vector<16x16x64xf32> to vector<256x64xf32>
    %13 = arith.truncf %12 : vector<256x64xf32> to vector<256x64xbf16>
    %c0_12 = arith.constant 0 : index
    %c128 = arith.constant 128 : index
    %14 = vector.load %arg5[%c0_12, %c128] : memref<256x576xbf16, #tpu.memory_space<vmem>>, vector<256x64xbf16>
    tpu.vector_store %arg5[%c0_12, %c128], %13 {strides = array<i32>} : memref<256x576xbf16, #tpu.memory_space<vmem>>, vector<256x64xbf16>,
    %c0_13 = arith.constant 0 : index
    %c1_14 = arith.constant 1 : index
    %c0_15 = arith.constant 0 : index
    %c0_16 = arith.constant 0 : index
    %15 = vector.load %arg1[%c0_13, %c1_14, %c0_15, %c0_16] : memref<1x18x18x64xf32, #tpu.memory_space<vmem>>, vector<1x16x16x64xf32>
    %16 = vector.shape_cast %15 : vector<1x16x16x64xf32> to vector<16x16x64xf32>
    %17 = vector.shape_cast %16 : vector<16x16x64xf32> to vector<256x64xf32>
    %18 = arith.truncf %17 : vector<256x64xf32> to vector<256x64xbf16>
    %c0_17 = arith.constant 0 : index
    %c192 = arith.constant 192 : index
    %19 = vector.load %arg5[%c0_17, %c192] : memref<256x576xbf16, #tpu.memory_space<vmem>>, vector<256x64xbf16>
    tpu.vector_store %arg5[%c0_17, %c192], %18 {strides = array<i32>} : memref<256x576xbf16, #tpu.memory_space<vmem>>, vector<256x64xbf16>,
    %c0_18 = arith.constant 0 : index
    %c1_19 = arith.constant 1 : index
    %c1_20 = arith.constant 1 : index
    %c0_21 = arith.constant 0 : index
    %20 = vector.load %arg1[%c0_18, %c1_19, %c1_20, %c0_21] : memref<1x18x18x64xf32, #tpu.memory_space<vmem>>, vector<1x16x16x64xf32>
    %21 = vector.shape_cast %20 : vector<1x16x16x64xf32> to vector<16x16x64xf32>
    %22 = vector.shape_cast %21 : vector<16x16x64xf32> to vector<256x64xf32>
    %23 = arith.truncf %22 : vector<256x64xf32> to vector<256x64xbf16>
    %c0_22 = arith.constant 0 : index
    %c256 = arith.constant 256 : index
    %24 = vector.load %arg5[%c0_22, %c256] : memref<256x576xbf16, #tpu.memory_space<vmem>>, vector<256x64xbf16>
    tpu.vector_store %arg5[%c0_22, %c256], %23 {strides = array<i32>} : memref<256x576xbf16, #tpu.memory_space<vmem>>, vector<256x64xbf16>,
    %c0_23 = arith.constant 0 : index
    %c1_24 = arith.constant 1 : index
    %c2_25 = arith.constant 2 : index
    %c0_26 = arith.constant 0 : index
    %25 = vector.load %arg1[%c0_23, %c1_24, %c2_25, %c0_26] : memref<1x18x18x64xf32, #tpu.memory_space<vmem>>, vector<1x16x16x64xf32>
    %26 = vector.shape_cast %25 : vector<1x16x16x64xf32> to vector<16x16x64xf32>
    %27 = vector.shape_cast %26 : vector<16x16x64xf32> to vector<256x64xf32>
    %28 = arith.truncf %27 : vector<256x64xf32> to vector<256x64xbf16>
    %c0_27 = arith.constant 0 : index
    %c320 = arith.constant 320 : index
    %29 = vector.load %arg5[%c0_27, %c320] : memref<256x576xbf16, #tpu.memory_space<vmem>>, vector<256x64xbf16>
    tpu.vector_store %arg5[%c0_27, %c320], %28 {strides = array<i32>} : memref<256x576xbf16, #tpu.memory_space<vmem>>, vector<256x64xbf16>,
    %c0_28 = arith.constant 0 : index
    %c2_29 = arith.constant 2 : index
    %c0_30 = arith.constant 0 : index
    %c0_31 = arith.constant 0 : index
    %30 = vector.load %arg1[%c0_28, %c2_29, %c0_30, %c0_31] : memref<1x18x18x64xf32, #tpu.memory_space<vmem>>, vector<1x16x16x64xf32>
    %31 = vector.shape_cast %30 : vector<1x16x16x64xf32> to vector<16x16x64xf32>
    %32 = vector.shape_cast %31 : vector<16x16x64xf32> to vector<256x64xf32>
    %33 = arith.truncf %32 : vector<256x64xf32> to vector<256x64xbf16>
    %c0_32 = arith.constant 0 : index
    %c384 = arith.constant 384 : index
    %34 = vector.load %arg5[%c0_32, %c384] : memref<256x576xbf16, #tpu.memory_space<vmem>>, vector<256x64xbf16>
    tpu.vector_store %arg5[%c0_32, %c384], %33 {strides = array<i32>} : memref<256x576xbf16, #tpu.memory_space<vmem>>, vector<256x64xbf16>,
    %c0_33 = arith.constant 0 : index
    %c2_34 = arith.constant 2 : index
    %c1_35 = arith.constant 1 : index
    %c0_36 = arith.constant 0 : index
    %35 = vector.load %arg1[%c0_33, %c2_34, %c1_35, %c0_36] : memref<1x18x18x64xf32, #tpu.memory_space<vmem>>, vector<1x16x16x64xf32>
    %36 = vector.shape_cast %35 : vector<1x16x16x64xf32> to vector<16x16x64xf32>
    %37 = vector.shape_cast %36 : vector<16x16x64xf32> to vector<256x64xf32>
    %38 = arith.truncf %37 : vector<256x64xf32> to vector<256x64xbf16>
    %c0_37 = arith.constant 0 : index
    %c448 = arith.constant 448 : index
    %39 = vector.load %arg5[%c0_37, %c448] : memref<256x576xbf16, #tpu.memory_space<vmem>>, vector<256x64xbf16>
    tpu.vector_store %arg5[%c0_37, %c448], %38 {strides = array<i32>} : memref<256x576xbf16, #tpu.memory_space<vmem>>, vector<256x64xbf16>,
    %c0_38 = arith.constant 0 : index
    %c2_39 = arith.constant 2 : index
    %c2_40 = arith.constant 2 : index
    %c0_41 = arith.constant 0 : index
    %40 = vector.load %arg1[%c0_38, %c2_39, %c2_40, %c0_41] : memref<1x18x18x64xf32, #tpu.memory_space<vmem>>, vector<1x16x16x64xf32>
    %41 = vector.shape_cast %40 : vector<1x16x16x64xf32> to vector<16x16x64xf32>
    %42 = vector.shape_cast %41 : vector<16x16x64xf32> to vector<256x64xf32>
    %43 = arith.truncf %42 : vector<256x64xf32> to vector<256x64xbf16>
    %c0_42 = arith.constant 0 : index
    %c512 = arith.constant 512 : index
    %44 = vector.load %arg5[%c0_42, %c512] : memref<256x576xbf16, #tpu.memory_space<vmem>>, vector<256x64xbf16>
    tpu.vector_store %arg5[%c0_42, %c512], %43 {strides = array<i32>} : memref<256x576xbf16, #tpu.memory_space<vmem>>, vector<256x64xbf16>,
    %c0_43 = arith.constant 0 : index
    %c0_44 = arith.constant 0 : index
    %45 = vector.load %arg5[%c0_43, %c0_44] : memref<256x576xbf16, #tpu.memory_space<vmem>>, vector<256x576xbf16>
    %c0_45 = arith.constant 0 : index
    %c0_46 = arith.constant 0 : index
    %46 = vector.load %arg2[%c0_45, %c0_46] : memref<576x128xbf16, #tpu.memory_space<vmem>>, vector<576x128xbf16>
    %cst = arith.constant dense<0.000000e+00> : vector<256x128xf32>
    %47 = tpu.matmul %45, %46, %cst {dimension_numbers = #tpu.dot_dimension_numbers<[1], [0], [0], [1], [0, 0, 1, 1], [], []>} : vector<256x576xbf16>, vector<576x128xbf16>, vector<256x128xf32> -> vector<256x128xf32>
    %c0_47 = arith.constant 0 : index
    %c0_48 = arith.constant 0 : index
    %48 = vector.load %arg3[%c0_47, %c0_48] : memref<1x128xf32, #tpu.memory_space<vmem>>, vector<1x128xf32>
    %49 = vector.broadcast %48 : vector<1x128xf32> to vector<256x128xf32>
    %50 = arith.addf %47, %49 : vector<256x128xf32>
    %cst_49 = arith.constant 0.000000e+00 : f32
    %51 = vector.broadcast %cst_49 : f32 to vector<256x128xf32>
    %52 = arith.maximumf %50, %51 : vector<256x128xf32>
    %53 = vector.extract_strided_slice %52 {offsets = [0, 0], sizes = [256, 64], strides = [1, 1]} : vector<256x128xf32> to vector<256x64xf32>
    %54 = vector.extract_strided_slice %52 {offsets = [0, 64], sizes = [256, 64], strides = [1, 1]} : vector<256x128xf32> to vector<256x64xf32>
    %55 = arith.addf %53, %54 : vector<256x64xf32>
    %56 = vector.shape_cast %55 : vector<256x64xf32> to vector<8x2x16x64xf32>
    %57 = vector.extract_strided_slice %56 {offsets = [0, 0, 0, 0], sizes = [8, 1, 16, 64], strides = [1, 1, 1, 1]} : vector<8x2x16x64xf32> to vector<8x1x16x64xf32>
    %58 = vector.shape_cast %57 : vector<8x1x16x64xf32> to vector<8x16x64xf32>
    %59 = vector.extract_strided_slice %56 {offsets = [0, 1, 0, 0], sizes = [8, 1, 16, 64], strides = [1, 1, 1, 1]} : vector<8x2x16x64xf32> to vector<8x1x16x64xf32>
    %60 = vector.shape_cast %59 : vector<8x1x16x64xf32> to vector<8x16x64xf32>
    %61 = arith.maximumf %58, %60 : vector<8x16x64xf32>
    %c0_50 = arith.constant 0 : index
    %c0_51 = arith.constant 0 : index
    %c0_52 = arith.constant 0 : index
    %62 = vector.load %arg6[%c0_50, %c0_51, %c0_52] : memref<8x16x64xf32, #tpu.memory_space<vmem>>, vector<8x16x64xf32>
    tpu.vector_store %arg6[%c0_50, %c0_51, %c0_52], %61 {strides = array<i32>} : memref<8x16x64xf32, #tpu.memory_space<vmem>>, vector<8x16x64xf32>,
    %c0_53 = arith.constant 0 : index
    %c0_54 = arith.constant 0 : index
    %c0_55 = arith.constant 0 : index
    %63 = tpu.strided_load %arg6[%c0_53, %c0_54, %c0_55] {strides = array<i32: 1, 2, 1>} : memref<8x16x64xf32, #tpu.memory_space<vmem>>, vector<8x8x64xf32>
    %c0_56 = arith.constant 0 : index
    %c1_57 = arith.constant 1 : index
    %c0_58 = arith.constant 0 : index
    %64 = tpu.strided_load %arg6[%c0_56, %c1_57, %c0_58] {strides = array<i32: 1, 2, 1>} : memref<8x16x64xf32, #tpu.memory_space<vmem>>, vector<8x8x64xf32>
    %65 = arith.maximumf %63, %64 : vector<8x8x64xf32>
    %c0_59 = arith.constant 0 : index
    %c0_60 = arith.constant 0 : index
    %c0_61 = arith.constant 0 : index
    %c0_62 = arith.constant 0 : index
    %66 = vector.load %arg4[%c0_59, %c0_60, %c0_61, %c0_62] : memref<1x8x8x64xf32, #tpu.memory_space<vmem>>, vector<1x8x8x64xf32>
    %67 = vector.shape_cast %66 : vector<1x8x8x64xf32> to vector<8x8x64xf32>
    %68 = vector.shape_cast %65 : vector<8x8x64xf32> to vector<1x8x8x64xf32>
    tpu.vector_store %arg4[%c0_59, %c0_60, %c0_61, %c0_62], %68 {strides = array<i32>} : memref<1x8x8x64xf32, #tpu.memory_space<vmem>>, vector<1x8x8x64xf32>,
    return
  }
  func.func @transform_0(%arg0: i32) -> (i32, i32, i32, i32) {
    %c0_i32 = arith.constant 0 : i32
    %c0_i32_0 = arith.constant 0 : i32
    %c0_i32_1 = arith.constant 0 : i32
    %c0_i32_2 = arith.constant 0 : i32
    return %arg0, %c0_i32, %c0_i32_0, %c0_i32_1 : i32, i32, i32, i32
  }
  func.func @transform_1(%arg0: i32) -> (i32, i32) {
    %c0_i32 = arith.constant 0 : i32
    %c0_i32_0 = arith.constant 0 : i32
    %c0_i32_1 = arith.constant 0 : i32
    return %c0_i32, %c0_i32_0 : i32, i32
  }
  func.func @transform_2(%arg0: i32) -> (i32, i32) {
    %c0_i32 = arith.constant 0 : i32
    %c0_i32_0 = arith.constant 0 : i32
    %c0_i32_1 = arith.constant 0 : i32
    return %c0_i32, %c0_i32_0 : i32, i32
  }
  func.func @transform_3(%arg0: i32) -> (i32, i32, i32, i32) {
    %c0_i32 = arith.constant 0 : i32
    %c0_i32_0 = arith.constant 0 : i32
    %c0_i32_1 = arith.constant 0 : i32
    %c0_i32_2 = arith.constant 0 : i32
    return %arg0, %c0_i32, %c0_i32_0, %c0_i32_1 : i32, i32, i32, i32
  }
}

</mosaic_0001>

<bundles_post_ra>
// kernel: loop_forward_pallas.1
= control target key start
LH: loop header
LB: loop body
LE: loop exit
PB: predicated region body
PF: predicated region fallthrough
CT: control target
= control target key end

     0   :  { %8 = vsyncpa [#allocation5], 0  ;;  %s6942_s0 = inlined_call_operand.vmem [shape: f32[2,18,18,64], index: 0, kind: input, shape index: {}]   ;;  %s6943_s1 = inlined_call_operand.vmem [shape: bf16[576,128], index: 1, kind: input, shape index: {}]   ;;  %s6944_s2 = inlined_call_operand.vmem [shape: f32[1,128], index: 2, kind: input, shape index: {}]   ;;  %s6945_s3 = inlined_call_operand.hbm [shape: f32[2,8,8,64], index: 3, kind: output, shape index: {}]  }
   0x1   :  { %10 = vsyncpa [#allocation5 + $0x1], 0  ;;  %s5289_s12 = smov 0   ;;  %s5291_s13 = smov 0  }
   0x2   :  { %s5293_s14 = smov 0   ;;  %s5295_s15 = smov 0  }
   0x3 LB: > { %s5310_s16 = sadd.s32 4294967295, %s5263_s15   ;;  %s3828_s17 = sadd.s32 4294967294, %s5263_s15   ;;  %s5263_s15 = sphi %s5295_s15, %s7013_s15   ;;  %s5259_s14 = sphi %s5293_s14, %s7012_s14   ;;  %s5255_s13 = sphi %s5291_s13, %s7011_s13   ;;  %s5251_s12 = sphi %s5289_s12, %s7010_s12  }
   0x4   : > { %s5314_s18 = sadd.s32 1, %s5263_s15   ;;  %s91_s19 = sadd.s32 1, %s5259_s14 }
   0x5   : > { %s88_s20 = ssub.s32 %s5263_s15, %s5314_s18  ;;  %p101_p0 = scmp.ne.s32.totalorder %s5259_s14, %s5255_s13 }
   0x6   : > { %p89_p1 = scmp.eq.s32.totalorder %s88_s20, 0  ;;  %p102_p2 = scmp.eq.s32.totalorder %s5310_s16, 1 }
   0x7   : > { %p107_p3 = scmp.ne.s32.totalorder %s5255_s13, %s5251_s12  ;;  %p108_p4 = scmp.eq.s32.totalorder %s3828_s17, 1 }
   0x8   : > { %s5325_s21 = scalar_select %p89_p1, %s5259_s14, %s91_s19  }
   0x9   : > { %p5327_p5 = por %p102_p2, %p101_p0  ;;  %p5331_p6 = por %p108_p4, %p107_p3 }
   0xa   : > { %p3831_p7 = scmp.ge.s32.totalorder %s5263_s15, 1  ;;  %p140_p8 = scmp.lt.s32.totalorder %s5263_s15, 3 }
   0xc   : > { %p141_p9 = pnand %p3831_p7, %p140_p8 }
   0xe   : > { %144 = sbr.rel (%p141_p9) target bundleno = 756 (0x2f4), region = 32 }
  0x13   : > { %p164_p10 = scmp.lt.s32.totalorder %s5310_s16, 1  ;;  %v5084_v0 = vld [vmem:[%s6943_s1 + $0x78] sm:$0xff]   ;;  %v5086_v2 = vld [vmem:[%s6943_s1 + $0x70] sm:$0xff]   ;;  %v5088_v4 = vld [vmem:[%s6943_s1 + $0x68] sm:$0xff]   ;;  %vm330_vm0 = vcmask 519168   ;;  %s5265_s20 = smov 64  }
  0x14   : > { %v5085_v1 = vld [vmem:[%s6943_s1 + $0x38] sm:$0xff]   ;;  %5025 = vmatprep.subr.bf16.mxu1 %v5084_v0  ;;  %4741 = vmatprep.subr.bf16.mxu0 %v5084_v0  ;;  %v5087_v3 = vld [vmem:[%s6943_s1 + $0x30] sm:$0xff]   ;;  %v5089_v12 = vld [vmem:[%s6943_s1 + $0x28] sm:$0xff]   ;;  %vm587_vm1 = vcmask 1043968   ;;  %vm2949_vm2 = vcmask 523264   ;;  %s4740_s19 = sshll.u32 %s5310_s16, 10 }
  0x15   : > { %s165_s26 = scalar_select %p164_p10, %s5310_s16, 1  ;;  %5033 = vmatpush3.bf16.msra.mxu1 %v5085_v1  ;;  %4742 = vmatpush3.bf16.msra.mxu0 %v5085_v1  ;;  %v5090_v56 = vld [vmem:[%s6943_s1 + $0x60] sm:$0xff]   ;;  %v5092_v62 = vld [vmem:[%s6943_s1 + $0x58] sm:$0xff]  }
  0x16   : > { %5026 = vmatprep.subr.bf16.mxu1 %v5086_v2  ;;  %4743 = vmatprep.subr.bf16.mxu0 %v5086_v2  ;;  %v5091_v57 = vld [vmem:[%s6943_s1 + $0x20] sm:$0xff]   ;;  %s6894_s27 = scalar_lea.hbm %s6945_s3, %s4740_s19  ;;  %s5266_s29 = smov [#allocation4]  }
  0x17   : > { %s5041_s4 = smul.u32 432, %s165_s26  ;;  %s5207_s30 = sshll.u32 %s5266_s29, 4  ;;  %s5208_s30 = int_to_ptr.vmem [resolvable:$false] %s5207_s30 }
  0x19   : > { %s5357_s11 = scalar_lea.vmem %s6942_s0, %s5041_s4  ;;  %5034 = vmatpush3.bf16.msra.mxu1 %v5087_v3  ;;  %4744 = vmatpush3.bf16.msra.mxu0 %v5087_v3  ;;  %v5093_v3 = vld [vmem:[%s6943_s1 + $0x18] sm:$0xff]   ;;  %s5209_s4 = scalar_lea.vmem %s5208_s30, 2048 }
  0x1a   : > { %v3954_v5 = vld [vmem:[%s5357_s11 + $0x138] sm:$0xff]  ;;  %v387_v6 = vld [vmem:[%s5357_s11 + $0x121] sm:$0xff]  ;;  %v388_v11 = vld [vmem:[%s5357_s11 + $0x129] sm:$0xff]  ;;  %5027 = vmatprep.subr.bf16.mxu1 %v5088_v4  ;;  %4745 = vmatprep.subr.bf16.mxu0 %v5088_v4 }
  0x1b   : > { %v3955_v7 = vld [vmem:[%s5357_s11 + $0x140] sm:$0xff]  ;;  %v4572_v8 = vpack.c.bf16 %v3954_v5, %v3954_v5  ;;  %v4508_v9 = vpack.c.bf16 %v387_v6, %v387_v6  ;;  %v3930_v14 = vld [vmem:[%s5357_s11 + $0x18] sm:$0xff]  ;;  %v4509_v15 = vpack.c.bf16 %v388_v11, %v388_v11  ;;  %v364_v16 = vld [vmem:[%s5357_s11 + $0x9] sm:$0xff] }
  0x1c   : > { %v4573_v10 = vpack.c.bf16 %v3955_v7, %v3955_v7  ;;  %v3931_v13 = vld [vmem:[%s5357_s11 + $0x20] sm:$0xff]  ;;  %v4548_v18 = vpack.c.bf16 %v3930_v14, %v3930_v14  ;;  %v3957_v19 = vld [vmem:[%s5357_s11 + $0x158] sm:$0xff]  ;;  %v3956_v22 = vld [vmem:[%s5357_s11 + $0x150] sm:$0xff]  ;;  %v4485_v26 = vpack.c.bf16 %v364_v16, %v364_v16 }
  0x1d   : > { %989 = vrot.lane.b32.xlu1 %v4572_v8, %s5265_s20  ;;  %539 = vrot.lane.b32.xlu0 %v4508_v9, %s5265_s20  ;;  %v4549_v17 = vpack.c.bf16 %v3931_v13, %v3931_v13  ;;  %357 = vst.msk [vmem:[#allocation2 + $0x208] sm:$0xf] %vm330_vm0, %v4572_v8  ;;  %v363_v20 = vld [vmem:[%s5357_s11 + $0x1] sm:$0xff]  ;;  %v5375_v21 = vpack.c.bf16 %v3957_v19, %v3957_v19  ;;  %v3933_v24 = vld [vmem:[%s5357_s11 + $0x38] sm:$0xff] }
  0x1e   : > { %358 = vst.msk [vmem:[#allocation2 + $0x21c] sm:$0xf] %vm330_vm0, %v4573_v10  ;;  %v5378_v23 = vpack.c.bf16 %v3956_v22, %v3956_v22  ;;  %v3932_v25 = vld [vmem:[%s5357_s11 + $0x30] sm:$0xff]  ;;  %5035 = vmatpush3.bf16.msra.mxu1 %v5089_v12  ;;  %4746 = vmatpush3.bf16.msra.mxu0 %v5089_v12  ;;  %333 = vst.msk [vmem:[#allocation2 + $0x28] sm:$0xf] %vm330_vm0, %v4548_v18  ;;  %v5384_v27 = vpack.c.bf16 %v3933_v24, %v3933_v24  ;;  %v3958_v30 = vld [vmem:[%s5357_s11 + $0x168] sm:$0xff] }
  0x1f   : > { %334 = vst.msk [vmem:[#allocation2 + $0x3c] sm:$0xf] %vm330_vm0, %v4549_v17  ;;  %v5386_v28 = vpack.c.bf16 %v3932_v25, %v3932_v25  ;;  %v3959_v29 = vld [vmem:[%s5357_s11 + $0x170] sm:$0xff]  ;;  %360 = vst.msk [vmem:[#allocation2 + $0x244] sm:$0xf] %vm330_vm0, %v5375_v21  ;;  %v4484_v31 = vpack.c.bf16 %v363_v20, %v363_v20  ;;  %v5396_v33 = vpack.c.bf16 %v3958_v30, %v3958_v30  ;;  %v3934_v35 = vld [vmem:[%s5357_s11 + $0x48] sm:$0xff]  ;;  %5028 = vmatprep.subr.bf16.mxu1 %v5090_v56 }
  0x20   : > { %v5394_v32 = vpack.c.bf16 %v3959_v29, %v3959_v29  ;;  %359 = vst.msk [vmem:[#allocation2 + $0x230] sm:$0xf] %vm330_vm0, %v5378_v23  ;;  %v3935_v34 = vld [vmem:[%s5357_s11 + $0x50] sm:$0xff]  ;;  %336 = vst.msk [vmem:[#allocation2 + $0x64] sm:$0xf] %vm330_vm0, %v5384_v27  ;;  %v5408_v37 = vpack.c.bf16 %v3934_v35, %v3934_v35  ;;  %v4059_v38 = vld [vmem:[%s5357_s11 + $0x22] sm:$0xff]  ;;  %4747 = vmatprep.subr.bf16.mxu0 %v5090_v56 }
  0x21   : > { %991 = vrot.lane.b32.xlu1 %v4573_v10, %s5265_s20  ;;  %541 = vrot.lane.b32.xlu0 %v4509_v15, %s5265_s20  ;;  %335 = vst.msk [vmem:[#allocation2 + $0x50] sm:$0xf] %vm330_vm0, %v5386_v28  ;;  %v5406_v36 = vpack.c.bf16 %v3935_v34, %v3935_v34  ;;  %361 = vst.msk [vmem:[#allocation2 + $0x258] sm:$0xf] %vm330_vm0, %v5396_v33  ;;  %v390_v39 = vld [vmem:[%s5357_s11 + $0x141] sm:$0xff]  ;;  %v389_v40 = vld [vmem:[%s5357_s11 + $0x139] sm:$0xff]  ;;  %v5423_v41 = vpack.c.bf16 %v4059_v38, %v4059_v38 }
  0x22   : > { %362 = vst.msk [vmem:[#allocation2 + $0x26c] sm:$0xf] %vm330_vm0, %v5394_v32  ;;  %337 = vst.msk [vmem:[#allocation2 + $0x78] sm:$0xf] %vm330_vm0, %v5408_v37  ;;  %v4058_v42 = vld [vmem:[%s5357_s11 + $0x1a] sm:$0xff]  ;;  %v4060_v46 = vld [vmem:[%s5357_s11 + $0x32] sm:$0xff]  ;;  %v4511_v47 = vpack.c.bf16 %v390_v39, %v390_v39  ;;  %v4510_v48 = vpack.c.bf16 %v389_v40, %v389_v40  ;;  %5036 = vmatpush3.bf16.msra.mxu1 %v5091_v57  ;;  %4748 = vmatpush3.bf16.msra.mxu0 %v5091_v57 }
  0x23   : > { %338 = vst.msk [vmem:[#allocation2 + $0x8c] sm:$0xf] %vm330_vm0, %v5406_v36  ;;  %v5426_v43 = vpack.c.bf16 %v4058_v42, %v4058_v42  ;;  %v4061_v44 = vld [vmem:[%s5357_s11 + $0x3a] sm:$0xff]  ;;  %783 = vst.msk [vmem:[#allocation2 + $0x40] sm:$0xf] %vm330_vm0, %v5423_v41  ;;  %v5436_v49 = vpack.c.bf16 %v4060_v46, %v4060_v46  ;;  %v4063_v50 = vld [vmem:[%s5357_s11 + $0x52] sm:$0xff]  ;;  %5029 = vmatprep.subr.bf16.mxu1 %v5092_v62  ;;  %4749 = vmatprep.subr.bf16.mxu0 %v5092_v62 }
  0x24   : > { %v5429_v45 = vpack.c.bf16 %v4061_v44, %v4061_v44  ;;  %v4062_v51 = vld [vmem:[%s5357_s11 + $0x4a] sm:$0xff]  ;;  %v5444_v52 = vpack.c.bf16 %v4063_v50, %v4063_v50  ;;  %v366_v54 = vld [vmem:[%s5357_s11 + $0x21] sm:$0xff]  ;;  %v365_v55 = vld [vmem:[%s5357_s11 + $0x19] sm:$0xff] }
  0x25   : > { %493 = vrot.lane.b32.xlu1 %v4485_v26, %s5265_s20  ;;  %491 = vrot.lane.b32.xlu0 %v4484_v31, %s5265_s20  ;;  %782 = vst.msk [vmem:[#allocation2 + $0x2c] sm:$0xf] %vm330_vm0, %v5426_v43  ;;  %v5446_v53 = vpack.c.bf16 %v4062_v51, %v4062_v51  ;;  %784 = vst.msk [vmem:[#allocation2 + $0x54] sm:$0xf] %vm330_vm0, %v5436_v49  ;;  %v4065_v58 = vld [vmem:[%s5357_s11 + $0x6a] sm:$0xff]  ;;  %v4064_v60 = vld [vmem:[%s5357_s11 + $0x62] sm:$0xff]  ;;  %v4487_v4 = vpack.c.bf16 %v366_v54, %v366_v54 }
  0x26   : > { %785 = vst.msk [vmem:[#allocation2 + $0x68] sm:$0xf] %vm330_vm0, %v5429_v45  ;;  %787 = vst.msk [vmem:[#allocation2 + $0x90] sm:$0xf] %vm330_vm0, %v5444_v52  ;;  %v5465_v59 = vpack.c.bf16 %v4065_v58, %v4065_v58  ;;  %v5468_v61 = vpack.c.bf16 %v4064_v60, %v4064_v60  ;;  %v644_v63 = vld [vmem:[%s5357_s11 + $0x122] sm:$0xff]  ;;  %v4486_v5 = vpack.c.bf16 %v365_v55, %v365_v55  ;;  %v5094_v6 = vld [vmem:[%s6943_s1 + $0x50] sm:$0xff]   ;;  %5037 = vmatpush3.bf16.msra.mxu1 %v5093_v3 }
  0x27   : > { %786 = vst.msk [vmem:[#allocation2 + $0x7c] sm:$0xf] %vm330_vm0, %v5446_v53  ;;  %v194_v0 = vld [vmem:[%s5357_s11 + $0x120] sm:$0xff]  ;;  %v4540_v1 = vpack.c.bf16 %v644_v63, %v644_v63  ;;  %v645_v7 = vld [vmem:[%s5357_s11 + $0x12a] sm:$0xff]  ;;  %4750 = vmatpush3.bf16.msra.mxu0 %v5093_v3  ;;  %5030 = vmatprep.subr.bf16.mxu1 %v5094_v6  ;;  %v4068_v46 = vld [vmem:[%s5357_s11 + $0x92] sm:$0xff] }
  0x28   : > { %v5475_v2 = vpack.c.bf16 %v194_v0, %v194_v0  ;;  %789 = vst.msk [vmem:[#allocation2 + $0xb8] sm:$0xf] %vm330_vm0, %v5465_v59  ;;  %788 = vst.msk [vmem:[#allocation2 + $0xa4] sm:$0xf] %vm330_vm0, %v5468_v61  ;;  %v195_v8 = vld [vmem:[%s5357_s11 + $0x128] sm:$0xff]  ;;  %v4541_v9 = vpack.c.bf16 %v645_v7, %v645_v7  ;;  %v5095_v11 = vld [vmem:[%s6943_s1 + $0x10] sm:$0xff]   ;;  %4751 = vmatprep.subr.bf16.mxu0 %v5094_v6 }
  0x29   : > { %943 = vrot.lane.b32.xlu1 %v4549_v17, %s5265_s20  ;;  %941 = vrot.lane.b32.xlu0 %v4548_v18, %s5265_s20  ;;  %804 = vst.msk [vmem:[#allocation2 + $0x1e4] sm:$0xf] %vm330_vm0, %v4540_v1  ;;  %v5496_v10 = vpack.c.bf16 %v195_v8, %v195_v8  ;;  %v392_v12 = vld [vmem:[%s5357_s11 + $0x159] sm:$0xff]  ;;  %v391_v13 = vld [vmem:[%s5357_s11 + $0x151] sm:$0xff] }
  0x2a   : > { %355 = vst.msk [vmem:[#allocation2 + $0x1e0] sm:$0xf] %vm330_vm0, %v5475_v2  ;;  %805 = vst.msk [vmem:[#allocation2 + $0x1f8] sm:$0xf] %vm330_vm0, %v4541_v9  ;;  %v5096_v14 = vld [vmem:[%s6943_s1 + $0x48] sm:$0xff]   ;;  %v170_v16 = vld [vmem:[%s5357_s11] sm:$0xff]  ;;  %5038 = vmatpush3.bf16.msra.mxu1 %v5095_v11  ;;  %v4513_v20 = vpack.c.bf16 %v392_v12, %v392_v12 }
  0x2b   : > { %356 = vst.msk [vmem:[#allocation2 + $0x1f4] sm:$0xf] %vm330_vm0, %v5496_v10  ;;  %v171_v15 = vld [vmem:[%s5357_s11 + $0x8] sm:$0xff]  ;;  %v4452_v18 = vpack.c.bf16 %v170_v16, %v170_v16  ;;  %4752 = vmatpush3.bf16.msra.mxu0 %v5095_v11  ;;  %5031 = vmatprep.subr.bf16.mxu1 %v5096_v14  ;;  %v5098_v22 = vld [vmem:[%s6943_s1 + $0x40] sm:$0xff]   ;;  %v367_v42 = vld [vmem:[%s5357_s11 + $0x31] sm:$0xff] }
  0x2c   : > { %v4453_v17 = vpack.c.bf16 %v171_v15, %v171_v15  ;;  %v5097_v19 = vld [vmem:[%s6943_s1 + $0x8] sm:$0xff]   ;;  %4753 = vmatprep.subr.bf16.mxu0 %v5096_v14  ;;  %v4066_v29 = vld [vmem:[%s5357_s11 + $0x7a] sm:$0xff]  ;;  %v648_v51 = vld [vmem:[%s5357_s11 + $0x152] sm:$0xff]  ;;  %v5574_v57 = vpack.c.bf16 %v367_v42, %v367_v42 }
  0x2d   : > { %545 = vrot.lane.b32.xlu1 %v4511_v47, %s5265_s20  ;;  %543 = vrot.lane.b32.xlu0 %v4510_v48, %s5265_s20  ;;  %331 = vst.msk [vmem:[#allocation2] sm:$0xf] %vm330_vm0, %v4452_v18  ;;  %v620_v25 = vld [vmem:[%s5357_s11 + $0x2] sm:$0xff]  ;;  %v5535_v31 = vpack.c.bf16 %v4066_v29, %v4066_v29  ;;  %v646_v35 = vld [vmem:[%s5357_s11 + $0x13a] sm:$0xff]  ;;  %v5560_v48 = vpack.c.bf16 %v4068_v46, %v4068_v46 }
  0x2e   : > { %332 = vst.msk [vmem:[#allocation2 + $0x14] sm:$0xf] %vm330_vm0, %v4453_v17  ;;  %5039 = vmatpush3.bf16.msra.mxu1 %v5097_v19  ;;  %v4516_v26 = vpack.c.bf16 %v620_v25, %v620_v25  ;;  %v647_v34 = vld [vmem:[%s5357_s11 + $0x142] sm:$0xff]  ;;  %v368_v38 = vld [vmem:[%s5357_s11 + $0x39] sm:$0xff]  ;;  %v5545_v40 = vpack.c.bf16 %v646_v35, %v646_v35  ;;  %v5566_v55 = vpack.c.bf16 %v648_v51, %v648_v51  ;;  %v4070_v60 = vld [vmem:[%s5357_s11 + $0xaa] sm:$0xff] }
  0x2f   : > { %4754 = vmatpush3.bf16.msra.mxu0 %v5097_v19  ;;  %5032 = vmatprep.subr.bf16.mxu1 %v5098_v22  ;;  %v5543_v39 = vpack.c.bf16 %v647_v34, %v647_v34  ;;  %v4069_v44 = vld [vmem:[%s5357_s11 + $0x9a] sm:$0xff]  ;;  %790 = vst.msk [vmem:[#allocation2 + $0xcc] sm:$0xf] %vm330_vm0, %v5535_v31  ;;  %v5572_v56 = vpack.c.bf16 %v368_v38, %v368_v38  ;;  %v4071_v58 = vld [vmem:[%s5357_s11 + $0xb2] sm:$0xff]  ;;  %792 = vst.msk [vmem:[#allocation2 + $0xf4] sm:$0xf] %vm330_vm0, %v5560_v48 }
  0x30   : > { %4755 = vmatprep.subr.bf16.mxu0 %v5098_v22  ;;  %780 = vst.msk [vmem:[#allocation2 + $0x4] sm:$0xf] %vm330_vm0, %v4516_v26  ;;  %806 = vst.msk [vmem:[#allocation2 + $0x20c] sm:$0xf] %vm330_vm0, %v5545_v40  ;;  %v5558_v47 = vpack.c.bf16 %v4069_v44, %v4069_v44  ;;  %v649_v50 = vld [vmem:[%s5357_s11 + $0x15a] sm:$0xff]  ;;  %v651_v63 = vld [vmem:[%s5357_s11 + $0x172] sm:$0xff] }
  0x31   : > { %995 = vrot.lane.b32.xlu1 %v5375_v21, %s5265_s20  ;;  %993 = vrot.lane.b32.xlu0 %v5378_v23, %s5265_s20  ;;  %v4512_v21 = vpack.c.bf16 %v391_v13, %v391_v13  ;;  %v621_v23 = vld [vmem:[%s5357_s11 + $0xa] sm:$0xff]  ;;  %807 = vst.msk [vmem:[#allocation2 + $0x220] sm:$0xf] %vm330_vm0, %v5543_v39  ;;  %v5564_v54 = vpack.c.bf16 %v649_v50, %v649_v50  ;;  %808 = vst.msk [vmem:[#allocation2 + $0x234] sm:$0xf] %vm330_vm0, %v5566_v55  ;;  %v5112_v62 = vld [vmem:[%s6943_s1 + $0xf8] sm:$0xff]  }
  0x32   : > { %v4517_v24 = vpack.c.bf16 %v621_v23, %v621_v23  ;;  %793 = vst.msk [vmem:[#allocation2 + $0x108] sm:$0xf] %vm330_vm0, %v5558_v47  ;;  %v650_v0 = vld [vmem:[%s5357_s11 + $0x16a] sm:$0xff]  ;;  %v5604_v3 = vpack.c.bf16 %v651_v63, %v651_v63  ;;  %v3960_v9 = vld [vmem:[%s5357_s11 + $0x180] sm:$0xff] }
  0x33   : > { %809 = vst.msk [vmem:[#allocation2 + $0x248] sm:$0xf] %vm330_vm0, %v5564_v54  ;;  %v394_v1 = vld [vmem:[%s5357_s11 + $0x171] sm:$0xff]  ;;  %v3961_v8 = vld [vmem:[%s5357_s11 + $0x188] sm:$0xff]  ;;  %v4578_v15 = vpack.c.bf16 %v3960_v9, %v3960_v9  ;;  %v3994_v19 = vld [vmem:[%s5357_s11 + $0x19] sm:$0xff] }
  0x34   : > { %781 = vst.msk [vmem:[#allocation2 + $0x18] sm:$0xf] %vm330_vm0, %v4517_v24  ;;  %811 = vst.msk [vmem:[#allocation2 + $0x270] sm:$0xf] %vm330_vm0, %v5604_v3  ;;  %v4515_v6 = vpack.c.bf16 %v394_v1, %v394_v1  ;;  %v370_v11 = vld [vmem:[%s5357_s11 + $0x51] sm:$0xff]  ;;  %v369_v12 = vld [vmem:[%s5357_s11 + $0x49] sm:$0xff]  ;;  %v4579_v14 = vpack.c.bf16 %v3961_v8, %v3961_v8 }
  0x35   : > { %497 = vrot.lane.b32.xlu1 %v4487_v4, %s5265_s20  ;;  %495 = vrot.lane.b32.xlu0 %v4486_v5, %s5265_s20  ;;  %v5606_v4 = vpack.c.bf16 %v650_v0, %v650_v0  ;;  %v393_v5 = vld [vmem:[%s5357_s11 + $0x169] sm:$0xff]  ;;  %v5639_v22 = vpack.c.bf16 %v370_v11, %v370_v11  ;;  %v5641_v23 = vpack.c.bf16 %v369_v12, %v369_v12  ;;  %v4123_v24 = vld [vmem:[%s5357_s11 + $0x38] sm:$0xff] }
  0x36   : > { %v4514_v7 = vpack.c.bf16 %v393_v5, %v393_v5  ;;  %v4073_v13 = vld [vmem:[%s5357_s11 + $0xca] sm:$0xff]  ;;  %v3936_v26 = vld [vmem:[%s5357_s11 + $0x60] sm:$0xff]  ;;  %v3938_v9 = vld [vmem:[%s5357_s11 + $0x78] sm:$0xff] }
  0x37   : > { %810 = vst.msk [vmem:[#allocation2 + $0x25c] sm:$0xf] %vm330_vm0, %v5606_v4  ;;  %v5624_v16 = vpack.c.bf16 %v4073_v13, %v4073_v13  ;;  %v4122_v25 = vld [vmem:[%s5357_s11 + $0x30] sm:$0xff]  ;;  %v4554_v34 = vpack.c.bf16 %v3936_v26, %v3936_v26  ;;  %v179_v35 = vld [vmem:[%s5357_s11 + $0x68] sm:$0xff]  ;;  %v178_v38 = vld [vmem:[%s5357_s11 + $0x60] sm:$0xff] }
  0x38   : > { %v4461_v42 = vpack.c.bf16 %v179_v35, %v179_v35  ;;  %v4460_v44 = vpack.c.bf16 %v178_v38, %v178_v38  ;;  %v4075_v46 = vld [vmem:[%s5357_s11 + $0xe2] sm:$0xff]  ;;  %v4074_v50 = vld [vmem:[%s5357_s11 + $0xda] sm:$0xff] }
  0x39   : > { %947 = vrot.lane.b32.xlu1 %v5384_v27, %s5265_s20  ;;  %945 = vrot.lane.b32.xlu0 %v5386_v28, %s5265_s20  ;;  %v5099_v27 = vld [vmem:[%s6943_s1] sm:$0xff]   ;;  %797 = vst.msk [vmem:[#allocation2 + $0x158] sm:$0xf] %vm330_vm0, %v5624_v16  ;;  %v5663_v51 = vpack.c.bf16 %v4075_v46, %v4075_v46  ;;  %v372_v63 = vld [vmem:[%s5357_s11 + $0x69] sm:$0xff] }
  0x3a   : > { %v4067_v28 = vld [vmem:[%s5357_s11 + $0x82] sm:$0xff]  ;;  %5040 = vmatpush3.bf16.msra.mxu1 %v5099_v27  ;;  %4756 = vmatpush3.bf16.msra.mxu0 %v5099_v27  ;;  %v4645_v27 = vpack.c.bf16 %v4123_v24, %v4123_v24  ;;  %340 = vst.msk [vmem:[#allocation2 + $0xb4] sm:$0xf] %vm330_vm0, %v4461_v42  ;;  %339 = vst.msk [vmem:[#allocation2 + $0xa0] sm:$0xf] %vm330_vm0, %v4460_v44  ;;  %v4077_v13 = vld [vmem:[%s5357_s11 + $0xfa] sm:$0xff] }
  0x3b   : > { %v5533_v30 = vpack.c.bf16 %v4067_v28, %v4067_v28  ;;  %4853 = vmatprep.subr.bf16.mxu1 %v5112_v62  ;;  %v4644_v28 = vpack.c.bf16 %v4122_v25, %v4122_v25  ;;  %1683 = vst.msk [vmem:[#allocation2 + $0x70] sm:$0xf] %vm330_vm0, %v4461_v42  ;;  %1682 = vst.msk [vmem:[#allocation2 + $0x5c] sm:$0xf] %vm330_vm0, %v4460_v44  ;;  %v3996_v62 = vld [vmem:[%s5357_s11 + $0x31] sm:$0xff]  ;;  %v371_v0 = vld [vmem:[%s5357_s11 + $0x61] sm:$0xff] }
  0x3c   : > { %1679 = vst.msk [vmem:[#allocation2 + $0x20] sm:$0xf] %vm330_vm0, %v4645_v27  ;;  %v4582_v5 = vpack.c.bf16 %v3996_v62, %v3996_v62  ;;  %799 = vst.msk [vmem:[#allocation2 + $0x180] sm:$0xf] %vm330_vm0, %v5663_v51  ;;  %v3939_v8 = vld [vmem:[%s5357_s11 + $0x80] sm:$0xff]  ;;  %v4078_v24 = vld [vmem:[%s5357_s11 + $0x10a] sm:$0xff] }
  0x3d   : > { %549 = vrot.lane.b32.xlu1 %v4513_v20, %s5265_s20  ;;  %547 = vrot.lane.b32.xlu0 %v4512_v21, %s5265_s20  ;;  %791 = vst.msk [vmem:[#allocation2 + $0xe0] sm:$0xf] %vm330_vm0, %v5533_v30  ;;  %v4580_v20 = vpack.c.bf16 %v3994_v19, %v3994_v19  ;;  %v3937_v21 = vld [vmem:[%s5357_s11 + $0x68] sm:$0xff]  ;;  %1678 = vst.msk [vmem:[#allocation2 + $0xc] sm:$0xf] %vm330_vm0, %v4644_v28  ;;  %v5721_v26 = vpack.c.bf16 %v4078_v24, %v4078_v24  ;;  %v3999_v27 = vld [vmem:[%s5357_s11 + $0x51] sm:$0xff] }
  0x3e   : > { %v4555_v29 = vpack.c.bf16 %v3937_v21, %v3937_v21  ;;  %1231 = vst.msk [vmem:[#allocation2 + $0x30] sm:$0xf] %vm330_vm0, %v4582_v5  ;;  %v4079_v21 = vld [vmem:[%s5357_s11 + $0x112] sm:$0xff]  ;;  %v3998_v28 = vld [vmem:[%s5357_s11 + $0x49] sm:$0xff]  ;;  %v4585_v35 = vpack.c.bf16 %v3999_v27, %v3999_v27  ;;  %v4206_v44 = vld [vmem:[%s5357_s11 + $0x121] sm:$0xff] }
  0x3f   : > { %1229 = vst.msk [vmem:[#allocation2 + $0x8] sm:$0xf] %vm330_vm0, %v4580_v20  ;;  %v5719_v25 = vpack.c.bf16 %v4079_v21, %v4079_v21  ;;  %v4584_v38 = vpack.c.bf16 %v3998_v28, %v3998_v28  ;;  %802 = vst.msk [vmem:[#allocation2 + $0x1bc] sm:$0xf] %vm330_vm0, %v5721_v26  ;;  %v4207_v42 = vld [vmem:[%s5357_s11 + $0x129] sm:$0xff]  ;;  %v4002_v21 = vld [vmem:[%s5357_s11 + $0x79] sm:$0xff] }
  0x40   : > { %1234 = vst.msk [vmem:[#allocation2 + $0x6c] sm:$0xf] %vm330_vm0, %v4585_v35  ;;  %v3940_v62 = vld [vmem:[%s5357_s11 + $0x90] sm:$0xff] }
  0x41   : > { %999 = vrot.lane.b32.xlu1 %v5394_v32, %s5265_s20  ;;  %997 = vrot.lane.b32.xlu0 %v5396_v33, %s5265_s20  ;;  %v5586_v32 = vpack.c.bf16 %v4071_v58, %v4071_v58  ;;  %v5588_v33 = vpack.c.bf16 %v4070_v60, %v4070_v60  ;;  %v5665_v58 = vpack.c.bf16 %v4074_v50, %v4074_v50  ;;  %v3997_v60 = vld [vmem:[%s5357_s11 + $0x39] sm:$0xff]  ;;  %v378_v24 = vld [vmem:[%s5357_s11 + $0xb1] sm:$0xff] }
  0x42   : > { %v4583_v1 = vpack.c.bf16 %v3997_v60, %v3997_v60  ;;  %803 = vst.msk [vmem:[#allocation2 + $0x1d0] sm:$0xf] %vm330_vm0, %v5719_v25  ;;  %1233 = vst.msk [vmem:[#allocation2 + $0x58] sm:$0xf] %vm330_vm0, %v4584_v38  ;;  %v3941_v60 = vld [vmem:[%s5357_s11 + $0x98] sm:$0xff]  ;;  %v377_v27 = vld [vmem:[%s5357_s11 + $0xa9] sm:$0xff] }
  0x43   : > { %795 = vst.msk [vmem:[#allocation2 + $0x130] sm:$0xf] %vm330_vm0, %v5586_v32  ;;  %794 = vst.msk [vmem:[#allocation2 + $0x11c] sm:$0xf] %vm330_vm0, %v5588_v33  ;;  %v3945_v38 = vld [vmem:[%s5357_s11 + $0xc8] sm:$0xff] }
  0x44   : > { %798 = vst.msk [vmem:[#allocation2 + $0x16c] sm:$0xf] %vm330_vm0, %v5665_v58  ;;  %1232 = vst.msk [vmem:[#allocation2 + $0x44] sm:$0xf] %vm330_vm0, %v4583_v1 }
  0x45   : > { %501 = vrot.lane.b32.xlu1 %v5572_v56, %s5265_s20  ;;  %499 = vrot.lane.b32.xlu0 %v5574_v57, %s5265_s20 }
  0x49   : > { %951 = vrot.lane.b32.xlu1 %v5406_v36, %s5265_s20  ;;  %949 = vrot.lane.b32.xlu0 %v5408_v37, %s5265_s20  ;;  %v4072_v36 = vld [vmem:[%s5357_s11 + $0xc2] sm:$0xff] }
  0x4a   : > { %v3995_v37 = vld [vmem:[%s5357_s11 + $0x21] sm:$0xff]  ;;  %v5628_v17 = vpack.c.bf16 %v4072_v36, %v4072_v36  ;;  %v4556_v36 = vpack.c.bf16 %v3938_v9, %v3938_v9  ;;  %v375_v9 = vld [vmem:[%s5357_s11 + $0x91] sm:$0xff] }
  0x4b   : > { %v4581_v18 = vpack.c.bf16 %v3995_v37, %v3995_v37  ;;  %v181_v37 = vld [vmem:[%s5357_s11 + $0x80] sm:$0xff] }
  0x4c   : > { %796 = vst.msk [vmem:[#allocation2 + $0x144] sm:$0xf] %vm330_vm0, %v5628_v17  ;;  %v4463_v19 = vpack.c.bf16 %v181_v37, %v181_v37 }
  0x4d   : > { %553 = vrot.lane.b32.xlu1 %v4515_v6, %s5265_s20  ;;  %551 = vrot.lane.b32.xlu0 %v4514_v7, %s5265_s20  ;;  %1230 = vst.msk [vmem:[#allocation2 + $0x1c] sm:$0xf] %vm330_vm0, %v4581_v18  ;;  %v4125_v6 = vld [vmem:[%s5357_s11 + $0x50] sm:$0xff]  ;;  %v4124_v7 = vld [vmem:[%s5357_s11 + $0x48] sm:$0xff] }
  0x4e   : > { %v4647_v11 = vpack.c.bf16 %v4125_v6, %v4125_v6  ;;  %v4646_v12 = vpack.c.bf16 %v4124_v7, %v4124_v7  ;;  %v180_v18 = vld [vmem:[%s5357_s11 + $0x78] sm:$0xff]  ;;  %342 = vst.msk [vmem:[#allocation2 + $0xdc] sm:$0xf] %vm330_vm0, %v4463_v19  ;;  %1685 = vst.msk [vmem:[#allocation2 + $0x98] sm:$0xf] %vm330_vm0, %v4463_v19  ;;  %v4001_v6 = vld [vmem:[%s5357_s11 + $0x69] sm:$0xff] }
  0x4f   : > { %v4462_v20 = vpack.c.bf16 %v180_v18, %v180_v18  ;;  %v4000_v7 = vld [vmem:[%s5357_s11 + $0x61] sm:$0xff] }
  0x50   : > { %1681 = vst.msk [vmem:[#allocation2 + $0x48] sm:$0xf] %vm330_vm0, %v4647_v11  ;;  %1680 = vst.msk [vmem:[#allocation2 + $0x34] sm:$0xf] %vm330_vm0, %v4646_v12  ;;  %v5780_v11 = vld [vmem:[%s6943_s1 + $0x118] sm:$0xff]   ;;  %v4587_v12 = vpack.c.bf16 %v4001_v6, %v4001_v6 }
  0x51   : > { %1003 = vrot.lane.b32.xlu1 %v4579_v14, %s5265_s20  ;;  %1001 = vrot.lane.b32.xlu0 %v4578_v15, %s5265_s20  ;;  %v4076_v14 = vld [vmem:[%s5357_s11 + $0xf2] sm:$0xff]  ;;  %v4557_v15 = vpack.c.bf16 %v3939_v8, %v3939_v8  ;;  %341 = vst.msk [vmem:[#allocation2 + $0xc8] sm:$0xf] %vm330_vm0, %v4462_v20  ;;  %1684 = vst.msk [vmem:[#allocation2 + $0x84] sm:$0xf] %vm330_vm0, %v4462_v20  ;;  %v4003_v20 = vld [vmem:[%s5357_s11 + $0x81] sm:$0xff] }
  0x52   : > { %v376_v8 = vld [vmem:[%s5357_s11 + $0x99] sm:$0xff]  ;;  %4985 = vmatprep.subr.bf16.mxu0 %v5780_v11  ;;  %1236 = vst.msk [vmem:[#allocation2 + $0x94] sm:$0xf] %vm330_vm0, %v4587_v12  ;;  %v4589_v28 = vpack.c.bf16 %v4003_v20, %v4003_v20 }
  0x53   : > { %v4005_v12 = vld [vmem:[%s5357_s11 + $0x99] sm:$0xff] }
  0x54   : > { %1238 = vst.msk [vmem:[#allocation2 + $0xbc] sm:$0xf] %vm330_vm0, %v4589_v28  ;;  %v3947_v20 = vld [vmem:[%s5357_s11 + $0xe0] sm:$0xff] }
  0x55   : > { %505 = vrot.lane.b32.xlu1 %v5639_v22, %s5265_s20  ;;  %503 = vrot.lane.b32.xlu0 %v5641_v23, %s5265_s20 }
  0x59   : > { %955 = vrot.lane.b32.xlu1 %v4555_v29, %s5265_s20  ;;  %953 = vrot.lane.b32.xlu0 %v4554_v34, %s5265_s20  ;;  %v374_v29 = vld [vmem:[%s5357_s11 + $0x81] sm:$0xff]  ;;  %v373_v34 = vld [vmem:[%s5357_s11 + $0x79] sm:$0xff] }
  0x5a   : > { %v5747_v46 = vpack.c.bf16 %v374_v29, %v374_v29  ;;  %v5749_v50 = vpack.c.bf16 %v373_v34, %v373_v34  ;;  %v4588_v29 = vpack.c.bf16 %v4002_v21, %v4002_v21  ;;  %v3946_v21 = vld [vmem:[%s5357_s11 + $0xd8] sm:$0xff] }
  0x5c   : > { %1237 = vst.msk [vmem:[#allocation2 + $0xa8] sm:$0xf] %vm330_vm0, %v4588_v29 }
  0x5d   : > { %1391 = vrot.lane.b32.xlu1 %v5423_v41, %s5265_s20  ;;  %1389 = vrot.lane.b32.xlu0 %v5426_v43, %s5265_s20  ;;  %v5685_v41 = vpack.c.bf16 %v372_v63, %v372_v63  ;;  %v5687_v43 = vpack.c.bf16 %v371_v0, %v371_v0  ;;  %v183_v63 = vld [vmem:[%s5357_s11 + $0x98] sm:$0xff]  ;;  %v182_v0 = vld [vmem:[%s5357_s11 + $0x90] sm:$0xff] }
  0x5e   : > { %v4465_v1 = vpack.c.bf16 %v183_v63, %v183_v63  ;;  %v4464_v5 = vpack.c.bf16 %v182_v0, %v182_v0 }
  0x60   : > { %344 = vst.msk [vmem:[#allocation2 + $0x104] sm:$0xf] %vm330_vm0, %v4465_v1  ;;  %343 = vst.msk [vmem:[#allocation2 + $0xf0] sm:$0xf] %vm330_vm0, %v4464_v5 }
  0x61   : > { %1840 = vrot.lane.b32.xlu1 %v5572_v56, %s5265_s20  ;;  %1838 = vrot.lane.b32.xlu0 %v5574_v57, %s5265_s20  ;;  %v5697_v56 = vpack.c.bf16 %v4077_v13, %v4077_v13  ;;  %v5699_v57 = vpack.c.bf16 %v4076_v14, %v4076_v14  ;;  %1687 = vst.msk [vmem:[#allocation2 + $0xc0] sm:$0xf] %vm330_vm0, %v4465_v1  ;;  %1686 = vst.msk [vmem:[#allocation2 + $0xac] sm:$0xf] %vm330_vm0, %v4464_v5  ;;  %v3943_v14 = vld [vmem:[%s5357_s11 + $0xb0] sm:$0xff] }
  0x62   : > { %v4586_v13 = vpack.c.bf16 %v4000_v7, %v4000_v7 }
  0x63   : > { %801 = vst.msk [vmem:[#allocation2 + $0x1a8] sm:$0xf] %vm330_vm0, %v5697_v56  ;;  %800 = vst.msk [vmem:[#allocation2 + $0x194] sm:$0xf] %vm330_vm0, %v5699_v57 }
  0x64   : > { %1235 = vst.msk [vmem:[#allocation2 + $0x80] sm:$0xf] %vm330_vm0, %v4586_v13  ;;  %v4004_v13 = vld [vmem:[%s5357_s11 + $0x91] sm:$0xff] }
  0x65   : > { %509 = vrot.lane.b32.xlu1 %v5685_v41, %s5265_s20  ;;  %507 = vrot.lane.b32.xlu0 %v5687_v43, %s5265_s20 }
  0x69   : > { %959 = vrot.lane.b32.xlu1 %v4557_v15, %s5265_s20  ;;  %957 = vrot.lane.b32.xlu0 %v4556_v36, %s5265_s20  ;;  %v3942_v15 = vld [vmem:[%s5357_s11 + $0xa8] sm:$0xff]  ;;  %v4561_v36 = vpack.c.bf16 %v3943_v14, %v3943_v14 }
  0x6a   : > { %v4560_v37 = vpack.c.bf16 %v3942_v15, %v3942_v15  ;;  %v380_v14 = vld [vmem:[%s5357_s11 + $0xc9] sm:$0xff]  ;;  %v379_v15 = vld [vmem:[%s5357_s11 + $0xc1] sm:$0xff] }
  0x6d   : > { %1395 = vrot.lane.b32.xlu1 %v5429_v45, %s5265_s20  ;;  %1393 = vrot.lane.b32.xlu0 %v5436_v49, %s5265_s20  ;;  %v5739_v45 = vpack.c.bf16 %v4207_v42, %v4207_v42  ;;  %v5741_v49 = vpack.c.bf16 %v4206_v44, %v4206_v44  ;;  %v3944_v42 = vld [vmem:[%s5357_s11 + $0xc0] sm:$0xff] }
  0x6f   : > { %1252 = vst.msk [vmem:[#allocation2 + $0x1d4] sm:$0xf] %vm330_vm0, %v5739_v45  ;;  %1251 = vst.msk [vmem:[#allocation2 + $0x1c0] sm:$0xf] %vm330_vm0, %v5741_v49 }
  0x71   : > { %1844 = vrot.lane.b32.xlu1 %v5639_v22, %s5265_s20  ;;  %1842 = vrot.lane.b32.xlu0 %v5641_v23, %s5265_s20  ;;  %v4559_v22 = vpack.c.bf16 %v3941_v60, %v3941_v60  ;;  %v4558_v23 = vpack.c.bf16 %v3940_v62, %v3940_v62  ;;  %v187_v62 = vld [vmem:[%s5357_s11 + $0xc8] sm:$0xff] }
  0x75   : > { %513 = vrot.lane.b32.xlu1 %v5747_v46, %s5265_s20  ;;  %511 = vrot.lane.b32.xlu0 %v5749_v50, %s5265_s20 }
  0x79   : > { %963 = vrot.lane.b32.xlu1 %v4559_v22, %s5265_s20  ;;  %961 = vrot.lane.b32.xlu0 %v4558_v23, %s5265_s20  ;;  %v186_v22 = vld [vmem:[%s5357_s11 + $0xc0] sm:$0xff]  ;;  %v4469_v23 = vpack.c.bf16 %v187_v62, %v187_v62 }
  0x7a   : > { %v4468_v63 = vpack.c.bf16 %v186_v22, %v186_v22 }
  0x7b   : > { %348 = vst.msk [vmem:[#allocation2 + $0x154] sm:$0xf] %vm330_vm0, %v4469_v23  ;;  %1691 = vst.msk [vmem:[#allocation2 + $0x110] sm:$0xf] %vm330_vm0, %v4469_v23  ;;  %v5121_v23 = vld [vmem:[%s6943_s1 + $0xa0] sm:$0xff]  }
  0x7c   : > { %347 = vst.msk [vmem:[#allocation2 + $0x140] sm:$0xf] %vm330_vm0, %v4468_v63  ;;  %1690 = vst.msk [vmem:[#allocation2 + $0xfc] sm:$0xf] %vm330_vm0, %v4468_v63  ;;  %v5124_v63 = vld [vmem:[%s6943_s1 + $0xd8] sm:$0xff]  }
  0x7d   : > { %1399 = vrot.lane.b32.xlu1 %v5444_v52, %s5265_s20  ;;  %1397 = vrot.lane.b32.xlu0 %v5446_v53, %s5265_s20  ;;  %v5789_v52 = vpack.c.bf16 %v376_v8, %v376_v8  ;;  %v5791_v53 = vpack.c.bf16 %v375_v9, %v375_v9  ;;  %v5113_v9 = vld [vmem:[%s6943_s1 + $0xb8] sm:$0xff]  }
  0x81   : > { %1848 = vrot.lane.b32.xlu1 %v5685_v41, %s5265_s20  ;;  %1846 = vrot.lane.b32.xlu0 %v5687_v43, %s5265_s20  ;;  %v185_v41 = vld [vmem:[%s5357_s11 + $0xb0] sm:$0xff]  ;;  %v184_v43 = vld [vmem:[%s5357_s11 + $0xa8] sm:$0xff] }
  0x82   : > { %v4467_v18 = vpack.c.bf16 %v185_v41, %v185_v41  ;;  %v4466_v19 = vpack.c.bf16 %v184_v43, %v184_v43  ;;  %v4590_v41 = vpack.c.bf16 %v4004_v13, %v4004_v13  ;;  %v4007_v13 = vld [vmem:[%s5357_s11 + $0xb1] sm:$0xff] }
  0x84   : > { %346 = vst.msk [vmem:[#allocation2 + $0x12c] sm:$0xf] %vm330_vm0, %v4467_v18  ;;  %345 = vst.msk [vmem:[#allocation2 + $0x118] sm:$0xf] %vm330_vm0, %v4466_v19 }
  0x85   : > { %517 = vrot.lane.b32.xlu1 %v5789_v52, %s5265_s20  ;;  %515 = vrot.lane.b32.xlu0 %v5791_v53, %s5265_s20  ;;  %1689 = vst.msk [vmem:[#allocation2 + $0xe8] sm:$0xf] %vm330_vm0, %v4467_v18  ;;  %1688 = vst.msk [vmem:[#allocation2 + $0xd4] sm:$0xf] %vm330_vm0, %v4466_v19  ;;  %v5874_v19 = vpack.c.bf16 %v379_v15, %v379_v15  ;;  %v5126_v15 = vld [vmem:[%s6943_s1 + $0xd0] sm:$0xff]  }
  0x86   : > { %1239 = vst.msk [vmem:[#allocation2 + $0xd0] sm:$0xf] %vm330_vm0, %v4590_v41 }
  0x89   : > { %967 = vrot.lane.b32.xlu1 %v4561_v36, %s5265_s20  ;;  %965 = vrot.lane.b32.xlu0 %v4560_v37, %s5265_s20  ;;  %v5114_v36 = vld [vmem:[%s6943_s1 + $0xf0] sm:$0xff]   ;;  %v4591_v37 = vpack.c.bf16 %v4005_v12, %v4005_v12  ;;  %v5159_v12 = vld [vmem:[%s6943_s1 + $0x108] sm:$0xff]  }
  0x8b   : > { %1240 = vst.msk [vmem:[#allocation2 + $0xe4] sm:$0xf] %vm330_vm0, %v4591_v37  ;;  %v4006_v37 = vld [vmem:[%s5357_s11 + $0xa9] sm:$0xff] }
  0x8d   : > { %1403 = vrot.lane.b32.xlu1 %v5465_v59, %s5265_s20  ;;  %1401 = vrot.lane.b32.xlu0 %v5468_v61, %s5265_s20  ;;  %v5823_v59 = vpack.c.bf16 %v378_v24, %v378_v24  ;;  %v5825_v61 = vpack.c.bf16 %v377_v27, %v377_v27  ;;  %v5118_v24 = vld [vmem:[%s6943_s1 + $0xe8] sm:$0xff]  }
  0x8f   : > { %v990_v34 = vpop.permute.xlu1 %989  ;;  %v540_v35 = vpop.permute.xlu0 %539 }
  0x90   : > { %1061 = vst.msk [vmem:[#allocation2 + $0x1e4] sm:$0xf] %vm587_vm1, %v990_v34  ;;  %612 = vst.msk [vmem:[#allocation2 + $0x1e0] sm:$0xf] %vm587_vm1, %v540_v35  ;;  %v4565_v34 = vpack.c.bf16 %v3947_v20, %v3947_v20  ;;  %v4564_v35 = vpack.c.bf16 %v3946_v21, %v3946_v21  ;;  %v3949_v20 = vld [vmem:[%s5357_s11 + $0xf8] sm:$0xff]  ;;  %v3948_v21 = vld [vmem:[%s5357_s11 + $0xf0] sm:$0xff] }
  0x91   : > { %1852 = vrot.lane.b32.xlu1 %v5747_v46, %s5265_s20  ;;  %1850 = vrot.lane.b32.xlu0 %v5749_v50, %s5265_s20  ;;  %v4563_v46 = vpack.c.bf16 %v3945_v38, %v3945_v38  ;;  %v4562_v50 = vpack.c.bf16 %v3944_v42, %v3944_v42  ;;  %v189_v38 = vld [vmem:[%s5357_s11 + $0xe0] sm:$0xff]  ;;  %v188_v42 = vld [vmem:[%s5357_s11 + $0xd8] sm:$0xff] }
  0x93   : > { %v992_v44 = vpop.permute.xlu1 %991  ;;  %v542_v60 = vpop.permute.xlu0 %541 }
  0x94   : > { %1062 = vst.msk [vmem:[#allocation2 + $0x1f8] sm:$0xf] %vm587_vm1, %v992_v44  ;;  %613 = vst.msk [vmem:[#allocation2 + $0x1f4] sm:$0xf] %vm587_vm1, %v542_v60  ;;  %v5120_v44 = vld [vmem:[%s6943_s1 + $0xe0] sm:$0xff]   ;;  %v5152_v60 = vld [vmem:[%s6943_s1 + $0x110] sm:$0xff]  }
  0x95   : > { %521 = vrot.lane.b32.xlu1 %v5823_v59, %s5265_s20  ;;  %519 = vrot.lane.b32.xlu0 %v5825_v61, %s5265_s20 }
  0x97   : > { %v494_v0 = vpop.permute.xlu1 %493  ;;  %v492_v1 = vpop.permute.xlu0 %491 }
  0x98   : > { %589 = vst.msk [vmem:[#allocation2 + $0x14] sm:$0xf] %vm587_vm1, %v494_v0  ;;  %588 = vst.msk [vmem:[#allocation2] sm:$0xf] %vm587_vm1, %v492_v1 }
  0x99   : > { %971 = vrot.lane.b32.xlu1 %v4563_v46, %s5265_s20  ;;  %969 = vrot.lane.b32.xlu0 %v4562_v50, %s5265_s20  ;;  %v4471_v46 = vpack.c.bf16 %v189_v38, %v189_v38  ;;  %v4470_v50 = vpack.c.bf16 %v188_v42, %v188_v42  ;;  %v191_v38 = vld [vmem:[%s5357_s11 + $0xf8] sm:$0xff]  ;;  %v190_v42 = vld [vmem:[%s5357_s11 + $0xf0] sm:$0xff] }
  0x9b   : > { %v944_v5 = vpop.permute.xlu1 %943  ;;  %v942_v6 = vpop.permute.xlu0 %941  ;;  %v5100_v7 = vld [vmem:[#allocation2 + $0x1e0] ss:$20 sps:$4 sm:$0xff]   ;;  %v5102_v8 = vld [vmem:[#allocation2 + $0x1e4] ss:$20 sps:$4 sm:$0xff]   ;;  %350 = vst.msk [vmem:[#allocation2 + $0x17c] sm:$0xf] %vm330_vm0, %v4471_v46 }
  0x9c   : > { %1038 = vst.msk [vmem:[#allocation2 + $0x18] sm:$0xf] %vm587_vm1, %v944_v5  ;;  %1037 = vst.msk [vmem:[#allocation2 + $0x4] sm:$0xf] %vm587_vm1, %v942_v6  ;;  %3126 = vmatprep.mubr.bf16.mxu1 %v5102_v8  ;;  %v382_v8 = vld [vmem:[%s5357_s11 + $0xe1] sm:$0xff] }
  0x9d   : > { %1407 = vrot.lane.b32.xlu1 %v5533_v30, %s5265_s20  ;;  %1405 = vrot.lane.b32.xlu0 %v5535_v31, %s5265_s20  ;;  %v5115_v30 = vld [vmem:[%s6943_s1 + $0xb0] sm:$0xff]   ;;  %v5872_v31 = vpack.c.bf16 %v380_v14, %v380_v14  ;;  %349 = vst.msk [vmem:[#allocation2 + $0x168] sm:$0xf] %vm330_vm0, %v4470_v50  ;;  %1693 = vst.msk [vmem:[#allocation2 + $0x138] sm:$0xf] %vm330_vm0, %v4471_v46  ;;  %v381_v14 = vld [vmem:[%s5357_s11 + $0xd9] sm:$0xff]  ;;  %v4472_v46 = vpack.c.bf16 %v190_v42, %v190_v42 }
  0x9e   : > { %3127 = vmatmul.mubr.bf16.vlgmr.msra.gmra.mxu1 %v5100_v7  ;;  %1692 = vst.msk [vmem:[#allocation2 + $0x124] sm:$0xf] %vm330_vm0, %v4470_v50 }
  0x9f   : > { %v546_v43 = vpop.permute.xlu1 %545  ;;  %v544_v18 = vpop.permute.xlu0 %543  ;;  %4854 = vmatpush3.bf16.msra.mxu1 %v5113_v9  ;;  %v5103_v29 = vld [vmem:[#allocation2] ss:$20 sps:$4 sm:$0xff]   ;;  %v5125_v9 = vld [vmem:[%s6943_s1 + $0x98] sm:$0xff]   ;;  %351 = vst.msk [vmem:[#allocation2 + $0x190] sm:$0xf] %vm330_vm0, %v4472_v46 }
  0xa0   : > { %615 = vst.msk [vmem:[#allocation2 + $0x21c] sm:$0xf] %vm587_vm1, %v546_v43  ;;  %614 = vst.msk [vmem:[#allocation2 + $0x208] sm:$0xf] %vm587_vm1, %v544_v18  ;;  %4855 = vmatprep.subr.bf16.mxu1 %v5114_v36  ;;  %v4593_v36 = vpack.c.bf16 %v4007_v13, %v4007_v13  ;;  %v5127_v43 = vld [vmem:[%s6943_s1 + $0x90] sm:$0xff]   ;;  %v5942_v18 = vpack.c.bf16 %v382_v8, %v382_v8  ;;  %v384_v8 = vld [vmem:[%s5357_s11 + $0xf9] sm:$0xff] }
  0xa1   : > { %1856 = vrot.lane.b32.xlu1 %v5789_v52, %s5265_s20  ;;  %1854 = vrot.lane.b32.xlu0 %v5791_v53, %s5265_s20  ;;  %v5119_v53 = vld [vmem:[%s6943_s1 + $0xa8] sm:$0xff]   ;;  %1694 = vst.msk [vmem:[#allocation2 + $0x14c] sm:$0xf] %vm330_vm0, %v4472_v46  ;;  %v4010_v46 = vld [vmem:[%s5357_s11 + $0xd9] sm:$0xff] }
  0xa2   : > { %1242 = vst.msk [vmem:[#allocation2 + $0x10c] sm:$0xf] %vm330_vm0, %v4593_v36  ;;  %v3951_v36 = vld [vmem:[%s5357_s11 + $0x110] sm:$0xff] }
  0xa3   : > { %v996_v27 = vpop.permute.xlu1 %995  ;;  %v994_v28 = vpop.permute.xlu0 %993  ;;  %v5105_v52 = vld [vmem:[#allocation2 + $0x4] ss:$20 sps:$4 sm:$0xff]   ;;  %4856 = vmatpush3.bf16.msra.mxu1 %v5115_v30  ;;  %v5944_v30 = vpack.c.bf16 %v381_v14, %v381_v14 }
  0xa4   : > { %1064 = vst.msk [vmem:[#allocation2 + $0x220] sm:$0xf] %vm587_vm1, %v996_v27  ;;  %1063 = vst.msk [vmem:[#allocation2 + $0x20c] sm:$0xf] %vm587_vm1, %v994_v28  ;;  %3030 = vmatprep.mubr.bf16.mxu0 %v5105_v52  ;;  %4857 = vmatprep.subr.bf16.mxu1 %v5118_v24  ;;  %v5130_v24 = vld [vmem:[%s6943_s1 + $0xc8] sm:$0xff]  }
  0xa5   : > { %525 = vrot.lane.b32.xlu1 %v5872_v31, %s5265_s20  ;;  %523 = vrot.lane.b32.xlu0 %v5874_v19, %s5265_s20 }
  0xa6   : > { %3031 = vmatmul.mubr.bf16.vlgmr.msra.gmra.mxu0 %v5103_v29 }
  0xa7   : > { %v498_v62 = vpop.permute.xlu1 %497  ;;  %v496_v22 = vpop.permute.xlu0 %495  ;;  %4858 = vmatpush3.bf16.msra.mxu1 %v5119_v53  ;;  %4986 = vmatpush3.bf16.msra.mxu0 %v5780_v11  ;;  %v5131_v53 = vld [vmem:[%s6943_s1 + $0x88] sm:$0xff]  }
  0xa8   : > { %591 = vst.msk [vmem:[#allocation2 + $0x3c] sm:$0xf] %vm587_vm1, %v498_v62  ;;  %590 = vst.msk [vmem:[#allocation2 + $0x28] sm:$0xf] %vm587_vm1, %v496_v22  ;;  %4859 = vmatprep.subr.bf16.mxu1 %v5120_v44  ;;  %4987 = vmatprep.subr.bf16.mxu0 %v5152_v60  ;;  %v5132_v44 = vld [vmem:[%s6943_s1 + $0xc0] sm:$0xff]  }
  0xa9   : > { %975 = vrot.lane.b32.xlu1 %v4565_v34, %s5265_s20  ;;  %973 = vrot.lane.b32.xlu0 %v4564_v35, %s5265_s20  ;;  %v4567_v34 = vpack.c.bf16 %v3949_v20, %v3949_v20  ;;  %v4566_v35 = vpack.c.bf16 %v3948_v21, %v3948_v21  ;;  %v5133_v22 = vld [vmem:[%s6943_s1 + $0x80] sm:$0xff]  }
  0xab   : > { %v948_v11 = vpop.permute.xlu1 %947  ;;  %v946_v0 = vpop.permute.xlu0 %945  ;;  %v2236_v1 = vld [vmem:[#allocation2 + $0x208] sm:$0xff]  ;;  %v2239_v5 = vld [vmem:[#allocation2 + $0x21c] sm:$0xff]  ;;  %4860 = vmatpush3.bf16.msra.mxu1 %v5121_v23  ;;  %4988 = vmatpush3.bf16.msra.mxu0 %v5152_v60  ;;  %v4473_v60 = vpack.c.bf16 %v191_v38, %v191_v38 }
  0xac   : > { %v5106_v6 = vld [vmem:[#allocation2 + $0x20c] ss:$20 sps:$4 sm:$0xff]   ;;  %1040 = vst.msk [vmem:[#allocation2 + $0x40] sm:$0xf] %vm587_vm1, %v948_v11  ;;  %1039 = vst.msk [vmem:[#allocation2 + $0x2c] sm:$0xf] %vm587_vm1, %v946_v0  ;;  %v4380_v7 = vcombine.low %v2236_v1, %v2239_v5  ;;  %4861 = vmatprep.subr.bf16.mxu1 %v5124_v63  ;;  %4989 = vmatprep.subr.bf16.mxu0 %v5159_v12 }
  0xad   : > { %1411 = vrot.lane.b32.xlu1 %v5558_v47, %s5265_s20  ;;  %1409 = vrot.lane.b32.xlu0 %v5560_v48, %s5265_s20  ;;  %v4592_v48 = vpack.c.bf16 %v4006_v37, %v4006_v37  ;;  %352 = vst.msk [vmem:[#allocation2 + $0x1a4] sm:$0xf] %vm330_vm0, %v4473_v60  ;;  %1695 = vst.msk [vmem:[#allocation2 + $0x160] sm:$0xf] %vm330_vm0, %v4473_v60  ;;  %v3950_v37 = vld [vmem:[%s5357_s11 + $0x108] sm:$0xff] }
  0xae   : > { %3134 = vmatprep.mubr.bf16.mxu1 %v5106_v6  ;;  %v4009_v6 = vld [vmem:[%s5357_s11 + $0xc9] sm:$0xff]  ;;  %v4568_v21 = vpack.c.bf16 %v3950_v37, %v3950_v37  ;;  %v4011_v60 = vld [vmem:[%s5357_s11 + $0xe1] sm:$0xff] }
  0xaf   : > { %v550_v41 = vpop.permute.xlu1 %549  ;;  %v548_v47 = vpop.permute.xlu0 %547  ;;  %3135 = vmatmul.mubr.bf16.gmra.mxu1 %v4380_v7  ;;  %4990 = vmatpush3.bf16.msra.mxu0 %v5159_v12  ;;  %1241 = vst.msk [vmem:[#allocation2 + $0xf8] sm:$0xf] %vm330_vm0, %v4592_v48  ;;  %v4008_v7 = vld [vmem:[%s5357_s11 + $0xc1] sm:$0xff]  ;;  %v4595_v12 = vpack.c.bf16 %v4009_v6, %v4009_v6 }
  0xb0   : > { %617 = vst.msk [vmem:[#allocation2 + $0x244] sm:$0xf] %vm587_vm1, %v550_v41  ;;  %616 = vst.msk [vmem:[#allocation2 + $0x230] sm:$0xf] %vm587_vm1, %v548_v47  ;;  %4862 = vmatpush3.bf16.msra.mxu1 %v5125_v9  ;;  %v383_v9 = vld [vmem:[%s5357_s11 + $0xf1] sm:$0xff]  ;;  %v4594_v13 = vpack.c.bf16 %v4008_v7, %v4008_v7 }
  0xb1   : > { %1860 = vrot.lane.b32.xlu1 %v5823_v59, %s5265_s20  ;;  %1858 = vrot.lane.b32.xlu0 %v5825_v61, %s5265_s20  ;;  %1244 = vst.msk [vmem:[#allocation2 + $0x134] sm:$0xf] %vm330_vm0, %v4595_v12 }
  0xb2   : > { %4863 = vmatprep.subr.bf16.mxu1 %v5126_v15  ;;  %1243 = vst.msk [vmem:[#allocation2 + $0x120] sm:$0xf] %vm330_vm0, %v4594_v13  ;;  %v4252_v13 = vld [vmem:[%s5357_s11 + $0x4a] sm:$0xff] }
  0xb3   : > { %v1000_v27 = vpop.permute.xlu1 %999  ;;  %v998_v59 = vpop.permute.xlu0 %997  ;;  %v2164_v28 = vld [vmem:[#allocation2 + $0x28] sm:$0xff]  ;;  %v2167_v29 = vld [vmem:[#allocation2 + $0x3c] sm:$0xff]  ;;  %v4710_v37 = vpack.c.bf16 %v4252_v13, %v4252_v13 }
  0xb4   : > { %v5108_v61 = vld [vmem:[#allocation2 + $0x2c] ss:$20 sps:$4 sm:$0xff]   ;;  %1066 = vst.msk [vmem:[#allocation2 + $0x248] sm:$0xf] %vm587_vm1, %v1000_v27  ;;  %1065 = vst.msk [vmem:[#allocation2 + $0x234] sm:$0xf] %vm587_vm1, %v998_v59  ;;  %v4320_v52 = vcombine.low %v2164_v28, %v2167_v29  ;;  %4864 = vmatpush3.bf16.msra.mxu1 %v5127_v43 }
  0xb5   : > { %529 = vrot.lane.b32.xlu1 %v5942_v18, %s5265_s20  ;;  %527 = vrot.lane.b32.xlu0 %v5944_v30, %s5265_s20  ;;  %v193_v27 = vld [vmem:[%s5357_s11 + $0x110] sm:$0xff]  ;;  %v192_v28 = vld [vmem:[%s5357_s11 + $0x108] sm:$0xff]  ;;  %2128 = vst.msk [vmem:[#allocation2 + $0x38] sm:$0xf] %vm330_vm0, %v4710_v37 }
  0xb6   : > { %3038 = vmatprep.mubr.bf16.mxu0 %v5108_v61  ;;  %4865 = vmatprep.subr.bf16.mxu1 %v5130_v24  ;;  %v5166_v24 = vld [vmem:[%s6943_s1 + $0x100] sm:$0xff]   ;;  %v4475_v59 = vpack.c.bf16 %v193_v27, %v193_v27  ;;  %v4014_v27 = vld [vmem:[%s5357_s11 + $0x109] sm:$0xff]  ;;  %v4144_v37 = vld [vmem:[%s5357_s11 + $0x138] sm:$0xff] }
  0xb7   : > { %v502_v50 = vpop.permute.xlu1 %501  ;;  %v500_v62 = vpop.permute.xlu0 %499  ;;  %3039 = vmatmul.mubr.bf16.gmra.mxu0 %v4320_v52  ;;  %4991 = vmatprep.subr.bf16.mxu0 %v5166_v24  ;;  %v4474_v52 = vpack.c.bf16 %v192_v28, %v192_v28 }
  0xb8   : > { %593 = vst.msk [vmem:[#allocation2 + $0x64] sm:$0xf] %vm587_vm1, %v502_v50  ;;  %592 = vst.msk [vmem:[#allocation2 + $0x50] sm:$0xf] %vm587_vm1, %v500_v62  ;;  %4866 = vmatpush3.bf16.msra.mxu1 %v5131_v53  ;;  %4992 = vmatpush3.bf16.msra.mxu0 %v5166_v24  ;;  %v386_v50 = vld [vmem:[%s5357_s11 + $0x111] sm:$0xff]  ;;  %v385_v62 = vld [vmem:[%s5357_s11 + $0x109] sm:$0xff] }
  0xb9   : > { %979 = vrot.lane.b32.xlu1 %v4567_v34, %s5265_s20  ;;  %977 = vrot.lane.b32.xlu0 %v4566_v35, %s5265_s20  ;;  %354 = vst.msk [vmem:[#allocation2 + $0x1cc] sm:$0xf] %vm330_vm0, %v4475_v59  ;;  %1697 = vst.msk [vmem:[#allocation2 + $0x188] sm:$0xf] %vm330_vm0, %v4475_v59  ;;  %v4600_v59 = vpack.c.bf16 %v4014_v27, %v4014_v27 }
  0xba   : > { %4867 = vmatprep.subr.bf16.mxu1 %v5132_v44  ;;  %353 = vst.msk [vmem:[#allocation2 + $0x1b8] sm:$0xf] %vm330_vm0, %v4474_v52  ;;  %1696 = vst.msk [vmem:[#allocation2 + $0x174] sm:$0xf] %vm330_vm0, %v4474_v52  ;;  %v4255_v52 = vld [vmem:[%s5357_s11 + $0x6a] sm:$0xff] }
  0xbb   : > { %v952_v23 = vpop.permute.xlu1 %951  ;;  %v950_v63 = vpop.permute.xlu0 %949  ;;  %v2242_v11 = vld [vmem:[#allocation2 + $0x230] sm:$0xff]  ;;  %v2245_v0 = vld [vmem:[#allocation2 + $0x244] sm:$0xff]  ;;  %1249 = vst.msk [vmem:[#allocation2 + $0x198] sm:$0xf] %vm330_vm0, %v4600_v59 }
  0xbc   : > { %v5110_v1 = vld [vmem:[#allocation2 + $0x234] ss:$20 sps:$4 sm:$0xff]   ;;  %1042 = vst.msk [vmem:[#allocation2 + $0x68] sm:$0xf] %vm587_vm1, %v952_v23  ;;  %1041 = vst.msk [vmem:[#allocation2 + $0x54] sm:$0xf] %vm587_vm1, %v950_v63  ;;  %v4385_v5 = vcombine.low %v2242_v11, %v2245_v0  ;;  %4868 = vmatpush3.bf16.msra.mxu1 %v5133_v22  ;;  %v4597_v22 = vpack.c.bf16 %v4011_v60, %v4011_v60  ;;  %v4596_v23 = vpack.c.bf16 %v4010_v46, %v4010_v46 }
  0xbd   : > { %1415 = vrot.lane.b32.xlu1 %v5586_v32, %s5265_s20  ;;  %1413 = vrot.lane.b32.xlu0 %v5588_v33, %s5265_s20  ;;  %v5995_v32 = vpack.c.bf16 %v384_v8, %v384_v8  ;;  %v5997_v33 = vpack.c.bf16 %v383_v9, %v383_v9  ;;  %v4250_v0 = vld [vmem:[%s5357_s11 + $0x32] sm:$0xff] }
  0xbe   : > { %3142 = vmatprep.mubr.bf16.mxu1 %v5110_v1  ;;  %1246 = vst.msk [vmem:[#allocation2 + $0x15c] sm:$0xf] %vm330_vm0, %v4597_v22  ;;  %1245 = vst.msk [vmem:[#allocation2 + $0x148] sm:$0xf] %vm330_vm0, %v4596_v23  ;;  %v4251_v1 = vld [vmem:[%s5357_s11 + $0x3a] sm:$0xff]  ;;  %v4708_v12 = vpack.c.bf16 %v4250_v0, %v4250_v0  ;;  %v4260_v0 = vld [vmem:[%s5357_s11 + $0xaa] sm:$0xff] }
  0xbf   : > { %v554_v14 = vpop.permute.xlu1 %553  ;;  %v552_v15 = vpop.permute.xlu0 %551  ;;  %3143 = vmatmul.mubr.bf16.gmra.mxu1 %v4385_v5 }
  0xc0   : > { %619 = vst.msk [vmem:[#allocation2 + $0x26c] sm:$0xf] %vm587_vm1, %v554_v14  ;;  %618 = vst.msk [vmem:[#allocation2 + $0x258] sm:$0xf] %vm587_vm1, %v552_v15  ;;  %v4253_v14 = vld [vmem:[%s5357_s11 + $0x52] sm:$0xff] }
  0xc1   : > { %1864 = vrot.lane.b32.xlu1 %v5872_v31, %s5265_s20  ;;  %1862 = vrot.lane.b32.xlu0 %v5874_v19, %s5265_s20  ;;  %v4569_v19 = vpack.c.bf16 %v3951_v36, %v3951_v36  ;;  %v4013_v15 = vld [vmem:[%s5357_s11 + $0xf9] sm:$0xff]  ;;  %v4012_v36 = vld [vmem:[%s5357_s11 + $0xf1] sm:$0xff]  ;;  %2126 = vst.msk [vmem:[#allocation2 + $0x10] sm:$0xf] %vm330_vm0, %v4708_v12 }
  0xc3   : > { %v1004_v41 = vpop.permute.xlu1 %1003  ;;  %v1002_v47 = vpop.permute.xlu0 %1001  ;;  %v2170_v48 = vld [vmem:[#allocation2 + $0x50] sm:$0xff]  ;;  %v2173_v43 = vld [vmem:[#allocation2 + $0x64] sm:$0xff] }
  0xc4   : > { %v5116_v20 = vld [vmem:[#allocation2 + $0x54] ss:$20 sps:$4 sm:$0xff]   ;;  %1068 = vst.msk [vmem:[#allocation2 + $0x270] sm:$0xf] %vm587_vm1, %v1004_v41  ;;  %1067 = vst.msk [vmem:[#allocation2 + $0x25c] sm:$0xf] %vm587_vm1, %v1002_v47  ;;  %v4325_v31 = vcombine.low %v2170_v48, %v2173_v43  ;;  %v4711_v41 = vpack.c.bf16 %v4253_v14, %v4253_v14  ;;  %v4599_v47 = vpack.c.bf16 %v4013_v15, %v4013_v15 }
  0xc5   : > { %533 = vrot.lane.b32.xlu1 %v5995_v32, %s5265_s20  ;;  %531 = vrot.lane.b32.xlu0 %v5997_v33, %s5265_s20  ;;  %v4598_v48 = vpack.c.bf16 %v4012_v36, %v4012_v36  ;;  %v4081_v15 = vld [vmem:[%s5357_s11 + $0x12a] sm:$0xff]  ;;  %v4145_v36 = vld [vmem:[%s5357_s11 + $0x140] sm:$0xff] }
  0xc6   : > { %3046 = vmatprep.mubr.bf16.mxu0 %v5116_v20  ;;  %2129 = vst.msk [vmem:[#allocation2 + $0x4c] sm:$0xf] %vm330_vm0, %v4711_v41  ;;  %1248 = vst.msk [vmem:[#allocation2 + $0x184] sm:$0xf] %vm330_vm0, %v4599_v47  ;;  %v4666_v41 = vpack.c.bf16 %v4144_v37, %v4144_v37  ;;  %v4263_v47 = vld [vmem:[%s5357_s11 + $0xca] sm:$0xff]  ;;  %v4635_v59 = vpack.c.bf16 %v4081_v15, %v4081_v15 }
  0xc7   : > { %v506_v29 = vpop.permute.xlu1 %505  ;;  %v504_v61 = vpop.permute.xlu0 %503  ;;  %3047 = vmatmul.mubr.bf16.gmra.mxu0 %v4325_v31  ;;  %1247 = vst.msk [vmem:[#allocation2 + $0x170] sm:$0xf] %vm330_vm0, %v4598_v48 }
  0xc8   : > { %595 = vst.msk [vmem:[#allocation2 + $0x8c] sm:$0xf] %vm587_vm1, %v506_v29  ;;  %594 = vst.msk [vmem:[#allocation2 + $0x78] sm:$0xf] %vm587_vm1, %v504_v61  ;;  %v4254_v61 = vld [vmem:[%s5357_s11 + $0x62] sm:$0xff] }
  0xc9   : > { %983 = vrot.lane.b32.xlu1 %v4569_v19, %s5265_s20  ;;  %981 = vrot.lane.b32.xlu0 %v4568_v21, %s5265_s20  ;;  %1700 = vst.msk [vmem:[#allocation2 + $0x1c4] sm:$0xf] %vm330_vm0, %v4666_v41  ;;  %v4270_v41 = vld [vmem:[%s5357_s11 + $0x122] sm:$0xff] }
  0xcb   : > { %v956_v53 = vpop.permute.xlu1 %955  ;;  %v954_v34 = vpop.permute.xlu0 %953  ;;  %v2248_v35 = vld [vmem:[#allocation2 + $0x258] sm:$0xff]  ;;  %v2251_v38 = vld [vmem:[#allocation2 + $0x26c] sm:$0xff] }
  0xcc   : > { %v5122_v42 = vld [vmem:[#allocation2 + $0x25c] ss:$20 sps:$4 sm:$0xff]   ;;  %1044 = vst.msk [vmem:[#allocation2 + $0x90] sm:$0xf] %vm587_vm1, %v956_v53  ;;  %1043 = vst.msk [vmem:[#allocation2 + $0x7c] sm:$0xf] %vm587_vm1, %v954_v34  ;;  %v4390_v44 = vcombine.low %v2248_v35, %v2251_v38 }
  0xcd   : > { %1419 = vrot.lane.b32.xlu1 %v5624_v16, %s5265_s20  ;;  %1417 = vrot.lane.b32.xlu0 %v5628_v17, %s5265_s20  ;;  %v6038_v16 = vpack.c.bf16 %v386_v50, %v386_v50  ;;  %v6040_v17 = vpack.c.bf16 %v385_v62, %v385_v62  ;;  %v4256_v53 = vld [vmem:[%s5357_s11 + $0x7a] sm:$0xff]  ;;  %v4257_v34 = vld [vmem:[%s5357_s11 + $0x82] sm:$0xff] }
  0xce   : > { %3150 = vmatprep.mubr.bf16.mxu1 %v5122_v42  ;;  %v4714_v35 = vpack.c.bf16 %v4256_v53, %v4256_v53  ;;  %v4715_v38 = vpack.c.bf16 %v4257_v34, %v4257_v34  ;;  %v4143_v42 = vld [vmem:[%s5357_s11 + $0x128] sm:$0xff]  ;;  %v4147_v53 = vld [vmem:[%s5357_s11 + $0x158] sm:$0xff] }
  0xcf   : > { %v1392_v63 = vpop.permute.xlu1 %1391  ;;  %v1390_v11 = vpop.permute.xlu0 %1389  ;;  %3151 = vmatmul.mubr.bf16.gmra.mxu1 %v4390_v44  ;;  %v4142_v44 = vld [vmem:[%s5357_s11 + $0x120] sm:$0xff]  ;;  %v4665_v22 = vpack.c.bf16 %v4143_v42, %v4143_v42 }
  0xd0   : > { %1486 = vst.msk [vmem:[#allocation2 + $0x1c] sm:$0xf] %vm587_vm1, %v1392_v63  ;;  %1485 = vst.msk [vmem:[#allocation2 + $0x8] sm:$0xf] %vm587_vm1, %v1390_v11  ;;  %v4258_v63 = vld [vmem:[%s5357_s11 + $0x92] sm:$0xff]  ;;  %v4259_v11 = vld [vmem:[%s5357_s11 + $0x9a] sm:$0xff] }
  0xd1   : > { %1868 = vrot.lane.b32.xlu1 %v5942_v18, %s5265_s20  ;;  %1866 = vrot.lane.b32.xlu0 %v5944_v30, %s5265_s20  ;;  %v4709_v18 = vpack.c.bf16 %v4251_v1, %v4251_v1  ;;  %2132 = vst.msk [vmem:[#allocation2 + $0x88] sm:$0xf] %vm330_vm0, %v4714_v35  ;;  %2133 = vst.msk [vmem:[#allocation2 + $0x9c] sm:$0xf] %vm330_vm0, %v4715_v38  ;;  %v4716_v1 = vpack.c.bf16 %v4258_v63, %v4258_v63 }
  0xd2   : > { %1699 = vst.msk [vmem:[#allocation2 + $0x1b0] sm:$0xf] %vm330_vm0, %v4665_v22 }
  0xd3   : > { %v1841_v5 = vpop.permute.xlu1 %1840  ;;  %v1839_v6 = vpop.permute.xlu0 %1838  ;;  %v2176_v7 = vld [vmem:[#allocation2 + $0x78] sm:$0xff]  ;;  %v2179_v8 = vld [vmem:[#allocation2 + $0x8c] sm:$0xff]  ;;  %2127 = vst.msk [vmem:[#allocation2 + $0x24] sm:$0xf] %vm330_vm0, %v4709_v18  ;;  %2134 = vst.msk [vmem:[#allocation2 + $0xb0] sm:$0xf] %vm330_vm0, %v4716_v1 }
  0xd4   : > { %v5128_v9 = vld [vmem:[#allocation2 + $0x7c] ss:$20 sps:$4 sm:$0xff]   ;;  %1935 = vst.msk [vmem:[#allocation2 + $0x20] sm:$0xf] %vm587_vm1, %v1841_v5  ;;  %1934 = vst.msk [vmem:[#allocation2 + $0xc] sm:$0xf] %vm587_vm1, %v1839_v6  ;;  %v4330_v30 = vcombine.low %v2176_v7, %v2179_v8  ;;  %v4717_v5 = vpack.c.bf16 %v4259_v11, %v4259_v11  ;;  %v4718_v7 = vpack.c.bf16 %v4260_v0, %v4260_v0 }
  0xd5   : > { %537 = vrot.lane.b32.xlu1 %v6038_v16, %s5265_s20  ;;  %535 = vrot.lane.b32.xlu0 %v6040_v17, %s5265_s20  ;;  %v4261_v6 = vld [vmem:[%s5357_s11 + $0xb2] sm:$0xff] }
  0xd6   : > { %3054 = vmatprep.mubr.bf16.mxu0 %v5128_v9  ;;  %v4719_v8 = vpack.c.bf16 %v4261_v6, %v4261_v6  ;;  %2135 = vst.msk [vmem:[#allocation2 + $0xc4] sm:$0xf] %vm330_vm0, %v4717_v5  ;;  %2136 = vst.msk [vmem:[#allocation2 + $0xd8] sm:$0xf] %vm330_vm0, %v4718_v7  ;;  %v4021_v11 = vld [vmem:[%s5357_s11 + $0x159] sm:$0xff]  ;;  %v4020_v0 = vld [vmem:[%s5357_s11 + $0x151] sm:$0xff] }
  0xd7   : > { %v510_v43 = vpop.permute.xlu1 %509  ;;  %v508_v20 = vpop.permute.xlu0 %507  ;;  %3055 = vmatmul.mubr.bf16.gmra.mxu0 %v4330_v30  ;;  %v5134_v21 = vld [vmem:[#allocation2 + $0x8] ss:$20 sps:$4 sm:$0xff]   ;;  %v4607_v7 = vpack.c.bf16 %v4021_v11, %v4021_v11 }
  0xd8   : > { %597 = vst.msk [vmem:[#allocation2 + $0xb4] sm:$0xf] %vm587_vm1, %v510_v43  ;;  %596 = vst.msk [vmem:[#allocation2 + $0xa0] sm:$0xf] %vm587_vm1, %v508_v20  ;;  %v4264_v43 = vld [vmem:[%s5357_s11 + $0xda] sm:$0xff]  ;;  %v4080_v20 = vld [vmem:[%s5357_s11 + $0x122] sm:$0xff] }
  0xd9   : > { %987 = vrot.lane.b32.xlu1 %v5496_v10, %s5265_s20  ;;  %985 = vrot.lane.b32.xlu0 %v5475_v2, %s5265_s20  ;;  %v4015_v10 = vld [vmem:[%s5357_s11 + $0x111] sm:$0xff]  ;;  %2137 = vst.msk [vmem:[#allocation2 + $0xec] sm:$0xf] %vm330_vm0, %v4719_v8  ;;  %v4606_v8 = vpack.c.bf16 %v4020_v0, %v4020_v0  ;;  %1256 = vst.msk [vmem:[#allocation2 + $0x224] sm:$0xf] %vm330_vm0, %v4607_v7  ;;  %v4215_v0 = vld [vmem:[%s5357_s11 + $0x189] sm:$0xff] }
  0xda   : > { %v4601_v2 = vpack.c.bf16 %v4015_v10, %v4015_v10 }
  0xdb   : > { %v960_v31 = vpop.permute.xlu1 %959  ;;  %v958_v19 = vpop.permute.xlu0 %957  ;;  %v5136_v24 = vld [vmem:[#allocation2 + $0xc] ss:$20 sps:$4 sm:$0xff]   ;;  %1255 = vst.msk [vmem:[#allocation2 + $0x210] sm:$0xf] %vm330_vm0, %v4606_v8 }
  0xdc   : > { %1046 = vst.msk [vmem:[#allocation2 + $0xb8] sm:$0xf] %vm587_vm1, %v960_v31  ;;  %1045 = vst.msk [vmem:[#allocation2 + $0xa4] sm:$0xf] %vm587_vm1, %v958_v19  ;;  %3191 = vmatprep.mubr.bf16.mxu1 %v5136_v24  ;;  %v4721_v31 = vpack.c.bf16 %v4263_v47, %v4263_v47  ;;  %v4722_v19 = vpack.c.bf16 %v4264_v43, %v4264_v43  ;;  %v4271_v47 = vld [vmem:[%s5357_s11 + $0x12a] sm:$0xff]  ;;  %v4728_v43 = vpack.c.bf16 %v4270_v41, %v4270_v41 }
  0xdd   : > { %1423 = vrot.lane.b32.xlu1 %v5663_v51, %s5265_s20  ;;  %1421 = vrot.lane.b32.xlu0 %v5665_v58, %s5265_s20  ;;  %1250 = vst.msk [vmem:[#allocation2 + $0x1ac] sm:$0xf] %vm330_vm0, %v4601_v2  ;;  %v4712_v51 = vpack.c.bf16 %v4254_v61, %v4254_v61  ;;  %v4713_v58 = vpack.c.bf16 %v4255_v52, %v4255_v52  ;;  %v4265_v2 = vld [vmem:[%s5357_s11 + $0xe2] sm:$0xff]  ;;  %v4208_v61 = vld [vmem:[%s5357_s11 + $0x139] sm:$0xff] }
  0xde   : > { %3192 = vmatmul.mubr.bf16.vlgmr.msra.gmra.mxu1 %v5134_v21  ;;  %2139 = vst.msk [vmem:[#allocation2 + $0x114] sm:$0xf] %vm330_vm0, %v4721_v31  ;;  %2140 = vst.msk [vmem:[#allocation2 + $0x128] sm:$0xf] %vm330_vm0, %v4722_v19  ;;  %v4723_v52 = vpack.c.bf16 %v4265_v2, %v4265_v2  ;;  %v4272_v31 = vld [vmem:[%s5357_s11 + $0x13a] sm:$0xff]  ;;  %v4273_v19 = vld [vmem:[%s5357_s11 + $0x142] sm:$0xff] }
  0xdf   : > { %v1396_v28 = vpop.permute.xlu1 %1395  ;;  %v1394_v29 = vpop.permute.xlu0 %1393  ;;  %2130 = vst.msk [vmem:[#allocation2 + $0x60] sm:$0xf] %vm330_vm0, %v4712_v51  ;;  %2131 = vst.msk [vmem:[#allocation2 + $0x74] sm:$0xf] %vm330_vm0, %v4713_v58  ;;  %v4146_v51 = vld [vmem:[%s5357_s11 + $0x150] sm:$0xff] }
  0xe0   : > { %1488 = vst.msk [vmem:[#allocation2 + $0x44] sm:$0xf] %vm587_vm1, %v1396_v28  ;;  %1487 = vst.msk [vmem:[#allocation2 + $0x30] sm:$0xf] %vm587_vm1, %v1394_v29  ;;  %v4634_v28 = vpack.c.bf16 %v4080_v20, %v4080_v20  ;;  %v4209_v29 = vld [vmem:[%s5357_s11 + $0x141] sm:$0xff]  ;;  %v4668_v42 = vpack.c.bf16 %v4146_v51, %v4146_v51  ;;  %v4729_v20 = vpack.c.bf16 %v4271_v47, %v4271_v47  ;;  %v4213_v2 = vld [vmem:[%s5357_s11 + $0x171] sm:$0xff] }
  0xe1   : > { %1872 = vrot.lane.b32.xlu1 %v5995_v32, %s5265_s20  ;;  %1870 = vrot.lane.b32.xlu0 %v5997_v33, %s5265_s20  ;;  %v4664_v33 = vpack.c.bf16 %v4142_v44, %v4142_v44  ;;  %2141 = vst.msk [vmem:[#allocation2 + $0x13c] sm:$0xf] %vm330_vm0, %v4723_v52  ;;  %2146 = vst.msk [vmem:[#allocation2 + $0x1a0] sm:$0xf] %vm330_vm0, %v4728_v43  ;;  %v4281_v47 = vld [vmem:[%s5357_s11 + $0x1a2] sm:$0xff] }
  0xe2   : > { %1702 = vst.msk [vmem:[#allocation2 + $0x1ec] sm:$0xf] %vm330_vm0, %v4668_v42  ;;  %2147 = vst.msk [vmem:[#allocation2 + $0x1b4] sm:$0xf] %vm330_vm0, %v4729_v20  ;;  %v4274_v42 = vld [vmem:[%s5357_s11 + $0x152] sm:$0xff]  ;;  %v4088_v43 = vld [vmem:[%s5357_s11 + $0x182] sm:$0xff]  ;;  %v4739_v20 = vpack.c.bf16 %v4281_v47, %v4281_v47 }
  0xe3   : > { %v1845_v60 = vpop.permute.xlu1 %1844  ;;  %v1843_v46 = vpop.permute.xlu0 %1842  ;;  %v2182_v50 = vld [vmem:[#allocation2 + $0xa0] sm:$0xff]  ;;  %v2185_v62 = vld [vmem:[#allocation2 + $0xb4] sm:$0xff]  ;;  %1698 = vst.msk [vmem:[#allocation2 + $0x19c] sm:$0xf] %vm330_vm0, %v4664_v33 }
  0xe4   : > { %v5137_v32 = vld [vmem:[#allocation2 + $0xa4] ss:$20 sps:$4 sm:$0xff]   ;;  %1937 = vst.msk [vmem:[#allocation2 + $0x48] sm:$0xf] %vm587_vm1, %v1845_v60  ;;  %1936 = vst.msk [vmem:[#allocation2 + $0x34] sm:$0xf] %vm587_vm1, %v1843_v46  ;;  %v4335_v23 = vcombine.low %v2182_v50, %v2185_v62  ;;  %v4699_v60 = vpack.c.bf16 %v4209_v29, %v4209_v29  ;;  %v4698_v46 = vpack.c.bf16 %v4208_v61, %v4208_v61 }
  0xe5   : > { %1427 = vrot.lane.b32.xlu1 %v5697_v56, %s5265_s20  ;;  %1425 = vrot.lane.b32.xlu0 %v5699_v57, %s5265_s20  ;;  %v4266_v50 = vld [vmem:[%s5357_s11 + $0xf2] sm:$0xff]  ;;  %v4267_v62 = vld [vmem:[%s5357_s11 + $0xfa] sm:$0xff]  ;;  %2157 = vst.msk [vmem:[#allocation2 + $0x27c] sm:$0xf] %vm330_vm0, %v4739_v20 }
  0xe6   : > { %3062 = vmatprep.mubr.bf16.mxu0 %v5137_v32  ;;  %v4268_v32 = vld [vmem:[%s5357_s11 + $0x10a] sm:$0xff]  ;;  %v4724_v22 = vpack.c.bf16 %v4266_v50, %v4266_v50  ;;  %v4725_v33 = vpack.c.bf16 %v4267_v62, %v4267_v62  ;;  %v4150_v29 = vld [vmem:[%s5357_s11 + $0x180] sm:$0xff]  ;;  %v4277_v62 = vld [vmem:[%s5357_s11 + $0x172] sm:$0xff] }
  0xe7   : > { %v514_v9 = vpop.permute.xlu1 %513  ;;  %v512_v12 = vpop.permute.xlu0 %511  ;;  %3063 = vmatmul.mubr.bf16.gmra.mxu0 %v4335_v23  ;;  %v4269_v23 = vld [vmem:[%s5357_s11 + $0x112] sm:$0xff]  ;;  %v4726_v63 = vpack.c.bf16 %v4268_v32, %v4268_v32 }
  0xe8   : > { %599 = vst.msk [vmem:[#allocation2 + $0xdc] sm:$0xf] %vm587_vm1, %v514_v9  ;;  %598 = vst.msk [vmem:[#allocation2 + $0xc8] sm:$0xf] %vm587_vm1, %v512_v12  ;;  %v4727_v1 = vpack.c.bf16 %v4269_v23, %v4269_v23  ;;  %v4211_v9 = vld [vmem:[%s5357_s11 + $0x159] sm:$0xff]  ;;  %v4210_v12 = vld [vmem:[%s5357_s11 + $0x151] sm:$0xff] }
  0xe9   : > { %1876 = vrot.lane.b32.xlu1 %v6038_v16, %s5265_s20  ;;  %1874 = vrot.lane.b32.xlu0 %v6040_v17, %s5265_s20  ;;  %v4262_v16 = vld [vmem:[%s5357_s11 + $0xc2] sm:$0xff]  ;;  %v4667_v17 = vpack.c.bf16 %v4145_v36, %v4145_v36  ;;  %2142 = vst.msk [vmem:[#allocation2 + $0x150] sm:$0xf] %vm330_vm0, %v4724_v22  ;;  %2143 = vst.msk [vmem:[#allocation2 + $0x164] sm:$0xf] %vm330_vm0, %v4725_v33  ;;  %v4701_v37 = vpack.c.bf16 %v4211_v9, %v4211_v9 }
  0xea   : > { %v4720_v48 = vpack.c.bf16 %v4262_v16, %v4262_v16  ;;  %2144 = vst.msk [vmem:[#allocation2 + $0x178] sm:$0xf] %vm330_vm0, %v4726_v63  ;;  %2145 = vst.msk [vmem:[#allocation2 + $0x18c] sm:$0xf] %vm330_vm0, %v4727_v1  ;;  %v4700_v16 = vpack.c.bf16 %v4210_v12, %v4210_v12  ;;  %v4735_v22 = vpack.c.bf16 %v4277_v62, %v4277_v62  ;;  %v4025_v63 = vld [vmem:[%s5357_s11 + $0x189] sm:$0xff]  ;;  %v4214_v1 = vld [vmem:[%s5357_s11 + $0x181] sm:$0xff] }
  0xeb   : > { %v964_v56 = vpop.permute.xlu1 %963  ;;  %v962_v57 = vpop.permute.xlu0 %961  ;;  %v2165_v18 = vld [vmem:[#allocation2 + $0x30] sm:$0xff]  ;;  %v2168_v30 = vld [vmem:[#allocation2 + $0x44] sm:$0xff]  ;;  %1701 = vst.msk [vmem:[#allocation2 + $0x1d8] sm:$0xf] %vm330_vm0, %v4667_v17 }
  0xec   : > { %v5139_v13 = vld [vmem:[#allocation2 + $0x34] ss:$20 sps:$4 sm:$0xff]   ;;  %1048 = vst.msk [vmem:[#allocation2 + $0xe0] sm:$0xf] %vm587_vm1, %v964_v56  ;;  %1047 = vst.msk [vmem:[#allocation2 + $0xcc] sm:$0xf] %vm587_vm1, %v962_v57  ;;  %v4322_v14 = vcombine.low %v2165_v18, %v2168_v30 }
  0xed   : > { %1431 = vrot.lane.b32.xlu1 %v5719_v25, %s5265_s20  ;;  %1429 = vrot.lane.b32.xlu0 %v5721_v26, %s5265_s20  ;;  %v4019_v25 = vld [vmem:[%s5357_s11 + $0x141] sm:$0xff]  ;;  %v4018_v26 = vld [vmem:[%s5357_s11 + $0x139] sm:$0xff]  ;;  %2138 = vst.msk [vmem:[#allocation2 + $0x100] sm:$0xf] %vm330_vm0, %v4720_v48  ;;  %2153 = vst.msk [vmem:[#allocation2 + $0x22c] sm:$0xf] %vm330_vm0, %v4735_v22 }
  0xee   : > { %3199 = vmatprep.mubr.bf16.mxu1 %v5139_v13  ;;  %v4605_v10 = vpack.c.bf16 %v4019_v25, %v4019_v25  ;;  %v4604_v27 = vpack.c.bf16 %v4018_v26, %v4018_v26  ;;  %v4149_v56 = vld [vmem:[%s5357_s11 + $0x170] sm:$0xff]  ;;  %v4148_v17 = vld [vmem:[%s5357_s11 + $0x168] sm:$0xff] }
  0xef   : > { %v1400_v21 = vpop.permute.xlu1 %1399  ;;  %v1398_v24 = vpop.permute.xlu0 %1397  ;;  %3200 = vmatmul.mubr.bf16.gmra.mxu1 %v4322_v14  ;;  %v4671_v15 = vpack.c.bf16 %v4149_v56, %v4149_v56  ;;  %v4670_v48 = vpack.c.bf16 %v4148_v17, %v4148_v17 }
  0xf0   : > { %1490 = vst.msk [vmem:[#allocation2 + $0x6c] sm:$0xf] %vm587_vm1, %v1400_v21  ;;  %1489 = vst.msk [vmem:[#allocation2 + $0x58] sm:$0xf] %vm587_vm1, %v1398_v24  ;;  %v4730_v21 = vpack.c.bf16 %v4272_v31, %v4272_v31  ;;  %v4731_v24 = vpack.c.bf16 %v4273_v19, %v4273_v19 }
  0xf1   : > { %1880 = vrot.lane.b32.xlu1 %v5739_v45, %s5265_s20  ;;  %1878 = vrot.lane.b32.xlu0 %v5741_v49, %s5265_s20  ;;  %1254 = vst.msk [vmem:[#allocation2 + $0x1fc] sm:$0xf] %vm330_vm0, %v4605_v10  ;;  %1253 = vst.msk [vmem:[#allocation2 + $0x1e8] sm:$0xf] %vm330_vm0, %v4604_v27  ;;  %v4669_v49 = vpack.c.bf16 %v4147_v53, %v4147_v53 }
  0xf2   : > { %1705 = vst.msk [vmem:[#allocation2 + $0x228] sm:$0xf] %vm330_vm0, %v4671_v15  ;;  %1704 = vst.msk [vmem:[#allocation2 + $0x214] sm:$0xf] %vm330_vm0, %v4670_v48  ;;  %v4278_v15 = vld [vmem:[%s5357_s11 + $0x182] sm:$0xff] }
  0xf3   : > { %v1849_v58 = vpop.permute.xlu1 %1848  ;;  %v1847_v34 = vpop.permute.xlu0 %1846  ;;  %v2188_v45 = vld [vmem:[#allocation2 + $0xc8] sm:$0xff]  ;;  %v2191_v35 = vld [vmem:[#allocation2 + $0xdc] sm:$0xff]  ;;  %1703 = vst.msk [vmem:[#allocation2 + $0x200] sm:$0xf] %vm330_vm0, %v4669_v49  ;;  %2148 = vst.msk [vmem:[#allocation2 + $0x1c8] sm:$0xf] %vm330_vm0, %v4730_v21  ;;  %v4736_v17 = vpack.c.bf16 %v4278_v15, %v4278_v15 }
  0xf4   : > { %v5141_v38 = vld [vmem:[#allocation2 + $0xcc] ss:$20 sps:$4 sm:$0xff]   ;;  %1939 = vst.msk [vmem:[#allocation2 + $0x70] sm:$0xf] %vm587_vm1, %v1849_v58  ;;  %1938 = vst.msk [vmem:[#allocation2 + $0x5c] sm:$0xf] %vm587_vm1, %v1847_v34  ;;  %v4340_v44 = vcombine.low %v2188_v45, %v2191_v35  ;;  %v4672_v45 = vpack.c.bf16 %v4150_v29, %v4150_v29 }
  0xf5   : > { %1435 = vrot.lane.b32.xlu1 %v4635_v59, %s5265_s20  ;;  %1433 = vrot.lane.b32.xlu0 %v4634_v28, %s5265_s20  ;;  %2149 = vst.msk [vmem:[#allocation2 + $0x1dc] sm:$0xf] %vm330_vm0, %v4731_v24  ;;  %v4212_v59 = vld [vmem:[%s5357_s11 + $0x169] sm:$0xff]  ;;  %2154 = vst.msk [vmem:[#allocation2 + $0x240] sm:$0xf] %vm330_vm0, %v4736_v17  ;;  %v4217_v21 = vld [vmem:[%s5357_s11 + $0x1a1] sm:$0xff] }
  0xf6   : > { %3070 = vmatprep.mubr.bf16.mxu0 %v5141_v38  ;;  %v4151_v28 = vld [vmem:[%s5357_s11 + $0x188] sm:$0xff]  ;;  %v4703_v38 = vpack.c.bf16 %v4213_v2, %v4213_v2  ;;  %v4702_v49 = vpack.c.bf16 %v4212_v59, %v4212_v59  ;;  %1706 = vst.msk [vmem:[#allocation2 + $0x23c] sm:$0xf] %vm330_vm0, %v4672_v45  ;;  %v4216_v24 = vld [vmem:[%s5357_s11 + $0x199] sm:$0xff]  ;;  %v4707_v2 = vpack.c.bf16 %v4217_v21, %v4217_v21 }
  0xf7   : > { %v518_v5 = vpop.permute.xlu1 %517  ;;  %v516_v6 = vpop.permute.xlu0 %515  ;;  %3071 = vmatmul.mubr.bf16.gmra.mxu0 %v4340_v44  ;;  %v4673_v34 = vpack.c.bf16 %v4151_v28, %v4151_v28  ;;  %v4275_v44 = vld [vmem:[%s5357_s11 + $0x15a] sm:$0xff]  ;;  %v4706_v59 = vpack.c.bf16 %v4216_v24, %v4216_v24 }
  0xf8   : > { %601 = vst.msk [vmem:[#allocation2 + $0x104] sm:$0xf] %vm587_vm1, %v518_v5  ;;  %600 = vst.msk [vmem:[#allocation2 + $0xf0] sm:$0xf] %vm587_vm1, %v516_v6  ;;  %v4733_v50 = vpack.c.bf16 %v4275_v44, %v4275_v44  ;;  %v4153_v5 = vld [vmem:[%s5357_s11 + $0x1a0] sm:$0xff]  ;;  %v4152_v6 = vld [vmem:[%s5357_s11 + $0x198] sm:$0xff] }
  0xf9   : > { %1884 = vrot.lane.b32.xlu1 %v4699_v60, %s5265_s20  ;;  %1882 = vrot.lane.b32.xlu0 %v4698_v46, %s5265_s20  ;;  %v4276_v60 = vld [vmem:[%s5357_s11 + $0x16a] sm:$0xff]  ;;  %1707 = vst.msk [vmem:[#allocation2 + $0x250] sm:$0xf] %vm330_vm0, %v4673_v34  ;;  %v4732_v46 = vpack.c.bf16 %v4274_v42, %v4274_v42 }
  0xfa   : > { %v4734_v32 = vpack.c.bf16 %v4276_v60, %v4276_v60  ;;  %2151 = vst.msk [vmem:[#allocation2 + $0x204] sm:$0xf] %vm330_vm0, %v4733_v50 }
  0xfb   : > { %v968_v57 = vpop.permute.xlu1 %967  ;;  %v966_v18 = vpop.permute.xlu0 %965  ;;  %v2171_v30 = vld [vmem:[#allocation2 + $0x58] sm:$0xff]  ;;  %v2174_v13 = vld [vmem:[#allocation2 + $0x6c] sm:$0xff]  ;;  %2150 = vst.msk [vmem:[#allocation2 + $0x1f0] sm:$0xf] %vm330_vm0, %v4732_v46 }
  0xfc   : > { %v5143_v14 = vld [vmem:[#allocation2 + $0x5c] ss:$20 sps:$4 sm:$0xff]   ;;  %1050 = vst.msk [vmem:[#allocation2 + $0x108] sm:$0xf] %vm587_vm1, %v968_v57  ;;  %1049 = vst.msk [vmem:[#allocation2 + $0xf4] sm:$0xf] %vm587_vm1, %v966_v18  ;;  %v4327_v36 = vcombine.low %v2171_v30, %v2174_v13  ;;  %v4675_v57 = vpack.c.bf16 %v4153_v5, %v4153_v5  ;;  %v4674_v18 = vpack.c.bf16 %v4152_v6, %v4152_v6 }
  0xfd   : > { %1439 = vrot.lane.b32.xlu1 %v5543_v39, %s5265_s20  ;;  %1437 = vrot.lane.b32.xlu0 %v5545_v40, %s5265_s20  ;;  %v4023_v39 = vld [vmem:[%s5357_s11 + $0x171] sm:$0xff]  ;;  %v4022_v40 = vld [vmem:[%s5357_s11 + $0x169] sm:$0xff]  ;;  %2152 = vst.msk [vmem:[#allocation2 + $0x218] sm:$0xf] %vm330_vm0, %v4734_v32  ;;  %v4705_v13 = vpack.c.bf16 %v4215_v0, %v4215_v0 }
  0xfe   : > { %3207 = vmatprep.mubr.bf16.mxu1 %v5143_v14  ;;  %v4609_v10 = vpack.c.bf16 %v4023_v39, %v4023_v39  ;;  %v4608_v27 = vpack.c.bf16 %v4022_v40, %v4022_v40  ;;  %v4704_v14 = vpack.c.bf16 %v4214_v1, %v4214_v1  ;;  %1709 = vst.msk [vmem:[#allocation2 + $0x278] sm:$0xf] %vm330_vm0, %v4675_v57  ;;  %1708 = vst.msk [vmem:[#allocation2 + $0x264] sm:$0xf] %vm330_vm0, %v4674_v18 }
  0xff   : > { %v1404_v25 = vpop.permute.xlu1 %1403  ;;  %v1402_v26 = vpop.permute.xlu0 %1401  ;;  %3208 = vmatmul.mubr.bf16.gmra.mxu1 %v4327_v36  ;;  %v4279_v36 = vld [vmem:[%s5357_s11 + $0x18a] sm:$0xff] }
 0x100   : > { %1492 = vst.msk [vmem:[#allocation2 + $0x94] sm:$0xf] %vm587_vm1, %v1404_v25  ;;  %1491 = vst.msk [vmem:[#allocation2 + $0x80] sm:$0xf] %vm587_vm1, %v1402_v26  ;;  %v4737_v41 = vpack.c.bf16 %v4279_v36, %v4279_v36 }
 0x101   : > { %1888 = vrot.lane.b32.xlu1 %v4701_v37, %s5265_s20  ;;  %1886 = vrot.lane.b32.xlu0 %v4700_v16, %s5265_s20  ;;  %1258 = vst.msk [vmem:[#allocation2 + $0x24c] sm:$0xf] %vm330_vm0, %v4609_v10  ;;  %1257 = vst.msk [vmem:[#allocation2 + $0x238] sm:$0xf] %vm330_vm0, %v4608_v27  ;;  %v4280_v37 = vld [vmem:[%s5357_s11 + $0x19a] sm:$0xff]  ;;  %v4089_v16 = vld [vmem:[%s5357_s11 + $0x18a] sm:$0xff] }
 0x102   : > { %v4738_v48 = vpack.c.bf16 %v4280_v37, %v4280_v37  ;;  %2155 = vst.msk [vmem:[#allocation2 + $0x254] sm:$0xf] %vm330_vm0, %v4737_v41 }
 0x103   : > { %v1853_v61 = vpop.permute.xlu1 %1852  ;;  %v1851_v52 = vpop.permute.xlu0 %1850  ;;  %v2194_v53 = vld [vmem:[#allocation2 + $0xf0] sm:$0xff]  ;;  %v2197_v51 = vld [vmem:[#allocation2 + $0x104] sm:$0xff] }
 0x104   : > { %v5146_v58 = vld [vmem:[#allocation2 + $0xf4] ss:$20 sps:$4 sm:$0xff]   ;;  %1941 = vst.msk [vmem:[#allocation2 + $0x98] sm:$0xf] %vm587_vm1, %v1853_v61  ;;  %1940 = vst.msk [vmem:[#allocation2 + $0x84] sm:$0xf] %vm587_vm1, %v1851_v52  ;;  %v4345_v35 = vcombine.low %v2194_v53, %v2197_v51 }
 0x105   : > { %1443 = vrot.lane.b32.xlu1 %v5564_v54, %s5265_s20  ;;  %1441 = vrot.lane.b32.xlu0 %v5566_v55, %s5265_s20  ;;  %v4024_v54 = vld [vmem:[%s5357_s11 + $0x181] sm:$0xff]  ;;  %v4611_v55 = vpack.c.bf16 %v4025_v63, %v4025_v63  ;;  %2156 = vst.msk [vmem:[#allocation2 + $0x268] sm:$0xf] %vm330_vm0, %v4738_v48 }
 0x106   : > { %3078 = vmatprep.mubr.bf16.mxu0 %v5146_v58  ;;  %v4610_v11 = vpack.c.bf16 %v4024_v54, %v4024_v54 }
 0x107   : > { %v522_v33 = vpop.permute.xlu1 %521  ;;  %v520_v23 = vpop.permute.xlu0 %519  ;;  %3079 = vmatmul.mubr.bf16.gmra.mxu0 %v4345_v35  ;;  %1260 = vst.msk [vmem:[#allocation2 + $0x274] sm:$0xf] %vm330_vm0, %v4611_v55 }
 0x108   : > { %603 = vst.msk [vmem:[#allocation2 + $0x12c] sm:$0xf] %vm587_vm1, %v522_v33  ;;  %602 = vst.msk [vmem:[#allocation2 + $0x118] sm:$0xf] %vm587_vm1, %v520_v23 }
 0x109   : > { %1892 = vrot.lane.b32.xlu1 %v4703_v38, %s5265_s20  ;;  %1890 = vrot.lane.b32.xlu0 %v4702_v49, %s5265_s20  ;;  %1259 = vst.msk [vmem:[#allocation2 + $0x260] sm:$0xf] %vm330_vm0, %v4610_v11 }
 0x10b   : > { %v972_v7 = vpop.permute.xlu1 %971  ;;  %v970_v8 = vpop.permute.xlu0 %969  ;;  %v2177_v9 = vld [vmem:[#allocation2 + $0x80] sm:$0xff]  ;;  %v2180_v12 = vld [vmem:[#allocation2 + $0x94] sm:$0xff] }
 0x10c   : > { %v5148_v56 = vld [vmem:[#allocation2 + $0x84] ss:$20 sps:$4 sm:$0xff]   ;;  %1052 = vst.msk [vmem:[#allocation2 + $0x130] sm:$0xf] %vm587_vm1, %v972_v7  ;;  %1051 = vst.msk [vmem:[#allocation2 + $0x11c] sm:$0xf] %vm587_vm1, %v970_v8  ;;  %v4332_v30 = vcombine.low %v2177_v9, %v2180_v12 }
 0x10d   : > { %1447 = vrot.lane.b32.xlu1 %v5604_v3, %s5265_s20  ;;  %1445 = vrot.lane.b32.xlu0 %v5606_v4, %s5265_s20  ;;  %v4643_v3 = vpack.c.bf16 %v4089_v16, %v4089_v16  ;;  %v4642_v4 = vpack.c.bf16 %v4088_v43, %v4088_v43 }
 0x10e   : > { %3215 = vmatprep.mubr.bf16.mxu1 %v5148_v56 }
 0x10f   : > { %v1408_v31 = vpop.permute.xlu1 %1407  ;;  %v1406_v19 = vpop.permute.xlu0 %1405  ;;  %3216 = vmatmul.mubr.bf16.gmra.mxu1 %v4332_v30 }
 0x110   : > { %1494 = vst.msk [vmem:[#allocation2 + $0xbc] sm:$0xf] %vm587_vm1, %v1408_v31  ;;  %1493 = vst.msk [vmem:[#allocation2 + $0xa8] sm:$0xf] %vm587_vm1, %v1406_v19 }
 0x111   : > { %1896 = vrot.lane.b32.xlu1 %v4705_v13, %s5265_s20  ;;  %1894 = vrot.lane.b32.xlu0 %v4704_v14, %s5265_s20 }
 0x113   : > { %v1857_v25 = vpop.permute.xlu1 %1856  ;;  %v1855_v26 = vpop.permute.xlu0 %1854  ;;  %v2200_v39 = vld [vmem:[#allocation2 + $0x118] sm:$0xff]  ;;  %v2203_v40 = vld [vmem:[#allocation2 + $0x12c] sm:$0xff] }
 0x114   : > { %v5150_v10 = vld [vmem:[#allocation2 + $0x11c] ss:$20 sps:$4 sm:$0xff]   ;;  %1943 = vst.msk [vmem:[#allocation2 + $0xc0] sm:$0xf] %vm587_vm1, %v1857_v25  ;;  %1942 = vst.msk [vmem:[#allocation2 + $0xac] sm:$0xf] %vm587_vm1, %v1855_v26  ;;  %v4350_v27 = vcombine.low %v2200_v39, %v2203_v40 }
 0x115   : > { %1451 = vrot.lane.b32.xlu1 %v4643_v3, %s5265_s20  ;;  %1449 = vrot.lane.b32.xlu0 %v4642_v4, %s5265_s20  ;;  %v5173_v39 = vld [vmem:[#allocation2 + $0x10] ss:$20 sps:$4 sm:$0xff]  }
 0x116   : > { %3086 = vmatprep.mubr.bf16.mxu0 %v5150_v10 }
 0x117   : > { %v526_v28 = vpop.permute.xlu1 %525  ;;  %v524_v29 = vpop.permute.xlu0 %523  ;;  %3087 = vmatmul.mubr.bf16.gmra.mxu0 %v4350_v27 }
 0x118   : > { %605 = vst.msk [vmem:[#allocation2 + $0x154] sm:$0xf] %vm587_vm1, %v526_v28  ;;  %604 = vst.msk [vmem:[#allocation2 + $0x140] sm:$0xf] %vm587_vm1, %v524_v29 }
 0x119   : > { %1900 = vrot.lane.b32.xlu1 %v4707_v2, %s5265_s20  ;;  %1898 = vrot.lane.b32.xlu0 %v4706_v59, %s5265_s20 }
 0x11b   : > { %v976_v61 = vpop.permute.xlu1 %975  ;;  %v974_v52 = vpop.permute.xlu0 %973  ;;  %v2183_v53 = vld [vmem:[#allocation2 + $0xa8] sm:$0xff]  ;;  %v2186_v51 = vld [vmem:[#allocation2 + $0xbc] sm:$0xff] }
 0x11c   : > { %v5153_v58 = vld [vmem:[#allocation2 + $0xac] ss:$20 sps:$4 sm:$0xff]   ;;  %1054 = vst.msk [vmem:[#allocation2 + $0x158] sm:$0xf] %vm587_vm1, %v976_v61  ;;  %1053 = vst.msk [vmem:[#allocation2 + $0x144] sm:$0xf] %vm587_vm1, %v974_v52  ;;  %v4337_v34 = vcombine.low %v2183_v53, %v2186_v51 }
 0x11d   : > { %3223 = vmatprep.mubr.bf16.mxu1 %v5153_v58  ;;  %v5174_v52 = vld [vmem:[#allocation2 + $0x38] ss:$20 sps:$4 sm:$0xff]   ;;  %v5177_v53 = vld [vmem:[#allocation2 + $0x60] ss:$20 sps:$4 sm:$0xff]  }
 0x11e   : > { %3224 = vmatmul.mubr.bf16.gmra.mxu1 %v4337_v34 }
 0x11f   : > { %v1412_v45 = vpop.permute.xlu1 %1411  ;;  %v1410_v35 = vpop.permute.xlu0 %1409 }
 0x120   : > { %1496 = vst.msk [vmem:[#allocation2 + $0xe4] sm:$0xf] %vm587_vm1, %v1412_v45  ;;  %1495 = vst.msk [vmem:[#allocation2 + $0xd0] sm:$0xf] %vm587_vm1, %v1410_v35 }
 0x123   : > { %v1861_v38 = vpop.permute.xlu1 %1860  ;;  %v1859_v49 = vpop.permute.xlu0 %1858  ;;  %v2206_v42 = vld [vmem:[#allocation2 + $0x140] sm:$0xff]  ;;  %v2209_v44 = vld [vmem:[#allocation2 + $0x154] sm:$0xff] }
 0x124   : > { %v5155_v60 = vld [vmem:[#allocation2 + $0x144] ss:$20 sps:$4 sm:$0xff]   ;;  %1945 = vst.msk [vmem:[#allocation2 + $0xe8] sm:$0xf] %vm587_vm1, %v1861_v38  ;;  %1944 = vst.msk [vmem:[#allocation2 + $0xd4] sm:$0xf] %vm587_vm1, %v1859_v49  ;;  %v4355_v46 = vcombine.low %v2206_v42, %v2209_v44 }
 0x125   : > { %3094 = vmatprep.mubr.bf16.mxu0 %v5155_v60 }
 0x126   : > { %3095 = vmatmul.mubr.bf16.gmra.mxu0 %v4355_v46  ;;  %v5178_v46 = vld [vmem:[#allocation2 + $0x88] ss:$20 sps:$4 sm:$0xff]  }
 0x127   : > { %v530_v50 = vpop.permute.xlu1 %529  ;;  %v528_v62 = vpop.permute.xlu0 %527 }
 0x128   : > { %607 = vst.msk [vmem:[#allocation2 + $0x17c] sm:$0xf] %vm587_vm1, %v530_v50  ;;  %606 = vst.msk [vmem:[#allocation2 + $0x168] sm:$0xf] %vm587_vm1, %v528_v62  ;;  %v5181_v50 = vld [vmem:[#allocation2 + $0xb0] ss:$20 sps:$4 sm:$0xff]  }
 0x12b   : > { %v980_v32 = vpop.permute.xlu1 %979  ;;  %v978_v22 = vpop.permute.xlu0 %977  ;;  %v2189_v33 = vld [vmem:[#allocation2 + $0xd0] sm:$0xff]  ;;  %v2192_v23 = vld [vmem:[#allocation2 + $0xe4] sm:$0xff] }
 0x12c   : > { %v5157_v63 = vld [vmem:[#allocation2 + $0xd4] ss:$20 sps:$4 sm:$0xff]   ;;  %1056 = vst.msk [vmem:[#allocation2 + $0x180] sm:$0xf] %vm587_vm1, %v980_v32  ;;  %1055 = vst.msk [vmem:[#allocation2 + $0x16c] sm:$0xf] %vm587_vm1, %v978_v22  ;;  %v4342_v54 = vcombine.low %v2189_v33, %v2192_v23 }
 0x12d   : > { %3231 = vmatprep.mubr.bf16.mxu1 %v5157_v63 }
 0x12e   : > { %3232 = vmatmul.mubr.bf16.gmra.mxu1 %v4342_v54 }
 0x12f   : > { %v1416_v55 = vpop.permute.xlu1 %1415  ;;  %v1414_v11 = vpop.permute.xlu0 %1413 }
 0x130   : > { %1498 = vst.msk [vmem:[#allocation2 + $0x10c] sm:$0xf] %vm587_vm1, %v1416_v55  ;;  %1497 = vst.msk [vmem:[#allocation2 + $0xf8] sm:$0xf] %vm587_vm1, %v1414_v11 }
 0x133   : > { %v1865_v0 = vpop.permute.xlu1 %1864  ;;  %v1863_v1 = vpop.permute.xlu0 %1862  ;;  %v2212_v5 = vld [vmem:[#allocation2 + $0x168] sm:$0xff]  ;;  %v2215_v6 = vld [vmem:[#allocation2 + $0x17c] sm:$0xff] }
 0x134   : > { %v5160_v7 = vld [vmem:[#allocation2 + $0x16c] ss:$20 sps:$4 sm:$0xff]   ;;  %1947 = vst.msk [vmem:[#allocation2 + $0x110] sm:$0xf] %vm587_vm1, %v1865_v0  ;;  %1946 = vst.msk [vmem:[#allocation2 + $0xfc] sm:$0xf] %vm587_vm1, %v1863_v1  ;;  %v4360_v8 = vcombine.low %v2212_v5, %v2215_v6 }
 0x135   : > { %3102 = vmatprep.mubr.bf16.mxu0 %v5160_v7 }
 0x136   : > { %3103 = vmatmul.mubr.bf16.gmra.mxu0 %v4360_v8  ;;  %v5182_v8 = vld [vmem:[#allocation2 + $0xd8] ss:$20 sps:$4 sm:$0xff]  }
 0x137   : > { %v534_v9 = vpop.permute.xlu1 %533  ;;  %v532_v12 = vpop.permute.xlu0 %531 }
 0x138   : > { %609 = vst.msk [vmem:[#allocation2 + $0x1a4] sm:$0xf] %vm587_vm1, %v534_v9  ;;  %608 = vst.msk [vmem:[#allocation2 + $0x190] sm:$0xf] %vm587_vm1, %v532_v12  ;;  %v5185_v9 = vld [vmem:[#allocation2 + $0x100] ss:$20 sps:$4 sm:$0xff]  }
 0x13b   : > { %v984_v56 = vpop.permute.xlu1 %983  ;;  %v982_v57 = vpop.permute.xlu0 %981  ;;  %v2195_v18 = vld [vmem:[#allocation2 + $0xf8] sm:$0xff]  ;;  %v2198_v30 = vld [vmem:[#allocation2 + $0x10c] sm:$0xff] }
 0x13c   : > { %v5162_v13 = vld [vmem:[#allocation2 + $0xfc] ss:$20 sps:$4 sm:$0xff]   ;;  %1058 = vst.msk [vmem:[#allocation2 + $0x1a8] sm:$0xf] %vm587_vm1, %v984_v56  ;;  %1057 = vst.msk [vmem:[#allocation2 + $0x194] sm:$0xf] %vm587_vm1, %v982_v57  ;;  %v4347_v14 = vcombine.low %v2195_v18, %v2198_v30 }
 0x13d   : > { %3239 = vmatprep.mubr.bf16.mxu1 %v5162_v13 }
 0x13e   : > { %3240 = vmatmul.mubr.bf16.gmra.mxu1 %v4347_v14 }
 0x13f   : > { %v1420_v15 = vpop.permute.xlu1 %1419  ;;  %v1418_v36 = vpop.permute.xlu0 %1417 }
 0x140   : > { %1500 = vst.msk [vmem:[#allocation2 + $0x134] sm:$0xf] %vm587_vm1, %v1420_v15  ;;  %1499 = vst.msk [vmem:[#allocation2 + $0x120] sm:$0xf] %vm587_vm1, %v1418_v36 }
 0x143   : > { %v1869_v37 = vpop.permute.xlu1 %1868  ;;  %v1867_v16 = vpop.permute.xlu0 %1866  ;;  %v2218_v17 = vld [vmem:[#allocation2 + $0x190] sm:$0xff]  ;;  %v2221_v41 = vld [vmem:[#allocation2 + $0x1a4] sm:$0xff] }
 0x144   : > { %v5164_v47 = vld [vmem:[#allocation2 + $0x194] ss:$20 sps:$4 sm:$0xff]   ;;  %1949 = vst.msk [vmem:[#allocation2 + $0x138] sm:$0xf] %vm587_vm1, %v1869_v37  ;;  %1948 = vst.msk [vmem:[#allocation2 + $0x124] sm:$0xf] %vm587_vm1, %v1867_v16  ;;  %v4365_v48 = vcombine.low %v2218_v17, %v2221_v41 }
 0x145   : > { %3110 = vmatprep.mubr.bf16.mxu0 %v5164_v47 }
 0x146   : > { %3111 = vmatmul.mubr.bf16.gmra.mxu0 %v4365_v48  ;;  %v5186_v48 = vld [vmem:[#allocation2 + $0x128] ss:$20 sps:$4 sm:$0xff]  }
 0x147   : > { %v538_v43 = vpop.permute.xlu1 %537  ;;  %v536_v20 = vpop.permute.xlu0 %535 }
 0x148   : > { %611 = vst.msk [vmem:[#allocation2 + $0x1cc] sm:$0xf] %vm587_vm1, %v538_v43  ;;  %610 = vst.msk [vmem:[#allocation2 + $0x1b8] sm:$0xf] %vm587_vm1, %v536_v20  ;;  %v5189_v43 = vld [vmem:[#allocation2 + $0x150] ss:$20 sps:$4 sm:$0xff]  }
 0x14b   : > { %v988_v31 = vpop.permute.xlu1 %987  ;;  %v986_v19 = vpop.permute.xlu0 %985  ;;  %v2201_v3 = vld [vmem:[#allocation2 + $0x120] sm:$0xff]  ;;  %v2204_v4 = vld [vmem:[#allocation2 + $0x134] sm:$0xff] }
 0x14c   : > { %v5167_v21 = vld [vmem:[#allocation2 + $0x124] ss:$20 sps:$4 sm:$0xff]   ;;  %1060 = vst.msk [vmem:[#allocation2 + $0x1d0] sm:$0xf] %vm587_vm1, %v988_v31  ;;  %1059 = vst.msk [vmem:[#allocation2 + $0x1bc] sm:$0xf] %vm587_vm1, %v986_v19  ;;  %v4352_v24 = vcombine.low %v2201_v3, %v2204_v4 }
 0x14d   : > { %3247 = vmatprep.mubr.bf16.mxu1 %v5167_v21 }
 0x14e   : > { %3248 = vmatmul.mubr.bf16.gmra.mxu1 %v4352_v24 }
 0x14f   : > { %v1424_v25 = vpop.permute.xlu1 %1423  ;;  %v1422_v26 = vpop.permute.xlu0 %1421 }
 0x150   : > { %1502 = vst.msk [vmem:[#allocation2 + $0x15c] sm:$0xf] %vm587_vm1, %v1424_v25  ;;  %1501 = vst.msk [vmem:[#allocation2 + $0x148] sm:$0xf] %vm587_vm1, %v1422_v26 }
 0x153   : > { %v1873_v40 = vpop.permute.xlu1 %1872  ;;  %v1871_v10 = vpop.permute.xlu0 %1870  ;;  %v2224_v27 = vld [vmem:[#allocation2 + $0x1b8] sm:$0xff]  ;;  %v2227_v2 = vld [vmem:[#allocation2 + $0x1cc] sm:$0xff] }
 0x154   : > { %v5169_v59 = vld [vmem:[#allocation2 + $0x1bc] ss:$20 sps:$4 sm:$0xff]   ;;  %1951 = vst.msk [vmem:[#allocation2 + $0x160] sm:$0xf] %vm587_vm1, %v1873_v40  ;;  %1950 = vst.msk [vmem:[#allocation2 + $0x14c] sm:$0xf] %vm587_vm1, %v1871_v10  ;;  %v4370_v28 = vcombine.low %v2224_v27, %v2227_v2 }
 0x155   : > { %3118 = vmatprep.mubr.bf16.mxu0 %v5169_v59  ;;  %v5190_v59 = vld [vmem:[#allocation2 + $0x178] ss:$20 sps:$4 sm:$0xff]  }
 0x156   : > { %3119 = vmatmul.mubr.bf16.gmra.mxu0 %v4370_v28  ;;  %v5193_v28 = vld [vmem:[#allocation2 + $0x1a0] ss:$20 sps:$4 sm:$0xff]  }
 0x157   : > { %v1428_v29 = vpop.permute.xlu1 %1427  ;;  %v1426_v61 = vpop.permute.xlu0 %1425  ;;  %4993 = vmatprep.mubr.msk.bf16.mxu0 %vm2949_vm2, %v5173_v39 }
 0x158   : > { %1504 = vst.msk [vmem:[#allocation2 + $0x184] sm:$0xf] %vm587_vm1, %v1428_v29  ;;  %1503 = vst.msk [vmem:[#allocation2 + $0x170] sm:$0xf] %vm587_vm1, %v1426_v61 }
 0x15b   : > { %v1877_v51 = vpop.permute.xlu1 %1876  ;;  %v1875_v58 = vpop.permute.xlu0 %1874  ;;  %v2207_v34 = vld [vmem:[#allocation2 + $0x148] sm:$0xff]  ;;  %v2210_v45 = vld [vmem:[#allocation2 + $0x15c] sm:$0xff] }
 0x15c   : > { %v5171_v35 = vld [vmem:[#allocation2 + $0x14c] ss:$20 sps:$4 sm:$0xff]   ;;  %1953 = vst.msk [vmem:[#allocation2 + $0x188] sm:$0xf] %vm587_vm1, %v1877_v51  ;;  %1952 = vst.msk [vmem:[#allocation2 + $0x174] sm:$0xf] %vm587_vm1, %v1875_v58  ;;  %v4357_v38 = vcombine.low %v2207_v34, %v2210_v45 }
 0x15d   : > { %3255 = vmatprep.mubr.bf16.mxu1 %v5171_v35 }
 0x15e   : > { %3256 = vmatmul.mubr.bf16.gmra.mxu1 %v4357_v38  ;;  %4994 = vmatmul.mubr.msk.bf16.vlgmr.msra.gmra.mxu0 %vm2949_vm2, %v5174_v52  ;;  %v4829_v44 = vpop.f32.mrf.mxu1 }
 0x15f   : > { %v1432_v49 = vpop.permute.xlu1 %1431  ;;  %v1430_v42 = vpop.permute.xlu0 %1429  ;;  %4997 = vmatprep.mubr.msk.bf16.mxu0 %vm2949_vm2, %v5177_v53 }
 0x160   : > { %1506 = vst.msk [vmem:[#allocation2 + $0x1ac] sm:$0xf] %vm587_vm1, %v1432_v49  ;;  %1505 = vst.msk [vmem:[#allocation2 + $0x198] sm:$0xf] %vm587_vm1, %v1430_v42  ;;  %v4830_v60 = vpop.f32.mrf.mxu1 }
 0x161   : > { %v6301_v62 = vadd.f32 %v4830_v60, %v4829_v44 }
 0x162   : > { %v4832_v54 = vpop.f32.mrf.mxu1 }
 0x163   : > { %6961 = vst [vmem:[#allocation7_spill] sm:$0xff] %v6301_v62  ;;  %v1881_v32 = vpop.permute.xlu1 %1880  ;;  %v1879_v22 = vpop.permute.xlu0 %1878  ;;  %v2213_v33 = vld [vmem:[#allocation2 + $0x170] sm:$0xff]  ;;  %v2216_v23 = vld [vmem:[#allocation2 + $0x184] sm:$0xff] }
 0x164   : > { %v5175_v63 = vld [vmem:[#allocation2 + $0x174] ss:$20 sps:$4 sm:$0xff]   ;;  %1955 = vst.msk [vmem:[#allocation2 + $0x1b0] sm:$0xf] %vm587_vm1, %v1881_v32  ;;  %1954 = vst.msk [vmem:[#allocation2 + $0x19c] sm:$0xf] %vm587_vm1, %v1879_v22  ;;  %v4362_v55 = vcombine.low %v2213_v33, %v2216_v23  ;;  %v4833_v11 = vpop.f32.mrf.mxu1 }
 0x165   : > { %3263 = vmatprep.mubr.bf16.mxu1 %v5175_v63  ;;  %v6306_v0 = vadd.f32 %v4833_v11, %v4832_v54 }
 0x166   : > { %3264 = vmatmul.mubr.bf16.gmra.mxu1 %v4362_v55  ;;  %4998 = vmatmul.mubr.msk.bf16.gmra.mxu0 %vm2949_vm2, %v5178_v46  ;;  %v4757_v6 = vpop.f32.mrf.mxu0  ;;  %v5194_v46 = vld [vmem:[#allocation2 + $0x1c8] ss:$20 sps:$4 sm:$0xff]  }
 0x167   : > { %6962 = vst [vmem:[#allocation8_spill] sm:$0xff] %v6306_v0  ;;  %v1436_v1 = vpop.permute.xlu1 %1435  ;;  %v1434_v5 = vpop.permute.xlu0 %1433  ;;  %5001 = vmatprep.mubr.msk.bf16.mxu0 %vm2949_vm2, %v5181_v50  ;;  %v5197_v50 = vld [vmem:[#allocation2 + $0x1f0] ss:$20 sps:$4 sm:$0xff]  }
 0x168   : > { %1508 = vst.msk [vmem:[#allocation2 + $0x1d4] sm:$0xf] %vm587_vm1, %v1436_v1  ;;  %1507 = vst.msk [vmem:[#allocation2 + $0x1c0] sm:$0xf] %vm587_vm1, %v1434_v5  ;;  %v4758_v7 = vpop.f32.mrf.mxu0 }
 0x169   : > { %v6311_v12 = vadd.f32 %v4758_v7, %v4757_v6 }
 0x16a   : > { %v4760_v14 = vpop.f32.mrf.mxu0 }
 0x16b   : > { %v1885_v56 = vpop.permute.xlu1 %1884  ;;  %v1883_v57 = vpop.permute.xlu0 %1882  ;;  %v2219_v18 = vld [vmem:[#allocation2 + $0x198] sm:$0xff]  ;;  %v2222_v30 = vld [vmem:[#allocation2 + $0x1ac] sm:$0xff] }
 0x16c   : > { %v5179_v13 = vld [vmem:[#allocation2 + $0x19c] ss:$20 sps:$4 sm:$0xff]   ;;  %1957 = vst.msk [vmem:[#allocation2 + $0x1d8] sm:$0xf] %vm587_vm1, %v1885_v56  ;;  %1956 = vst.msk [vmem:[#allocation2 + $0x1c4] sm:$0xf] %vm587_vm1, %v1883_v57  ;;  %v4367_v15 = vcombine.low %v2219_v18, %v2222_v30  ;;  %v4761_v36 = vpop.f32.mrf.mxu0 }
 0x16d   : > { %3271 = vmatprep.mubr.bf16.mxu1 %v5179_v13  ;;  %v6316_v37 = vadd.f32 %v4761_v36, %v4760_v14  ;;  %v5198_v56 = vld [vmem:[#allocation2 + $0x218] ss:$20 sps:$4 sm:$0xff]   ;;  %v5201_v57 = vld [vmem:[#allocation2 + $0x240] ss:$20 sps:$4 sm:$0xff]  }
 0x16e   : > { %3272 = vmatmul.mubr.bf16.gmra.mxu1 %v4367_v15  ;;  %5002 = vmatmul.mubr.msk.bf16.gmra.mxu0 %vm2949_vm2, %v5182_v8 }
 0x16f   : > { %v1440_v16 = vpop.permute.xlu1 %1439  ;;  %v1438_v17 = vpop.permute.xlu0 %1437  ;;  %5005 = vmatprep.mubr.msk.bf16.mxu0 %vm2949_vm2, %v5185_v9 }
 0x170   : > { %1510 = vst.msk [vmem:[#allocation2 + $0x1fc] sm:$0xf] %vm587_vm1, %v1440_v16  ;;  %1509 = vst.msk [vmem:[#allocation2 + $0x1e8] sm:$0xf] %vm587_vm1, %v1438_v17  ;;  %v4835_v41 = vpop.f32.mrf.mxu1 }
 0x172   : > { %v4836_v47 = vpop.f32.mrf.mxu1 }
 0x173   : > { %v6321_v20 = vadd.f32 %v4836_v47, %v4835_v41  ;;  %v1889_v31 = vpop.permute.xlu1 %1888  ;;  %v1887_v19 = vpop.permute.xlu0 %1886  ;;  %v2225_v3 = vld [vmem:[#allocation2 + $0x1c0] sm:$0xff]  ;;  %v2228_v4 = vld [vmem:[#allocation2 + $0x1d4] sm:$0xff] }
 0x174   : > { %v5183_v21 = vld [vmem:[#allocation2 + $0x1c4] ss:$20 sps:$4 sm:$0xff]   ;;  %1959 = vst.msk [vmem:[#allocation2 + $0x200] sm:$0xf] %vm587_vm1, %v1889_v31  ;;  %1958 = vst.msk [vmem:[#allocation2 + $0x1ec] sm:$0xf] %vm587_vm1, %v1887_v19  ;;  %v4838_v24 = vpop.f32.mrf.mxu1  ;;  %v4372_v25 = vcombine.low %v2225_v3, %v2228_v4 }
 0x175   : > { %6963 = vst [vmem:[#allocation9_spill] sm:$0xff] %v6321_v20  ;;  %3279 = vmatprep.mubr.bf16.mxu1 %v5183_v21  ;;  %v5202_v19 = vld [vmem:[#allocation2 + $0x268] ss:$20 sps:$4 sm:$0xff]  }
 0x176   : > { %v4839_v26 = vpop.f32.mrf.mxu1  ;;  %3280 = vmatmul.mubr.bf16.gmra.mxu1 %v4372_v25  ;;  %5006 = vmatmul.mubr.msk.bf16.gmra.mxu0 %vm2949_vm2, %v5186_v48 }
 0x177   : > { %v6326_v39 = vadd.f32 %v4839_v26, %v4838_v24  ;;  %v1444_v40 = vpop.permute.xlu1 %1443  ;;  %v1442_v10 = vpop.permute.xlu0 %1441  ;;  %5009 = vmatprep.mubr.msk.bf16.mxu0 %vm2949_vm2, %v5189_v43 }
 0x178   : > { %1512 = vst.msk [vmem:[#allocation2 + $0x224] sm:$0xf] %vm587_vm1, %v1444_v40  ;;  %1511 = vst.msk [vmem:[#allocation2 + $0x210] sm:$0xf] %vm587_vm1, %v1442_v10  ;;  %v4763_v27 = vpop.f32.mrf.mxu0 }
 0x179   : > { %6964 = vst [vmem:[#allocation10_spill] sm:$0xff] %v6326_v39 }
 0x17a   : > { %v4764_v2 = vpop.f32.mrf.mxu0 }
 0x17b   : > { %v6331_v29 = vadd.f32 %v4764_v2, %v4763_v27  ;;  %v1893_v61 = vpop.permute.xlu1 %1892  ;;  %v1891_v52 = vpop.permute.xlu0 %1890  ;;  %v2231_v53 = vld [vmem:[#allocation2 + $0x1e8] sm:$0xff]  ;;  %v2234_v51 = vld [vmem:[#allocation2 + $0x1fc] sm:$0xff] }
 0x17c   : > { %v5187_v58 = vld [vmem:[#allocation2 + $0x1ec] ss:$20 sps:$4 sm:$0xff]   ;;  %1961 = vst.msk [vmem:[#allocation2 + $0x228] sm:$0xf] %vm587_vm1, %v1893_v61  ;;  %1960 = vst.msk [vmem:[#allocation2 + $0x214] sm:$0xf] %vm587_vm1, %v1891_v52  ;;  %v4766_v34 = vpop.f32.mrf.mxu0  ;;  %v4377_v45 = vcombine.low %v2231_v53, %v2234_v51 }
 0x17d   : > { %3287 = vmatprep.mubr.bf16.mxu1 %v5187_v58  ;;  %v6371_v53 = vld [vmem:[%s6944_s2] ss:$0 sm:$0xff] }
 0x17e   : > { %v4767_v35 = vpop.f32.mrf.mxu0  ;;  %3288 = vmatmul.mubr.bf16.gmra.mxu1 %v4377_v45  ;;  %5010 = vmatmul.mubr.msk.bf16.gmra.mxu0 %vm2949_vm2, %v5190_v59  ;;  %v3033_v58 = vadd.f32 %v6311_v12, %v6371_v53  ;;  %v3041_v62 = vadd.f32 %v6331_v29, %v6371_v53 }
 0x17f   : > { %v6336_v38 = vadd.f32 %v4767_v35, %v4766_v34  ;;  %v1448_v49 = vpop.permute.xlu1 %1447  ;;  %v1446_v42 = vpop.permute.xlu0 %1445  ;;  %5013 = vmatprep.mubr.msk.bf16.mxu0 %vm2949_vm2, %v5193_v28 }
 0x180   : > { %1514 = vst.msk [vmem:[#allocation2 + $0x24c] sm:$0xf] %vm587_vm1, %v1448_v49  ;;  %1513 = vst.msk [vmem:[#allocation2 + $0x238] sm:$0xf] %vm587_vm1, %v1446_v42  ;;  %v4841_v44 = vpop.f32.mrf.mxu1  ;;  %v3036_v42 = vadd.f32 %v6316_v37, %v6371_v53 }
 0x182   : > { %v4842_v60 = vpop.f32.mrf.mxu1 }
 0x183   : > { %v6341_v32 = vadd.f32 %v4842_v60, %v4841_v44  ;;  %v1897_v22 = vpop.permute.xlu1 %1896  ;;  %v1895_v33 = vpop.permute.xlu0 %1894  ;;  %v2237_v23 = vld [vmem:[#allocation2 + $0x210] sm:$0xff]  ;;  %v2240_v63 = vld [vmem:[#allocation2 + $0x224] sm:$0xff] }
 0x184   : > { %v5191_v54 = vld [vmem:[#allocation2 + $0x214] ss:$20 sps:$4 sm:$0xff]   ;;  %1963 = vst.msk [vmem:[#allocation2 + $0x250] sm:$0xf] %vm587_vm1, %v1897_v22  ;;  %1962 = vst.msk [vmem:[#allocation2 + $0x23c] sm:$0xf] %vm587_vm1, %v1895_v33  ;;  %v4844_v55 = vpop.f32.mrf.mxu1  ;;  %v4382_v11 = vcombine.low %v2237_v23, %v2240_v63 }
 0x185   : > { %6965 = vst [vmem:[#allocation11_spill] sm:$0xff] %v6341_v32  ;;  %3295 = vmatprep.mubr.bf16.mxu1 %v5191_v54 }
 0x186   : > { %v4845_v1 = vpop.f32.mrf.mxu1  ;;  %3296 = vmatmul.mubr.bf16.gmra.mxu1 %v4382_v11  ;;  %5014 = vmatmul.mubr.msk.bf16.gmra.mxu0 %vm2949_vm2, %v5194_v46 }
 0x187   : > { %v6346_v5 = vadd.f32 %v4845_v1, %v4844_v55  ;;  %v1452_v6 = vpop.permute.xlu1 %1451  ;;  %v1450_v7 = vpop.permute.xlu0 %1449  ;;  %5017 = vmatprep.mubr.msk.bf16.mxu0 %vm2949_vm2, %v5197_v50 }
 0x188   : > { %1516 = vst.msk [vmem:[#allocation2 + $0x274] sm:$0xf] %vm587_vm1, %v1452_v6  ;;  %1515 = vst.msk [vmem:[#allocation2 + $0x260] sm:$0xf] %vm587_vm1, %v1450_v7  ;;  %v4769_v8 = vpop.f32.mrf.mxu0 }
 0x189   : > { %6966 = vst [vmem:[#allocation12_spill] sm:$0xff] %v6346_v5 }
 0x18a   : > { %v4770_v9 = vpop.f32.mrf.mxu0 }
 0x18b   : > { %v6351_v18 = vadd.f32 %v4770_v9, %v4769_v8  ;;  %v1901_v30 = vpop.permute.xlu1 %1900  ;;  %v1899_v13 = vpop.permute.xlu0 %1898  ;;  %v2243_v14 = vld [vmem:[#allocation2 + $0x238] sm:$0xff]  ;;  %v2246_v15 = vld [vmem:[#allocation2 + $0x24c] sm:$0xff] }
 0x18c   : > { %v5195_v36 = vld [vmem:[#allocation2 + $0x23c] ss:$20 sps:$4 sm:$0xff]   ;;  %1965 = vst.msk [vmem:[#allocation2 + $0x278] sm:$0xf] %vm587_vm1, %v1901_v30  ;;  %1964 = vst.msk [vmem:[#allocation2 + $0x264] sm:$0xf] %vm587_vm1, %v1899_v13  ;;  %v4772_v16 = vpop.f32.mrf.mxu0  ;;  %v4387_v17 = vcombine.low %v2243_v14, %v2246_v15 }
 0x18d   : > { %3303 = vmatprep.mubr.bf16.mxu1 %v5195_v36 }
 0x18e   : > { %v4773_v41 = vpop.f32.mrf.mxu0  ;;  %3304 = vmatmul.mubr.bf16.gmra.mxu1 %v4387_v17  ;;  %5018 = vmatmul.mubr.msk.bf16.gmra.mxu0 %vm2949_vm2, %v5198_v56 }
 0x18f   : > { %v6356_v47 = vadd.f32 %v4773_v41, %v4772_v16  ;;  %v4847_v48 = vpop.f32.mrf.mxu1  ;;  %5021 = vmatprep.mubr.msk.bf16.mxu0 %vm2949_vm2, %v5201_v57 }
 0x191   : > { %v4848_v43 = vpop.f32.mrf.mxu1 }
 0x192   : > { %v6359_v31 = vadd.f32 %v4848_v43, %v4847_v48 }
 0x193   : > { %v4850_v3 = vpop.f32.mrf.mxu1  ;;  %v2249_v4 = vld [vmem:[#allocation2 + $0x260] sm:$0xff]  ;;  %v2252_v21 = vld [vmem:[#allocation2 + $0x274] sm:$0xff] }
 0x194   : > { %6967 = vst [vmem:[#allocation13_spill] sm:$0xff] %v6359_v31  ;;  %v5199_v24 = vld [vmem:[#allocation2 + $0x264] ss:$20 sps:$4 sm:$0xff]   ;;  %v4392_v25 = vcombine.low %v2249_v4, %v2252_v21 }
 0x195   : > { %v4851_v26 = vpop.f32.mrf.mxu1  ;;  %3311 = vmatprep.mubr.bf16.mxu1 %v5199_v24 }
 0x196   : > { %v6361_v40 = vadd.f32 %v4851_v26, %v4850_v3  ;;  %3312 = vmatmul.mubr.bf16.gmra.mxu1 %v4392_v25  ;;  %5022 = vmatmul.mubr.msk.bf16.gmra.mxu0 %vm2949_vm2, %v5202_v19 }
 0x197   : > { %v4775_v10 = vpop.f32.mrf.mxu0 }
 0x198   : > { %6968 = vst [vmem:[#allocation14_spill] sm:$0xff] %v6361_v40 }
 0x199   : > { %v4776_v27 = vpop.f32.mrf.mxu0 }
 0x19a   : > { %v6364_v2 = vadd.f32 %v4776_v27, %v4775_v10 }
 0x19b   : > { %v4778_v59 = vpop.f32.mrf.mxu0 }
 0x19d   : > { %v4779_v28 = vpop.f32.mrf.mxu0 }
 0x19e   : > { %v6366_v61 = vadd.f32 %v4779_v28, %v4778_v59  ;;  %v4869_v52 = vpop.f32.mrf.mxu1 }
 0x1a0   : > { %v4870_v51 = vpop.f32.mrf.mxu1 }
 0x1a1   : > { %v4871_v34 = vadd.f32 %v4870_v51, %v4869_v52 }
 0x1a2   : > { %v4872_v45 = vpop.f32.mrf.mxu1 }
 0x1a3   : > { %v6375_v35 = vadd.f32 %v4871_v34, %v3033_v58 }
 0x1a4   : > { %v4873_v49 = vpop.f32.mrf.mxu1 }
 0x1a5   : > { %v4874_v44 = vadd.f32 %v4873_v49, %v4872_v45 }
 0x1a7   : > { %v4781_v60 = vpop.f32.mrf.mxu0  ;;  %v6379_v46 = vadd.f32 %v4874_v44, %v3036_v42 }
 0x1a9   : > { %v4782_v50 = vpop.f32.mrf.mxu0 }
 0x1aa   : > { %v6381_v22 = vadd.f32 %v4782_v50, %v4781_v60 }
 0x1ab   : > { %v4784_v33 = vpop.f32.mrf.mxu0 }
 0x1ad   : > { %v4785_v23 = vpop.f32.mrf.mxu0 }
 0x1ae   : > { %v6383_v63 = vadd.f32 %v4785_v23, %v4784_v33 }
 0x1af   : > { %v4875_v1 = vpop.f32.mrf.mxu1 }
 0x1b1   : > { %v4876_v37 = vpop.f32.mrf.mxu1 }
 0x1b2   : > { %v4877_v0 = vadd.f32 %v4876_v37, %v4875_v1 }
 0x1b3   : > { %v4878_v8 = vpop.f32.mrf.mxu1 }
 0x1b5   : > { %v4879_v56 = vpop.f32.mrf.mxu1 }
 0x1b7   : > { %v4787_v12 = vpop.f32.mrf.mxu0 }
 0x1b9   : > { %v4788_v54 = vpop.f32.mrf.mxu0 }
 0x1ba   : > { %v6385_v55 = vadd.f32 %v4788_v54, %v4787_v12 }
 0x1bb   : > { %v4790_v11 = vpop.f32.mrf.mxu0 }
 0x1bd   : > { %v4791_v6 = vpop.f32.mrf.mxu0 }
 0x1be   : > { %v6387_v7 = vadd.f32 %v4791_v6, %v4790_v11 }
 0x1bf   : > { %v6389_v30 = vpop.f32.mrf.mxu1 }
 0x1c1   : > { %v4882_v36 = vpop.f32.mrf.mxu1 }
 0x1c3   : > { %v6395_v17 = vpop.f32.mrf.mxu1 }
 0x1c5   : > { %v6397_v41 = vpop.f32.mrf.mxu1 }
 0x1c7   : > { %v4793_v9 = vpop.f32.mrf.mxu0 }
 0x1c9   : > { %v4794_v57 = vpop.f32.mrf.mxu0 }
 0x1ca   : > { %v6391_v13 = vadd.f32 %v4794_v57, %v4793_v9 }
 0x1cb   : > { %v4796_v14 = vpop.f32.mrf.mxu0 }
 0x1cd   : > { %v4797_v15 = vpop.f32.mrf.mxu0 }
 0x1ce   : > { %v6393_v16 = vadd.f32 %v4797_v15, %v4796_v14 }
 0x1cf   : > { %v4887_v48 = vpop.f32.mrf.mxu1 }
 0x1d1   : > { %v4888_v43 = vpop.f32.mrf.mxu1 }
 0x1d3   : > { %v4890_v3 = vpop.f32.mrf.mxu1 }
 0x1d5   : > { %v4891_v21 = vpop.f32.mrf.mxu1 }
 0x1d7   : > { %v6399_v19 = vpop.f32.mrf.mxu0 }
 0x1d9   : > { %v6401_v4 = vpop.f32.mrf.mxu0 }
 0x1db   : > { %v6403_v24 = vpop.f32.mrf.mxu0 }
 0x1dd   : > { %v6407_v26 = vpop.f32.mrf.mxu0 }
 0x1de   : > { %v6405_v25 = vpop.f32.mrf.mxu1 }
 0x1e0   : > { %v6409_v10 = vpop.f32.mrf.mxu1 }
 0x1e2   : > { %v6413_v59 = vpop.f32.mrf.mxu1 }
 0x1e4   : > { %v6417_v52 = vpop.f32.mrf.mxu1 }
 0x1e6   : > { %v6411_v27 = vpop.f32.mrf.mxu0 }
 0x1e8   : > { %v6415_v28 = vpop.f32.mrf.mxu0 }
 0x1ea   : > { %v6419_v51 = vpop.f32.mrf.mxu0 }
 0x1eb   : > { %6969 = vst [vmem:[#allocation15_spill] sm:$0xff] %v6419_v51 }
 0x1ec   : > { %v6423_v34 = vpop.f32.mrf.mxu0 }
 0x1ed   : > { %6970 = vst [vmem:[#allocation16_spill] sm:$0xff] %v6423_v34 }
 0x1ee   : > { %v6421_v58 = vpop.f32.mrf.mxu1 }
 0x1f0   : > { %v6425_v45 = vpop.f32.mrf.mxu1 }
 0x1f2   : > { %v6429_v42 = vpop.f32.mrf.mxu1 }
 0x1f4   : > { %v6433_v60 = vpop.f32.mrf.mxu1 }
 0x1f6   : > { %v6427_v49 = vpop.f32.mrf.mxu0 }
 0x1f8   : > { %v6431_v44 = vpop.f32.mrf.mxu0 }
 0x1fa   : > { %v6435_v50 = vpop.f32.mrf.mxu0 }
 0x1fc   : > { %v6439_v23 = vpop.f32.mrf.mxu0 }
 0x1fe   : > { %v6437_v33 = vpop.f32.mrf.mxu1 }
 0x200   : > { %v6441_v12 = vpop.f32.mrf.mxu1 }
 0x202   : > { %v6445_v11 = vpop.f32.mrf.mxu1 }
 0x204   : > { %v6449_v9 = vpop.f32.mrf.mxu1 }
 0x206   : > { %v6443_v54 = vpop.f32.mrf.mxu0 }
 0x207   : > { %6971 = vst [vmem:[#allocation17_spill] sm:$0xff] %v6443_v54 }
 0x208   : > { %v6447_v6 = vpop.f32.mrf.mxu0 }
 0x209   : > { %6972 = vst [vmem:[#allocation18_spill] sm:$0xff] %v6447_v6  ;;  %v4880_v6 = vadd.f32 %v4879_v56, %v4878_v8 }
 0x20a   : > { %v6451_v57 = vpop.f32.mrf.mxu0 }
 0x20b   : > { %6973 = vst [vmem:[#allocation19_spill] sm:$0xff] %v6451_v57 }
 0x20c   : > { %v6455_v15 = vpop.f32.mrf.mxu0 }
 0x20d   : > { %6974 = vst [vmem:[#allocation20_spill] sm:$0xff] %v6455_v15  ;;  %v3202_v15 = vadd.f32 %v4877_v0, %v3041_v62  ;;  %v3057_v0 = vadd.f32 %v6364_v2, %v6371_v53 }
 0x20e   : > { %v6453_v14 = vpop.f32.mrf.mxu1 }
 0x210   : > { %v6457_v40 = vpop.f32.mrf.mxu1 }
 0x212   : > { %v6461_v5 = vpop.f32.mrf.mxu1 }
 0x214   : > { %v6469_v20 = vpop.f32.mrf.mxu1 }
 0x216   : > { %v6459_v31 = vpop.f32.mrf.mxu0 }
 0x217   : > { %6975 = vst [vmem:[#allocation21_spill] sm:$0xff] %v6459_v31  ;;  %v3044_v31 = vadd.f32 %v6336_v38, %v6371_v53  ;;  %v4883_v38 = vadd.f32 %v4882_v36, %v6389_v30  ;;  %v3060_v36 = vadd.f32 %v6366_v61, %v6371_v53  ;;  %v3052_v61 = vadd.f32 %v6356_v47, %v6371_v53 }
 0x218   : > { %v6463_v32 = vpop.f32.mrf.mxu0  ;;  %v4895_v47 = vadd.f32 %v6409_v10, %v6405_v25 }
 0x219   : > { %6976 = vst [vmem:[#allocation22_spill] sm:$0xff] %v6463_v32 }
 0x21a   : > { %v6465_v39 = vpop.f32.mrf.mxu0 }
 0x21b   : > { %6977 = vst [vmem:[#allocation23_spill] sm:$0xff] %v6465_v39  ;;  %v4889_v39 = vadd.f32 %v4888_v43, %v4887_v48  ;;  %v3049_v48 = vadd.f32 %v6351_v18, %v6371_v53  ;;  %v4886_v18 = vadd.f32 %v6397_v41, %v6395_v17  ;;  %v4901_v17 = vadd.f32 %v6425_v45, %v6421_v58 }
 0x21c   : > { %v6471_v57 = vpop.f32.mrf.mxu0  ;;  %v4904_v45 = vadd.f32 %v6433_v60, %v6429_v42  ;;  %v4898_v42 = vadd.f32 %v6417_v52, %v6413_v59  ;;  %v4913_v59 = vadd.f32 %v6457_v40, %v6453_v14 }
 0x21d   : > { %6978 = vst [vmem:[#allocation24_spill] sm:$0xff] %v6471_v57  ;;  %v3205_v57 = vadd.f32 %v4880_v6, %v3044_v31  ;;  %v3218_v30 = vadd.f32 %v4889_v39, %v3057_v0  ;;  %v3210_v39 = vadd.f32 %v4883_v38, %v3049_v48  ;;  %v3213_v58 = vadd.f32 %v4886_v18, %v3052_v61 }
 0x21e   : > { %v6473_v54 = vpop.f32.mrf.mxu1  ;;  %v4995_v34 = vpop.f32.mrf.mxu0  ;;  %v4801_v18 = vadd.f32 %v6401_v4, %v6399_v19  ;;  %v3068_v19 = vadd.f32 %v6383_v63, %v6371_v53 }
 0x21f   : > { %v6477_v51 = vadd.f32 %v4995_v34, %v3202_v15 }
 0x220   : > { %v6479_v1 = vpop.f32.mrf.mxu1  ;;  %v3354_v37 = vpop.f32.mrf.mxu0  ;;  %v3229_v40 = vadd.f32 %v4898_v42, %v3068_v19  ;;  %v4813_v42 = vadd.f32 %v6431_v44, %v6427_v49  ;;  %v4807_v49 = vadd.f32 %v6415_v28, %v6411_v27 }
 0x221   : > { %v3483_v29 = vmax.f32 %v6477_v51, 0.0  ;;  %v6483_v32 = vadd.f32 %v3354_v37, %v6375_v35  ;;  %v4892_v35 = vadd.f32 %v4891_v21, %v4890_v3  ;;  %v4919_v27 = vadd.f32 %v6479_v1, %v6473_v54 }
 0x222   : > { %v6485_v8 = vpop.f32.mrf.mxu1  ;;  %v4996_v62 = vpop.f32.mrf.mxu0 }
 0x223   : > { %v6490_v56 = vadd.f32 %v4996_v62, %v3205_v57  ;;  %3549 = vrot.lane.b32.xlu0 %v3483_v29, %s5265_s20  ;;  %v3481_v34 = vmax.f32 %v6483_v32, 0.0  ;;  %v3221_v37 = vadd.f32 %v4892_v35, %v3060_v36 }
 0x224   : > { %v6497_v43 = vpop.f32.mrf.mxu1  ;;  %v3357_v31 = vpop.f32.mrf.mxu0 }
 0x225   : > { %v3484_v6 = vmax.f32 %v6490_v56, 0.0  ;;  %v6502_v2 = vadd.f32 %v3357_v31, %v6379_v46  ;;  %v3073_v31 = vadd.f32 %v6385_v55, %v6371_v53  ;;  %v3065_v55 = vadd.f32 %v6381_v22, %v6371_v53 }
 0x226   : > { %v6506_v57 = vpop.f32.mrf.mxu1  ;;  %v4999_v15 = vpop.f32.mrf.mxu0 }
 0x227   : > { %v6510_v3 = vadd.f32 %v4999_v15, %v3218_v30  ;;  %3551 = vrot.lane.b32.xlu1 %v3484_v6, %s5265_s20  ;;  %3545 = vrot.lane.b32.xlu0 %v3481_v34, %s5265_s20  ;;  %v3482_v41 = vmax.f32 %v6502_v2, 0.0 }
 0x228   : > { %v6520_v46 = vpop.f32.mrf.mxu1  ;;  %v3370_v21 = vpop.f32.mrf.mxu0 }
 0x229   : > { %v3487_v62 = vmax.f32 %v6510_v3, 0.0  ;;  %v6526_v0 = vadd.f32 %v3370_v21, %v3210_v39  ;;  %v3234_v39 = vadd.f32 %v4901_v17, %v3073_v31  ;;  %v3076_v21 = vadd.f32 %v6387_v7, %v6371_v53 }
 0x22a   : > { %v6530_v38 = vpop.f32.mrf.mxu1  ;;  %v5000_v48 = vpop.f32.mrf.mxu0  ;;  %v3226_v7 = vadd.f32 %v4895_v47, %v3065_v55  ;;  %v4804_v47 = vadd.f32 %v6407_v26, %v6403_v24  ;;  %v3081_v24 = vadd.f32 %v6391_v13, %v6371_v53  ;;  %v4916_v26 = vadd.f32 %v6469_v20, %v6461_v5 }
 0x22b   : > { %v6534_v30 = vadd.f32 %v5000_v48, %v3221_v37  ;;  %3547 = vrot.lane.b32.xlu1 %v3482_v41, %s5265_s20  ;;  %3557 = vrot.lane.b32.xlu0 %v3487_v62, %s5265_s20  ;;  %v3485_v10 = vmax.f32 %v6526_v0, 0.0  ;;  %v3237_v17 = vadd.f32 %v4904_v45, %v3076_v21  ;;  %v4907_v45 = vadd.f32 %v6441_v12, %v6437_v33 }
 0x22c   : > { %v6546_v35 = vpop.f32.mrf.mxu1  ;;  %v3373_v25 = vpop.f32.mrf.mxu0  ;;  %v4910_v20 = vadd.f32 %v6449_v9, %v6445_v11  ;;  %v4925_v9 = vadd.f32 %v6520_v46, %v6506_v57  ;;  %v3097_v46 = vadd.f32 %v4807_v49, %v6371_v53 }
 0x22d   : > { %v3488_v36 = vmax.f32 %v6534_v30, 0.0  ;;  %v6550_v15 = vadd.f32 %v3373_v25, %v3213_v58  ;;  %v3089_v58 = vadd.f32 %v4801_v18, %v6371_v53  ;;  %v3242_v19 = vadd.f32 %v4907_v45, %v3081_v24  ;;  %v6979_v24 = vld [vmem:[#allocation15_spill] sm:$0xff] }
 0x22e   : > { %v6556_v22 = vpop.f32.mrf.mxu1  ;;  %v5003_v61 = vpop.f32.mrf.mxu0 }
 0x22f   : > { %v6560_v60 = vadd.f32 %v5003_v61, %v3234_v39  ;;  %3559 = vrot.lane.b32.xlu1 %v3488_v36, %s5265_s20  ;;  %3553 = vrot.lane.b32.xlu0 %v3485_v10, %s5265_s20  ;;  %v3486_v52 = vmax.f32 %v6550_v15, 0.0  ;;  %v3250_v18 = vadd.f32 %v4913_v59, %v3089_v58  ;;  %v3092_v61 = vadd.f32 %v4804_v47, %v6371_v53 }
 0x230   : > { %v6570_v4 = vpop.f32.mrf.mxu1  ;;  %v3386_v37 = vpop.f32.mrf.mxu0 }
 0x231   : > { %v3491_v31 = vmax.f32 %v6560_v60, 0.0  ;;  %v6576_v48 = vadd.f32 %v3386_v37, %v3226_v7  ;;  %v3084_v37 = vadd.f32 %v6393_v16, %v6371_v53  ;;  %v3253_v11 = vadd.f32 %v4916_v26, %v3092_v61 }
 0x232   : > { %v6581_v55 = vpop.f32.mrf.mxu1  ;;  %v5004_v63 = vpop.f32.mrf.mxu0  ;;  %v4816_v16 = vadd.f32 %v6439_v23, %v6435_v50  ;;  %v6980_v50 = vld [vmem:[#allocation16_spill] sm:$0xff]  ;;  %v4928_v26 = vadd.f32 %v6546_v35, %v6530_v38  ;;  %v3258_v35 = vadd.f32 %v4919_v27, %v3097_v46 }
 0x233   : > { %v6585_v25 = vadd.f32 %v5004_v63, %v3237_v17  ;;  %3555 = vrot.lane.b32.xlu1 %v3486_v52, %s5265_s20  ;;  %3565 = vrot.lane.b32.xlu0 %v3491_v31, %s5265_s20  ;;  %v3489_v12 = vmax.f32 %v6576_v48, 0.0  ;;  %v3105_v63 = vadd.f32 %v4813_v42, %v6371_v53  ;;  %v3245_v57 = vadd.f32 %v4910_v20, %v3084_v37  ;;  %v6981_v20 = vld [vmem:[#allocation21_spill] sm:$0xff] }
 0x234   : > { %v6597_v14 = vpop.f32.mrf.mxu1  ;;  %v3389_v33 = vpop.f32.mrf.mxu0  ;;  %v4810_v23 = vadd.f32 %v6980_v50, %v6979_v24 }
 0x235   : > { %v3492_v39 = vmax.f32 %v6585_v25, 0.0  ;;  %v6601_v21 = vadd.f32 %v3389_v33, %v3229_v40  ;;  %v3266_v42 = vadd.f32 %v4925_v9, %v3105_v63  ;;  %v6983_v63 = vld [vmem:[#allocation17_spill] sm:$0xff] }
 0x236   : > { %v4935_v7 = vpop.f32.mrf.mxu1  ;;  %v5007_v13 = vpop.f32.mrf.mxu0  ;;  %v3100_v9 = vadd.f32 %v4810_v23, %v6371_v53 }
 0x237   : > { %v6608_v5 = vadd.f32 %v5007_v13, %v3250_v18  ;;  %3567 = vrot.lane.b32.xlu1 %v3492_v39, %s5265_s20  ;;  %3561 = vrot.lane.b32.xlu0 %v3489_v12, %s5265_s20  ;;  %v3490_v59 = vmax.f32 %v6601_v21, 0.0  ;;  %v3108_v13 = vadd.f32 %v4816_v16, %v6371_v53  ;;  %v6984_v16 = vld [vmem:[#allocation18_spill] sm:$0xff] }
 0x238   : > { %v4936_v44 = vpop.f32.mrf.mxu1  ;;  %v3402_v17 = vpop.f32.mrf.mxu0 }
 0x239   : > { %v3495_v58 = vmax.f32 %v6608_v5, 0.0  ;;  %v6624_v47 = vadd.f32 %v3402_v17, %v3242_v19  ;;  %v6982_v19 = vld [vmem:[#allocation22_spill] sm:$0xff]  ;;  %v3269_v50 = vadd.f32 %v4928_v26, %v3108_v13  ;;  %v6987_v26 = vld [vmem:[#allocation19_spill] sm:$0xff]  ;;  %v6988_v13 = vld [vmem:[#allocation20_spill] sm:$0xff] }
 0x23a   : > { %v4938_v45 = vpop.f32.mrf.mxu1  ;;  %v5008_v40 = vpop.f32.mrf.mxu0  ;;  %v4825_v37 = vadd.f32 %v6982_v19, %v6981_v20  ;;  %v6985_v19 = vld [vmem:[#allocation23_spill] sm:$0xff] }
 0x23b   : > { %v6631_v28 = vadd.f32 %v5008_v40, %v3253_v11  ;;  %3563 = vrot.lane.b32.xlu1 %v3490_v59, %s5265_s20  ;;  %3573 = vrot.lane.b32.xlu0 %v3495_v58, %s5265_s20  ;;  %v3493_v33 = vmax.f32 %v6624_v47, 0.0  ;;  %v4922_v11 = vadd.f32 %v6497_v43, %v6485_v8  ;;  %v4819_v40 = vadd.f32 %v6984_v16, %v6983_v63 }
 0x23c   : > { %v4939_v54 = vpop.f32.mrf.mxu1  ;;  %v3405_v1 = vpop.f32.mrf.mxu0  ;;  %v4937_v8 = vadd.f32 %v4936_v44, %v4935_v7  ;;  %v3121_v20 = vadd.f32 %v4825_v37, %v6371_v53  ;;  %v4931_v63 = vadd.f32 %v6570_v4, %v6556_v22  ;;  %v4822_v37 = vadd.f32 %v6988_v13, %v6987_v26 }
 0x23d   : > { %v6958_v18 = vmax.f32 %v6631_v28, 0.0  ;;  %v6646_v61 = vadd.f32 %v3405_v1, %v3245_v57  ;;  %v3261_v7 = vadd.f32 %v4922_v11, %v3100_v9  ;;  %v3113_v44 = vadd.f32 %v4819_v40, %v6371_v53 }
 0x23e   : > { %v4941_v49 = vpop.f32.mrf.mxu1  ;;  %v5011_v17 = vpop.f32.mrf.mxu0  ;;  %v4934_v11 = vadd.f32 %v6597_v14, %v6581_v55 }
 0x23f   : > { %v6653_v38 = vadd.f32 %v5011_v17, %v3266_v42  ;;  %3575 = vrot.lane.b32.xlu1 %v6958_v18, %s5265_s20  ;;  %3569 = vrot.lane.b32.xlu0 %v3493_v33, %s5265_s20  ;;  %v6946_v43 = vmax.f32 %v6646_v61, 0.0  ;;  %v6986_v17 = vld [vmem:[#allocation24_spill] sm:$0xff] }
 0x240   : > { %v4942_v57 = vpop.f32.mrf.mxu1  ;;  %v3418_v24 = vpop.f32.mrf.mxu0  ;;  %v4828_v27 = vadd.f32 %v6986_v17, %v6985_v19  ;;  %v3282_v17 = vadd.f32 %v4937_v8, %v3121_v20 }
 0x241   : > { %v6947_v1 = vmax.f32 %v6653_v38, 0.0  ;;  %v6666_v42 = vadd.f32 %v3418_v24, %v3258_v35  ;;  %v4940_v35 = vadd.f32 %v4939_v54, %v4938_v45  ;;  %v3274_v45 = vadd.f32 %v4931_v63, %v3113_v44 }
 0x242   : > { %v4944_v46 = vpop.f32.mrf.mxu1  ;;  %v5012_v23 = vpop.f32.mrf.mxu0  ;;  %v3116_v54 = vadd.f32 %v4822_v37, %v6371_v53 }
 0x243   : > { %v6673_v16 = vadd.f32 %v5012_v23, %v3269_v50  ;;  %3571 = vrot.lane.b32.xlu1 %v6946_v43, %s5265_s20  ;;  %3581 = vrot.lane.b32.xlu0 %v6947_v1, %s5265_s20  ;;  %v6956_v22 = vmax.f32 %v6666_v42, 0.0  ;;  %v3124_v23 = vadd.f32 %v4828_v27, %v6371_v53 }
 0x244   : > { %v4945_v24 = vpop.f32.mrf.mxu1  ;;  %v3421_v19 = vpop.f32.mrf.mxu0  ;;  %v3277_v63 = vadd.f32 %v4934_v11, %v3116_v54 }
 0x245   : > { %v6948_v4 = vmax.f32 %v6673_v16, 0.0  ;;  %v6686_v50 = vadd.f32 %v3421_v19, %v3261_v7  ;;  %v3285_v20 = vadd.f32 %v4940_v35, %v3124_v23  ;;  %v6989_v7 = vld [vmem:[#allocation9_spill] sm:$0xff] }
 0x246   : > { %v4947_v43 = vpop.f32.mrf.mxu1  ;;  %v5015_v1 = vpop.f32.mrf.mxu0  ;;  %v3137_v26 = vadd.f32 %v6989_v7, %v6371_v53 }
 0x247   : > { %v6691_v9 = vadd.f32 %v5015_v1, %v3282_v17  ;;  %3583 = vrot.lane.b32.xlu1 %v6948_v4, %s5265_s20  ;;  %3577 = vrot.lane.b32.xlu0 %v6956_v22, %s5265_s20  ;;  %v6955_v27 = vmax.f32 %v6686_v50, 0.0  ;;  %v4943_v17 = vadd.f32 %v4942_v57, %v4941_v49 }
 0x248   : > { %v4948_v40 = vpop.f32.mrf.mxu1  ;;  %v3434_v8 = vpop.f32.mrf.mxu0 }
 0x249   : > { %v6949_v55 = vmax.f32 %v6691_v9, 0.0  ;;  %v4949_v14 = vadd.f32 %v4948_v40, %v4947_v43  ;;  %v6702_v1 = vadd.f32 %v3434_v8, %v3274_v45  ;;  %v6990_v43 = vld [vmem:[#allocation7_spill] sm:$0xff]  ;;  %v6991_v8 = vld [vmem:[#allocation10_spill] sm:$0xff] }
 0x24a   : > { %v4950_v13 = vpop.f32.mrf.mxu1  ;;  %v5016_v19 = vpop.f32.mrf.mxu0  ;;  %v3129_v44 = vadd.f32 %v6990_v43, %v6371_v53 }
 0x24b   : > { %v6706_v4 = vadd.f32 %v5016_v19, %v3285_v20  ;;  %3579 = vrot.lane.b32.xlu1 %v6955_v27, %s5265_s20  ;;  %3589 = vrot.lane.b32.xlu0 %v6949_v55, %s5265_s20  ;;  %v6953_v37 = vmax.f32 %v6702_v1, 0.0  ;;  %v3298_v40 = vadd.f32 %v4949_v14, %v3137_v26  ;;  %v3140_v20 = vadd.f32 %v6991_v8, %v6371_v53 }
 0x24c   : > { %v4951_v35 = vpop.f32.mrf.mxu1  ;;  %v3437_v23 = vpop.f32.mrf.mxu0  ;;  %v4946_v55 = vadd.f32 %v4945_v24, %v4944_v46  ;;  %v3290_v54 = vadd.f32 %v4943_v17, %v3129_v44 }
 0x24d   : > { %v6952_v49 = vmax.f32 %v6706_v4, 0.0  ;;  %v4952_v57 = vadd.f32 %v4951_v35, %v4950_v13  ;;  %v6718_v45 = vadd.f32 %v3437_v23, %v3277_v63  ;;  %v6992_v13 = vld [vmem:[#allocation8_spill] sm:$0xff] }
 0x24e   : > { %v4953_v7 = vpop.f32.mrf.mxu1  ;;  %v5019_v19 = vpop.f32.mrf.mxu0  ;;  %v3132_v14 = vadd.f32 %v6992_v13, %v6371_v53 }
 0x24f   : > { %v6722_v11 = vadd.f32 %v5019_v19, %v3298_v40  ;;  %3591 = vrot.lane.b32.xlu1 %v6952_v49, %s5265_s20  ;;  %3585 = vrot.lane.b32.xlu0 %v6953_v37, %s5265_s20  ;;  %v6951_v43 = vmax.f32 %v6718_v45, 0.0  ;;  %v3301_v35 = vadd.f32 %v4952_v57, %v3140_v20 }
 0x250   : > { %v4954_v26 = vpop.f32.mrf.mxu1  ;;  %v3450_v63 = vpop.f32.mrf.mxu0  ;;  %v3293_v17 = vadd.f32 %v4946_v55, %v3132_v14  ;;  %v6994_v14 = vld [vmem:[#allocation12_spill] sm:$0xff] }
 0x251   : > { %v6950_v46 = vmax.f32 %v6722_v11, 0.0  ;;  %v6734_v24 = vadd.f32 %v3450_v63, %v3290_v54  ;;  %v4955_v8 = vadd.f32 %v4954_v26, %v4953_v7  ;;  %v6993_v54 = vld [vmem:[#allocation11_spill] sm:$0xff] }
 0x252   : > { %v4956_v23 = vpop.f32.mrf.mxu1  ;;  %v5020_v40 = vpop.f32.mrf.mxu0  ;;  %v3145_v63 = vadd.f32 %v6993_v54, %v6371_v53  ;;  %v3148_v54 = vadd.f32 %v6994_v14, %v6371_v53 }
 0x253   : > { %v6736_v19 = vadd.f32 %v5020_v40, %v3301_v35  ;;  %3587 = vrot.lane.b32.xlu1 %v6951_v43, %s5265_s20  ;;  %3597 = vrot.lane.b32.xlu0 %v6950_v46, %s5265_s20  ;;  %v6957_v57 = vmax.f32 %v6734_v24, 0.0 }
 0x254   : > { %v4957_v44 = vpop.f32.mrf.mxu1  ;;  %v3453_v13 = vpop.f32.mrf.mxu0  ;;  %v3306_v55 = vadd.f32 %v4955_v8, %v3145_v63 }
 0x255   : > { %v6954_v20 = vmax.f32 %v6736_v19, 0.0  ;;  %v6748_v7 = vadd.f32 %v3453_v13, %v3293_v17  ;;  %v4958_v40 = vadd.f32 %v4957_v44, %v4956_v23  ;;  %v6995_v17 = vld [vmem:[#allocation13_spill] sm:$0xff] }
 0x256   : > { %v4959_v26 = vpop.f32.mrf.mxu1  ;;  %v5023_v35 = vpop.f32.mrf.mxu0  ;;  %v3153_v13 = vadd.f32 %v6995_v17, %v6371_v53 }
 0x257   : > { %3599 = vrot.lane.b32.xlu1 %v6954_v20, %s5265_s20  ;;  %3593 = vrot.lane.b32.xlu0 %v6957_v57, %s5265_s20  ;;  %v3506_v49 = vmax.f32 %v6748_v7, 0.0  ;;  %v3309_v8 = vadd.f32 %v4958_v40, %v3148_v54  ;;  %v6996_v57 = vld [vmem:[#allocation14_spill] sm:$0xff] }
 0x258   : > { %v4960_v46 = vpop.f32.mrf.mxu1  ;;  %v3466_v43 = vpop.f32.mrf.mxu0  ;;  %v3156_v17 = vadd.f32 %v6996_v57, %v6371_v53 }
 0x259   : > { %v4961_v23 = vadd.f32 %v4960_v46, %v4959_v26  ;;  %v6761_v44 = vadd.f32 %v3466_v43, %v3306_v55 }
 0x25a   : > { %v4962_v37 = vpop.f32.mrf.mxu1  ;;  %v5024_v20 = vpop.f32.mrf.mxu0 }
 0x25b   : > { %v3314_v27 = vadd.f32 %v4961_v23, %v3153_v13  ;;  %v3509_v22 = vmax.f32 %v6761_v44, 0.0  ;;  %3595 = vrot.lane.b32.xlu1 %v3506_v49, %s5265_s20 }
 0x25c   : > { %v4963_v63 = vpop.f32.mrf.mxu1  ;;  %v3469_v14 = vpop.f32.mrf.mxu0 }
 0x25d   : > { %v6769_v18 = vadd.f32 %v5023_v35, %v3314_v27  ;;  %v4964_v46 = vadd.f32 %v4963_v63, %v4962_v37  ;;  %v6771_v43 = vadd.f32 %v3469_v14, %v3309_v8  ;;  %3601 = vrot.lane.b32.xlu0 %v3509_v22, %s5265_s20 }
 0x25f   : > { %v3511_v26 = vmax.f32 %v6769_v18, 0.0  ;;  %v3317_v55 = vadd.f32 %v4964_v46, %v3156_v17  ;;  %v3510_v13 = vmax.f32 %v6771_v43, 0.0 }
 0x261   : > { %v6778_v40 = vadd.f32 %v5024_v20, %v3317_v55  ;;  %3603 = vrot.lane.b32.xlu1 %v3510_v13, %s5265_s20  ;;  %3605 = vrot.lane.b32.xlu0 %v3511_v26, %s5265_s20 }
 0x263   : > { %v3512_v53 = vmax.f32 %v6778_v40, 0.0 }
 0x265   : > { %3607 = vrot.lane.b32.xlu1 %v3512_v53, %s5265_s20  ;;  %s161_s20 = sand.u32 1, %s5255_s13  }
 0x266   : > { %s3832_s10 = sshll.u32 %s161_s20, 6  ;;  %s6902_s28 = scalar_lea.sflag [#allocation5], %s161_s20 }
 0x267   : > { %s6817_s17 = scalar_lea.vmem [#allocation4], %s3832_s10 }
 0x268   : > { %s3766_s24 = sshll.u32 %s6817_s17, 4  ;;  %s6896_s24 = int_to_ptr.vmem [resolvable:$true] %s3766_s24 }
 0x269   : > { %s5203_s16 = scalar_lea.vmem %s6896_s24, 1024  ;;  %p5210_p0 = scmp.lt.s32.totalorder %s6896_s24, %s5208_s30 }
 0x26a   : > { %p5204_p11 = scmp.ne.s32.totalorder %s6896_s24, %s5203_s16  ;;  %p5211_p1 = scmp.lt.s32.totalorder %s5209_s4, %s5203_s16 }
 0x26c   : > { %p5205_p12 = pnand %p5204_p11, %p5327_p5  ;;  %p5212_p2 = por %p5211_p1, %p5210_p0 }
 0x26e   : > { %p5206_p13 = pneg %p5205_p12 }
 0x270   : > { %p5213_p3 = pnand %p5212_p2, %p5206_p13 }
 0x295   : > { %v3550_v27 = vpop.permute.xlu0 %3549 }
 0x296   : > { %v3643_v20 = vadd.f32 %v3550_v27, %v3483_v29 }
 0x299   : > { %v3552_v37 = vpop.permute.xlu1 %3551  ;;  %v3546_v57 = vpop.permute.xlu0 %3545 }
 0x29a   : > { %v3641_v35 = vadd.f32 %v3546_v57, %v3481_v34  ;;  %v3644_v63 = vadd.f32 %v3552_v37, %v3484_v6 }
 0x29c   : > { %v3673_v54 = vmax.f32 %v3641_v35, %v3643_v20 }
 0x29d   : > { %v3548_v23 = vpop.permute.xlu1 %3547  ;;  %v3558_v8 = vpop.permute.xlu0 %3557 }
 0x29e   : > { %3689 = vst.msk [vmem:[#allocation3] sm:$0xff] %vm2949_vm2, %v3673_v54  ;;  %v3642_v14 = vadd.f32 %v3548_v23, %v3482_v41  ;;  %v3647_v32 = vadd.f32 %v3558_v8, %v3487_v62  ;;  %v6997_v8 = vmax.f32 %v6631_v28, 0.0 }
 0x2a0   : > { %v3674_v17 = vmax.f32 %v3642_v14, %v3644_v63  ;;  %v6998_v14 = vmax.f32 %v6646_v61, 0.0 }
 0x2a1   : > { %v3560_v46 = vpop.permute.xlu1 %3559  ;;  %v3554_v55 = vpop.permute.xlu0 %3553 }
 0x2a2   : > { %3690 = vst.msk [vmem:[#allocation3 + $0x8] sm:$0xff] %vm2949_vm2, %v3674_v17  ;;  %v3645_v51 = vadd.f32 %v3554_v55, %v3485_v10  ;;  %v3648_v6 = vadd.f32 %v3560_v46, %v3488_v36 }
 0x2a4   : > { %v3675_v29 = vmax.f32 %v3645_v51, %v3647_v32  ;;  %v6999_v32 = vmax.f32 %v6653_v38, 0.0 }
 0x2a5   : > { %v3556_v56 = vpop.permute.xlu1 %3555  ;;  %v3566_v34 = vpop.permute.xlu0 %3565 }
 0x2a6   : > { %3691 = vst.msk [vmem:[#allocation3 + $0x10] sm:$0xff] %vm2949_vm2, %v3675_v29  ;;  %v3646_v2 = vadd.f32 %v3556_v56, %v3486_v52  ;;  %v3651_v37 = vadd.f32 %v3566_v34, %v3491_v31  ;;  %v7000_v29 = vmax.f32 %v6666_v42, 0.0 }
 0x2a8   : > { %v3676_v41 = vmax.f32 %v3646_v2, %v3648_v6  ;;  %v7001_v6 = vmax.f32 %v6673_v16, 0.0 }
 0x2a9   : > { %v3705_v3 = vld [vmem:[#allocation3] ss:$2 sm:$0xff]  ;;  %v3721_v62 = vld [vmem:[#allocation3 + $0x1] ss:$2 sm:$0xff]  ;;  %v3568_v27 = vpop.permute.xlu1 %3567  ;;  %v3562_v0 = vpop.permute.xlu0 %3561 }
 0x2aa   : > { %v3736_v10 = vmax.f32 %v3705_v3, %v3721_v62  ;;  %3692 = vst.msk [vmem:[#allocation3 + $0x18] sm:$0xff] %vm2949_vm2, %v3676_v41  ;;  %v3649_v30 = vadd.f32 %v3562_v0, %v3489_v12  ;;  %v3652_v57 = vadd.f32 %v3568_v27, %v3492_v39  ;;  %v7002_v41 = vmax.f32 %v6686_v50, 0.0 }
 0x2ac   : > { %v3677_v36 = vmax.f32 %v3649_v30, %v3651_v37  ;;  %3744 = vst.msk [vmem:[%s6817_s17] sm:$0xff] %vm2949_vm2, %v3736_v10  ;;  %v7003_v37 = vmax.f32 %v6691_v9, 0.0 }
 0x2ad   : > { %v3564_v15 = vpop.permute.xlu1 %3563  ;;  %v3574_v52 = vpop.permute.xlu0 %3573 }
 0x2ae   : > { %3693 = vst.msk [vmem:[#allocation3 + $0x20] sm:$0xff] %vm2949_vm2, %v3677_v36  ;;  %v3650_v60 = vadd.f32 %v3564_v15, %v3490_v59  ;;  %v3655_v23 = vadd.f32 %v3574_v52, %v3495_v58  ;;  %v7004_v36 = vmax.f32 %v6702_v1, 0.0 }
 0x2b0   : > { %v3678_v31 = vmax.f32 %v3650_v60, %v3652_v57  ;;  %v7005_v57 = vmax.f32 %v6706_v4, 0.0 }
 0x2b1   : > { %v3707_v48 = vld [vmem:[#allocation3 + $0x10] ss:$2 sm:$0xff]  ;;  %v3723_v12 = vld [vmem:[#allocation3 + $0x11] ss:$2 sm:$0xff]  ;;  %v3576_v20 = vpop.permute.xlu1 %3575  ;;  %v3570_v35 = vpop.permute.xlu0 %3569 }
 0x2b2   : > { %v3737_v54 = vmax.f32 %v3707_v48, %v3723_v12  ;;  %3694 = vst.msk [vmem:[#allocation3 + $0x28] sm:$0xff] %vm2949_vm2, %v3678_v31  ;;  %v3653_v25 = vadd.f32 %v3570_v35, %v3493_v33  ;;  %v3656_v63 = vadd.f32 %v3576_v20, %v6997_v8  ;;  %v7006_v31 = vmax.f32 %v6718_v45, 0.0 }
 0x2b4   : > { %v3679_v39 = vmax.f32 %v3653_v25, %v3655_v23  ;;  %3745 = vst.msk [vmem:[%s6817_s17 + $0x8] sm:$0xff] %vm2949_vm2, %v3737_v54  ;;  %v7007_v23 = vmax.f32 %v6722_v11, 0.0 }
 0x2b5   : > { %v3572_v21 = vpop.permute.xlu1 %3571  ;;  %v3582_v59 = vpop.permute.xlu0 %3581 }
 0x2b6   : > { %3695 = vst.msk [vmem:[#allocation3 + $0x30] sm:$0xff] %vm2949_vm2, %v3679_v39  ;;  %v3654_v17 = vadd.f32 %v3572_v21, %v6998_v14  ;;  %v3659_v51 = vadd.f32 %v3582_v59, %v6999_v32  ;;  %v7008_v39 = vmax.f32 %v6734_v24, 0.0  ;;  %v7009_v59 = vmax.f32 %v6736_v19, 0.0 }
 0x2b8   : > { %v3680_v46 = vmax.f32 %v3654_v17, %v3656_v63 }
 0x2b9   : > { %v3709_v5 = vld [vmem:[#allocation3 + $0x20] ss:$2 sm:$0xff]  ;;  %v3725_v58 = vld [vmem:[#allocation3 + $0x21] ss:$2 sm:$0xff]  ;;  %v3584_v55 = vpop.permute.xlu1 %3583  ;;  %v3578_v47 = vpop.permute.xlu0 %3577 }
 0x2ba   : > { %v3738_v33 = vmax.f32 %v3709_v5, %v3725_v58  ;;  %3696 = vst.msk [vmem:[#allocation3 + $0x38] sm:$0xff] %vm2949_vm2, %v3680_v46  ;;  %v3657_v28 = vadd.f32 %v3578_v47, %v7000_v29  ;;  %v3660_v2 = vadd.f32 %v3584_v55, %v7001_v6 }
 0x2bc   : > { %v3681_v56 = vmax.f32 %v3657_v28, %v3659_v51  ;;  %3746 = vst.msk [vmem:[%s6817_s17 + $0x10] sm:$0xff] %vm2949_vm2, %v3738_v33 }
 0x2bd   : > { %v3580_v61 = vpop.permute.xlu1 %3579  ;;  %v3590_v34 = vpop.permute.xlu0 %3589 }
 0x2be   : > { %3697 = vst.msk [vmem:[#allocation3 + $0x40] sm:$0xff] %vm2949_vm2, %v3681_v56  ;;  %v3658_v3 = vadd.f32 %v3580_v61, %v7002_v41  ;;  %v3663_v30 = vadd.f32 %v3590_v34, %v7003_v37 }
 0x2c0   : > { %v3682_v62 = vmax.f32 %v3658_v3, %v3660_v2 }
 0x2c1   : > { %v3711_v38 = vld [vmem:[#allocation3 + $0x30] ss:$2 sm:$0xff]  ;;  %v3727_v27 = vld [vmem:[#allocation3 + $0x31] ss:$2 sm:$0xff]  ;;  %v3592_v0 = vpop.permute.xlu1 %3591  ;;  %v3586_v42 = vpop.permute.xlu0 %3585 }
 0x2c2   : > { %v3739_v10 = vmax.f32 %v3711_v38, %v3727_v27  ;;  %3698 = vst.msk [vmem:[#allocation3 + $0x48] sm:$0xff] %vm2949_vm2, %v3682_v62  ;;  %v3661_v16 = vadd.f32 %v3586_v42, %v7004_v36  ;;  %v3664_v60 = vadd.f32 %v3592_v0, %v7005_v57 }
 0x2c4   : > { %v3683_v15 = vmax.f32 %v3661_v16, %v3663_v30  ;;  %3747 = vst.msk [vmem:[%s6817_s17 + $0x18] sm:$0xff] %vm2949_vm2, %v3739_v10 }
 0x2c5   : > { %v3588_v50 = vpop.permute.xlu1 %3587  ;;  %v3598_v52 = vpop.permute.xlu0 %3597 }
 0x2c6   : > { %3699 = vst.msk [vmem:[#allocation3 + $0x50] sm:$0xff] %vm2949_vm2, %v3683_v15  ;;  %v3662_v48 = vadd.f32 %v3588_v50, %v7006_v31  ;;  %v3667_v25 = vadd.f32 %v3598_v52, %v7007_v23 }
 0x2c8   : > { %v3684_v12 = vmax.f32 %v3662_v48, %v3664_v60 }
 0x2c9   : > { %v3713_v9 = vld [vmem:[#allocation3 + $0x40] ss:$2 sm:$0xff]  ;;  %v3729_v20 = vld [vmem:[#allocation3 + $0x41] ss:$2 sm:$0xff]  ;;  %v3600_v35 = vpop.permute.xlu1 %3599  ;;  %v3594_v1 = vpop.permute.xlu0 %3593 }
 0x2ca   : > { %v3740_v54 = vmax.f32 %v3713_v9, %v3729_v20  ;;  %3700 = vst.msk [vmem:[#allocation3 + $0x58] sm:$0xff] %vm2949_vm2, %v3684_v12  ;;  %v3665_v4 = vadd.f32 %v3594_v1, %v7008_v39  ;;  %v3668_v8 = vadd.f32 %v3600_v35, %v7009_v59 }
 0x2cc   : > { %v3685_v21 = vmax.f32 %v3665_v4, %v3667_v25  ;;  %3748 = vst.msk [vmem:[%s6817_s17 + $0x20] sm:$0xff] %vm2949_vm2, %v3740_v54 }
 0x2cd   : > { %v3596_v45 = vpop.permute.xlu1 %3595 }
 0x2ce   : > { %3701 = vst.msk [vmem:[#allocation3 + $0x60] sm:$0xff] %vm2949_vm2, %v3685_v21  ;;  %v3666_v63 = vadd.f32 %v3596_v45, %v3506_v49 }
 0x2cf   : > { %v3602_v14 = vpop.permute.xlu0 %3601 }
 0x2d0   : > { %v3686_v17 = vmax.f32 %v3666_v63, %v3668_v8  ;;  %v3669_v19 = vadd.f32 %v3602_v14, %v3509_v22 }
 0x2d1   : > { %v3715_v11 = vld [vmem:[#allocation3 + $0x50] ss:$2 sm:$0xff]  ;;  %v3731_v46 = vld [vmem:[#allocation3 + $0x51] ss:$2 sm:$0xff] }
 0x2d2   : > { %v3741_v5 = vmax.f32 %v3715_v11, %v3731_v46  ;;  %3702 = vst.msk [vmem:[#allocation3 + $0x68] sm:$0xff] %vm2949_vm2, %v3686_v17 }
 0x2d3   : > { %v3604_v24 = vpop.permute.xlu1 %3603  ;;  %v3606_v58 = vpop.permute.xlu0 %3605 }
 0x2d4   : > { %v3671_v55 = vadd.f32 %v3606_v58, %v3511_v26  ;;  %3749 = vst.msk [vmem:[%s6817_s17 + $0x28] sm:$0xff] %vm2949_vm2, %v3741_v5  ;;  %v3670_v47 = vadd.f32 %v3604_v24, %v3510_v13 }
 0x2d6   : > { %v3687_v49 = vmax.f32 %v3669_v19, %v3671_v55 }
 0x2d7   : > { %v3608_v7 = vpop.permute.xlu1 %3607 }
 0x2d8   : > { %3703 = vst.msk [vmem:[#allocation3 + $0x70] sm:$0xff] %vm2949_vm2, %v3687_v49  ;;  %v3672_v33 = vadd.f32 %v3608_v7, %v3512_v53 }
 0x2d9   : > { %v3717_v44 = vld [vmem:[#allocation3 + $0x60] ss:$2 sm:$0xff]  ;;  %v3733_v32 = vld [vmem:[#allocation3 + $0x61] ss:$2 sm:$0xff] }
 0x2da   : > { %v3742_v22 = vmax.f32 %v3717_v44, %v3733_v32  ;;  %v3688_v18 = vmax.f32 %v3670_v47, %v3672_v33 }
 0x2dc   : > { %3704 = vst.msk [vmem:[#allocation3 + $0x78] sm:$0xff] %vm2949_vm2, %v3688_v18  ;;  %3750 = vst.msk [vmem:[%s6817_s17 + $0x30] sm:$0xff] %vm2949_vm2, %v3742_v22 }
 0x2e3   : > { %v3719_v43 = vld [vmem:[#allocation3 + $0x70] ss:$2 sm:$0xff]  ;;  %v3735_v26 = vld [vmem:[#allocation3 + $0x71] ss:$2 sm:$0xff] }
 0x2e4   : > { %v3743_v13 = vmax.f32 %v3719_v43, %v3735_v26 }
 0x2e6   : > { %3751 = vst.msk [vmem:[%s6817_s17 + $0x38] sm:$0xff] %vm2949_vm2, %v3743_v13 }
 0x2e7   : > { %5216 = shalt.err (!%p5213_p3)
}
 0x2e8   : > { %s5217_s5 = scalar_lea.hbm %s6894_s27, 1024  ;;  %s5221_s8 = scalar_lea.hbm %s6945_s3, 2048 }
 0x2e9   : > { %p5218_p4 = scmp.ne.s32.totalorder %s6894_s27, %s5217_s5  ;;  %p5222_p9 = scmp.lt.s32.totalorder %s6894_s27, %s6945_s3 }
 0x2ea   : > { %p5223_p10 = scmp.lt.s32.totalorder %s5221_s8, %s5217_s5 }
 0x2eb   : > { %p5219_p7 = pnand %p5218_p4, %p5327_p5 }
 0x2ec   : > { %p5224_p11 = por %p5223_p10, %p5222_p9 }
 0x2ed   : > { %p5220_p8 = pneg %p5219_p7 }
 0x2ef   : > { %p5225_p12 = pnand %p5224_p11, %p5220_p8 }
 0x2f1   : > { %5228 = shalt.err (!%p5225_p12)
}
 0x2f2   : > { %s5267_s20 = smov 128   ;;  %s5268_s10 = smov 8  }
 0x2f3   : > { %5042 = dma.vmem_to_hbm [thread:$0]  (%p5327_p5), %s6896_s24, 1024, %s6894_s27, %s6902_s28, %s5267_s20, %s5267_s20, %s5268_s10  }
 0x2f4 PF: > { %p5048_p13 = scmp.ge.s32.totalorder %s5263_s15, 2  ;;  %s3781_s17 = sand.u32 1, %s5251_s12  }
 0x2f5   : > { %s3782_s19 = scalar_lea.sflag [#allocation5], %s3781_s17 }
 0x2f6   : > { %p5045_p0 = pnand %p5048_p13, %p5331_p6 }
 0x2f8   : > { %p5046_p1 = pneg %p5045_p0 }
 0x2fa   : > { %5246 = dma.done.wait (%p5046_p1), %s3782_s19, 1024  }
 0x2fb   : > { %5248 = vsyncadd (%p5046_p1), %s3782_s19, 4294966272  ;;  %p13_p2 = scmp.ge.s32.totalorder %s5314_s18, 4   ;;  %s7010_s12 = smov %s5255_s13 }
 0x2fc   : > { %s7011_s13 = smov %s5259_s14  ;;  %s7012_s14 = smov %s5325_s21 }
 0x2fd   : > { %s7013_s15 = smov %s5314_s18  ;;  %15 = sbr.rel (!%p13_p2) target bundleno = 3 (0x3), region = 84 }
 0x302   :  { %3787 = vsyncpa [#allocation5], 1 }
 0x303   :  { %3789 = vsyncpa [#allocation5 + $0x1], 1 }

</bundles_post_ra>
